<compile_context>
chip_gen: v7x
topology: tpu7x:2x2x1
jax: 0.10.0
libtpu: 0.0.40
codegen_flags: <defaults>
</compile_context>

<pallas_src>
import jax
import jax.numpy as jnp
from jax.experimental import pallas as pl
from jax.experimental.pallas import tpu as pltpu

EPS = 1e-12        # torch F.normalize eps
N_LAYERS = 9


# ----------------------------- fused kernel -------------------------------- #

def _branch_kernel(adj_ref, gc1_ref, gck_ref,
                   w1_ref, b1_ref, w2_ref, b2_ref, w3r_ref, b3_ref,
                   out_ref, x_scr):
    """One grid step == one branch (adj1 or adj2): 9 GNN layers + deferred MLP."""
    n = out_ref.shape[0]

    adj = adj_ref[...]                                   # (N, N) bf16 (wrapper-cast)

    def l2norm(h):
        # x / max(||x||_2, eps)  ==  x * rsqrt(max(||x||^2, eps^2))   (EUP rsqrt)
        ss = jnp.sum(h * h, axis=1, keepdims=True)
        return h * jax.lax.rsqrt(jnp.maximum(ss, EPS * EPS))

    # ---- 9 GNN layers; each layer output goes into the VMEM scratch --------
    # gc1 (GNN_Layer_Init): adj @ W1
    h = jnp.dot(adj, gc1_ref[...], preferred_element_type=jnp.float32)
    x = l2norm(jnp.maximum(h, 0.0))
    x_bf = x.astype(jnp.bfloat16)
    x_scr[pl.ds(0, n), :] = x_bf

    # gc2 .. gc9 (GNN_Layer): adj @ (x @ Wk); gc9 output is NOT normalized.
    for k in range(N_LAYERS - 1):
        support = jnp.dot(x_bf, gck_ref[k], preferred_element_type=jnp.float32)
        h = jnp.dot(adj, support.astype(jnp.bfloat16),
                    preferred_element_type=jnp.float32)
        h = jnp.maximum(h, 0.0)
        x = l2norm(h) if k < N_LAYERS - 2 else h
        x_bf = x.astype(jnp.bfloat16)
        x_scr[pl.ds((k + 1) * n, n), :] = x_bf

    # ---- deferred MLP: one pass over all 9 stacked layer outputs -----------
    xa = x_scr[...]                                      # (9N, NHID) bf16
    h1 = jnp.dot(xa, w1_ref[...], preferred_element_type=jnp.float32) + b1_ref[...]
    h1 = jnp.maximum(h1, 0.0)
    h2 = jnp.dot(h1.astype(jnp.bfloat16), w2_ref[...],
                 preferred_element_type=jnp.float32) + b2_ref[...]
    h2 = jnp.maximum(h2, 0.0)                            # (9N, 2*NHID) f32

    # Final Linear is linear => combine the 9 layer contributions first:
    #   sum_k (h2_k @ w3 + b3) = (sum_k h2_k) @ w3 + 9*b3
    h2_sum = h2[0:n, :]
    for k in range(1, N_LAYERS):
        h2_sum = h2_sum + h2[k * n:(k + 1) * n, :]

    # width-1 output layer on the VPU (+ lane reduce) instead of the MXU.
    score = jnp.sum(h2_sum * w3r_ref[...], axis=1, keepdims=True)    # (N, 1) f32
    out_ref[...] = score + jnp.float32(N_LAYERS) * b3_ref[...]


# ------------------------------- wrapper ------------------------------------ #

def gnn_bet8_forward(params, adj1, adj2):
    n = adj1.shape[0]
    nin, nhid = params["gc1"].shape
    w1, b1, w2, b2, w3, b3 = params["mlp"]
    nhid2 = w1.shape[1]

    # bf16 MXU operands prepared in the wrapper (halves adj DMA bytes, removes
    # in-kernel N^2 cast).  Accumulation stays f32 inside the kernel.
    adj = jnp.stack([adj1, adj2]).astype(jnp.bfloat16)                    # (2, N, N)
    gc1 = params["gc1"].astype(jnp.bfloat16)                              # (N, H)
    gck = jnp.stack([params[f"gc{k}"] for k in range(2, 10)]
                    ).astype(jnp.bfloat16)                                # (8, H, H)
    w1_bf = w1.astype(jnp.bfloat16)
    w2_bf = w2.astype(jnp.bfloat16)
    w3_row = jnp.reshape(w3, (1, nhid2))          # (1, 2H), stays f32 (VPU operand)

    def rep(shape):
        # Full-array block, replicated (constant index) across the branch axis.
        nd = len(shape)
        return pl.BlockSpec(shape, lambda b, nd=nd: (0,) * nd)

    # Advisory cost estimate so XLA schedules around the long fused call.
    gnn_flops = 2 * n * n * nhid + 8 * (2 * n * nhid * nhid + 2 * n * n * nhid)
    mlp_flops = (2 * N_LAYERS * n * nhid * nhid2
                 + 2 * N_LAYERS * n * nhid2 * nhid2
                 + 2 * n * nhid2)
    cost = pl.CostEstimate(
        flops=2 * (gnn_flops + mlp_flops),
        transcendentals=2 * 8 * n,                    # rsqrt per normalized row
        bytes_accessed=(adj.size * 2 + gc1.size * 2 + gck.size * 2
                        + w1_bf.size * 2 + w2_bf.size * 2
                        + (b1.size + b2.size + w3_row.size + b3.size) * 4
                        + 2 * n * 4))

    scores = pl.pallas_call(
        _branch_kernel,
        out_shape=jax.ShapeDtypeStruct((2, n, 1), jnp.float32),
        grid_spec=pltpu.PrefetchScalarGridSpec(
            num_scalar_prefetch=0,
            grid=(2,),
            in_specs=[
                pl.BlockSpec((pl.Squeezed(), n, n), lambda b: (b, 0, 0)),  # adj
                rep((nin, nhid)),                                          # gc1
                rep((8, nhid, nhid)),                                      # gc2..9
                rep(w1_bf.shape), rep(b1.shape),
                rep(w2_bf.shape), rep(b2.shape),
                rep(w3_row.shape), rep(b3.shape),
            ],
            out_specs=pl.BlockSpec((pl.Squeezed(), n, 1), lambda b: (b, 0, 0)),
            scratch_shapes=[pltpu.VMEM((N_LAYERS * n, nhid), jnp.bfloat16)],
        ),
        compiler_params=pltpu.CompilerParams(
            dimension_semantics=("parallel",),
            vmem_limit_bytes=48 * 1024 * 1024),
        cost_estimate=cost,
    )(adj, gc1, gck, w1_bf, b1, w2_bf, b2, w3_row, b3)

    return scores[0] * scores[1]


# --------------------------- parameter init --------------------------------- #

def init_params(key, ninput, nhid):
    ks = jax.random.split(key, 16)

    def gcn_w(k, fan_in, fan_out):
        # mirrors GNN layer reset_parameters: uniform(-stdv, stdv), stdv = 1/sqrt(out)
        stdv = 1.0 / jnp.sqrt(jnp.float32(fan_out))
        return jax.random.uniform(k, (fan_in, fan_out), jnp.float32, -stdv, stdv)

    def lin(kw, kb, fan_in, fan_out):
        bound = 1.0 / jnp.sqrt(jnp.float32(fan_in))
        w = jax.random.uniform(kw, (fan_in, fan_out), jnp.float32, -bound, bound)
        b = jax.random.uniform(kb, (1, fan_out), jnp.float32, -bound, bound)
        return w, b

    params = {"gc1": gcn_w(ks[0], ninput, nhid)}
    for i in range(2, 10):
        params[f"gc{i}"] = gcn_w(ks[i - 1], nhid, nhid)

    w1, b1 = lin(ks[9], ks[10], nhid, 2 * nhid)
    w2, b2 = lin(ks[11], ks[12], 2 * nhid, 2 * nhid)
    w3, b3 = lin(ks[13], ks[14], 2 * nhid, 1)
    params["mlp"] = (w1, b1, w2, b2, w3, b3)
    return params


# --------------------------------- main -------------------------------------- #

if __name__ == "__main__":
    N = 128      # nodes == ninput (gc1 multiplies adj (N,N) by W (ninput, nhid))
    NHID = 32

    key = jax.random.PRNGKey(0)
    kp, ka1, ka2, km1, km2 = jax.random.split(key, 5)

    params = init_params(kp, N, NHID)

    def make_adj(kv, km):
        vals = jax.random.uniform(kv, (N, N), jnp.float32)
        mask = (jax.random.uniform(km, (N, N)) < 0.1).astype(jnp.float32)
        a = vals * mask + jnp.eye(N, dtype=jnp.float32)
        # row-normalize (stands in for the sparse normalized adjacency)
        return a / jnp.sum(a, axis=1, keepdims=True)

    adj1 = make_adj(ka1, km1)
    adj2 = make_adj(ka2, km2)

    fwd = jax.jit(gnn_bet8_forward)
    out = fwd(params, adj1, adj2)
    out = jax.block_until_ready(out)

    assert out.shape == (N, 1) and out.dtype == jnp.float32
    assert bool(jnp.all(jnp.isfinite(out)))
    print("KERNEL_OK")
</pallas_src>

<mosaic_0001>
module attributes {stable_mosaic.version = 11 : i64} {
  func.func @_branch_kernel(%arg0: i32, %arg1: memref<1x128x128xbf16, #tpu.memory_space<vmem>>, %arg2: memref<128x32xbf16, #tpu.memory_space<vmem>>, %arg3: memref<8x32x32xbf16, #tpu.memory_space<vmem>>, %arg4: memref<32x64xbf16, #tpu.memory_space<vmem>>, %arg5: memref<1x64xf32, #tpu.memory_space<vmem>>, %arg6: memref<64x64xbf16, #tpu.memory_space<vmem>>, %arg7: memref<1x64xf32, #tpu.memory_space<vmem>>, %arg8: memref<1x64xf32, #tpu.memory_space<vmem>>, %arg9: memref<1x1xf32, #tpu.memory_space<vmem>>, %arg10: memref<1x128x1xf32, #tpu.memory_space<vmem>>, %arg11: memref<1152x32xbf16, #tpu.memory_space<vmem>>) attributes {dimension_semantics = [#tpu.dimension_semantics<parallel>], iteration_bounds = array<i64: 2>, scalar_prefetch = 0 : i64, scratch_operands = 1 : i64, tpu.core_type = #tpu.core_type<tc>, window_params = [{transform_indices = @transform_0, window_bounds = array<i64: 1, 128, 128>}, {pipeline_mode = #tpu.pipeline_mode<synchronous>, transform_indices = @transform_1, window_bounds = array<i64: 128, 32>}, {pipeline_mode = #tpu.pipeline_mode<synchronous>, transform_indices = @transform_2, window_bounds = array<i64: 8, 32, 32>}, {pipeline_mode = #tpu.pipeline_mode<synchronous>, transform_indices = @transform_3, window_bounds = array<i64: 32, 64>}, {pipeline_mode = #tpu.pipeline_mode<synchronous>, transform_indices = @transform_4, window_bounds = array<i64: 1, 64>}, {pipeline_mode = #tpu.pipeline_mode<synchronous>, transform_indices = @transform_5, window_bounds = array<i64: 64, 64>}, {pipeline_mode = #tpu.pipeline_mode<synchronous>, transform_indices = @transform_6, window_bounds = array<i64: 1, 64>}, {pipeline_mode = #tpu.pipeline_mode<synchronous>, transform_indices = @transform_7, window_bounds = array<i64: 1, 64>}, {pipeline_mode = #tpu.pipeline_mode<synchronous>, transform_indices = @transform_8, window_bounds = array<i64: 1, 1>}, {transform_indices = @transform_9, window_bounds = array<i64: 1, 128, 1>}]} {
    %c0 = arith.constant 0 : index
    %c0_0 = arith.constant 0 : index
    %c0_1 = arith.constant 0 : index
    %0 = vector.load %arg1[%c0, %c0_0, %c0_1] : memref<1x128x128xbf16, #tpu.memory_space<vmem>>, vector<1x128x128xbf16>
    %1 = vector.shape_cast %0 : vector<1x128x128xbf16> to vector<128x128xbf16>
    %c0_2 = arith.constant 0 : index
    %c0_3 = arith.constant 0 : index
    %2 = vector.load %arg2[%c0_2, %c0_3] : memref<128x32xbf16, #tpu.memory_space<vmem>>, vector<128x32xbf16>
    %cst = arith.constant dense<0.000000e+00> : vector<128x32xf32>
    %3 = tpu.matmul %1, %2, %cst {dimension_numbers = #tpu.dot_dimension_numbers<[1], [0], [0], [1], [0, 0, 1, 1], [], []>} : vector<128x128xbf16>, vector<128x32xbf16>, vector<128x32xf32> -> vector<128x32xf32>
    %cst_4 = arith.constant 0.000000e+00 : f32
    %4 = vector.broadcast %cst_4 : f32 to vector<128x32xf32>
    %5 = arith.maximumf %3, %4 : vector<128x32xf32>
    %6 = arith.mulf %5, %5 : vector<128x32xf32>
    %cst_5 = arith.constant dense<0.000000e+00> : vector<128xf32>
    %7 = vector.multi_reduction <add>, %6, %cst_5 [1] : vector<128x32xf32> to vector<128xf32>
    %8 = vector.shape_cast %7 : vector<128xf32> to vector<128x1xf32>
    %cst_6 = arith.constant 1.000000e-24 : f32
    %9 = vector.broadcast %cst_6 : f32 to vector<128x1xf32>
    %10 = arith.maximumf %8, %9 : vector<128x1xf32>
    %11 = math.rsqrt %10 : vector<128x1xf32>
    %12 = vector.broadcast %11 : vector<128x1xf32> to vector<128x32xf32>
    %13 = arith.mulf %5, %12 : vector<128x32xf32>
    %14 = arith.truncf %13 : vector<128x32xf32> to vector<128x32xbf16>
    %c0_7 = arith.constant 0 : index
    %c0_8 = arith.constant 0 : index
    %15 = vector.load %arg11[%c0_7, %c0_8] : memref<1152x32xbf16, #tpu.memory_space<vmem>>, vector<128x32xbf16>
    tpu.vector_store %arg11[%c0_7, %c0_8], %14 {strides = array<i32>} : memref<1152x32xbf16, #tpu.memory_space<vmem>>, vector<128x32xbf16>,
    %c0_9 = arith.constant 0 : index
    %c0_10 = arith.constant 0 : index
    %c0_11 = arith.constant 0 : index
    %16 = vector.load %arg3[%c0_9, %c0_10, %c0_11] : memref<8x32x32xbf16, #tpu.memory_space<vmem>>, vector<1x32x32xbf16>
    %17 = vector.shape_cast %16 : vector<1x32x32xbf16> to vector<32x32xbf16>
    %cst_12 = arith.constant dense<0.000000e+00> : vector<128x32xf32>
    %18 = tpu.matmul %14, %17, %cst_12 {dimension_numbers = #tpu.dot_dimension_numbers<[1], [0], [0], [1], [0, 0, 1, 1], [], []>} : vector<128x32xbf16>, vector<32x32xbf16>, vector<128x32xf32> -> vector<128x32xf32>
    %19 = arith.truncf %18 : vector<128x32xf32> to vector<128x32xbf16>
    %cst_13 = arith.constant dense<0.000000e+00> : vector<128x32xf32>
    %20 = tpu.matmul %1, %19, %cst_13 {dimension_numbers = #tpu.dot_dimension_numbers<[1], [0], [0], [1], [0, 0, 1, 1], [], []>} : vector<128x128xbf16>, vector<128x32xbf16>, vector<128x32xf32> -> vector<128x32xf32>
    %cst_14 = arith.constant 0.000000e+00 : f32
    %21 = vector.broadcast %cst_14 : f32 to vector<128x32xf32>
    %22 = arith.maximumf %20, %21 : vector<128x32xf32>
    %23 = arith.mulf %22, %22 : vector<128x32xf32>
    %cst_15 = arith.constant dense<0.000000e+00> : vector<128xf32>
    %24 = vector.multi_reduction <add>, %23, %cst_15 [1] : vector<128x32xf32> to vector<128xf32>
    %25 = vector.shape_cast %24 : vector<128xf32> to vector<128x1xf32>
    %cst_16 = arith.constant 1.000000e-24 : f32
    %26 = vector.broadcast %cst_16 : f32 to vector<128x1xf32>
    %27 = arith.maximumf %25, %26 : vector<128x1xf32>
    %28 = math.rsqrt %27 : vector<128x1xf32>
    %29 = vector.broadcast %28 : vector<128x1xf32> to vector<128x32xf32>
    %30 = arith.mulf %22, %29 : vector<128x32xf32>
    %31 = arith.truncf %30 : vector<128x32xf32> to vector<128x32xbf16>
    %c128 = arith.constant 128 : index
    %c0_17 = arith.constant 0 : index
    %32 = vector.load %arg11[%c128, %c0_17] : memref<1152x32xbf16, #tpu.memory_space<vmem>>, vector<128x32xbf16>
    tpu.vector_store %arg11[%c128, %c0_17], %31 {strides = array<i32>} : memref<1152x32xbf16, #tpu.memory_space<vmem>>, vector<128x32xbf16>,
    %c1 = arith.constant 1 : index
    %c0_18 = arith.constant 0 : index
    %c0_19 = arith.constant 0 : index
    %33 = vector.load %arg3[%c1, %c0_18, %c0_19] : memref<8x32x32xbf16, #tpu.memory_space<vmem>>, vector<1x32x32xbf16>
    %34 = vector.shape_cast %33 : vector<1x32x32xbf16> to vector<32x32xbf16>
    %cst_20 = arith.constant dense<0.000000e+00> : vector<128x32xf32>
    %35 = tpu.matmul %31, %34, %cst_20 {dimension_numbers = #tpu.dot_dimension_numbers<[1], [0], [0], [1], [0, 0, 1, 1], [], []>} : vector<128x32xbf16>, vector<32x32xbf16>, vector<128x32xf32> -> vector<128x32xf32>
    %36 = arith.truncf %35 : vector<128x32xf32> to vector<128x32xbf16>
    %cst_21 = arith.constant dense<0.000000e+00> : vector<128x32xf32>
    %37 = tpu.matmul %1, %36, %cst_21 {dimension_numbers = #tpu.dot_dimension_numbers<[1], [0], [0], [1], [0, 0, 1, 1], [], []>} : vector<128x128xbf16>, vector<128x32xbf16>, vector<128x32xf32> -> vector<128x32xf32>
    %cst_22 = arith.constant 0.000000e+00 : f32
    %38 = vector.broadcast %cst_22 : f32 to vector<128x32xf32>
    %39 = arith.maximumf %37, %38 : vector<128x32xf32>
    %40 = arith.mulf %39, %39 : vector<128x32xf32>
    %cst_23 = arith.constant dense<0.000000e+00> : vector<128xf32>
    %41 = vector.multi_reduction <add>, %40, %cst_23 [1] : vector<128x32xf32> to vector<128xf32>
    %42 = vector.shape_cast %41 : vector<128xf32> to vector<128x1xf32>
    %cst_24 = arith.constant 1.000000e-24 : f32
    %43 = vector.broadcast %cst_24 : f32 to vector<128x1xf32>
    %44 = arith.maximumf %42, %43 : vector<128x1xf32>
    %45 = math.rsqrt %44 : vector<128x1xf32>
    %46 = vector.broadcast %45 : vector<128x1xf32> to vector<128x32xf32>
    %47 = arith.mulf %39, %46 : vector<128x32xf32>
    %48 = arith.truncf %47 : vector<128x32xf32> to vector<128x32xbf16>
    %c256 = arith.constant 256 : index
    %c0_25 = arith.constant 0 : index
    %49 = vector.load %arg11[%c256, %c0_25] : memref<1152x32xbf16, #tpu.memory_space<vmem>>, vector<128x32xbf16>
    tpu.vector_store %arg11[%c256, %c0_25], %48 {strides = array<i32>} : memref<1152x32xbf16, #tpu.memory_space<vmem>>, vector<128x32xbf16>,
    %c2 = arith.constant 2 : index
    %c0_26 = arith.constant 0 : index
    %c0_27 = arith.constant 0 : index
    %50 = vector.load %arg3[%c2, %c0_26, %c0_27] : memref<8x32x32xbf16, #tpu.memory_space<vmem>>, vector<1x32x32xbf16>
    %51 = vector.shape_cast %50 : vector<1x32x32xbf16> to vector<32x32xbf16>
    %cst_28 = arith.constant dense<0.000000e+00> : vector<128x32xf32>
    %52 = tpu.matmul %48, %51, %cst_28 {dimension_numbers = #tpu.dot_dimension_numbers<[1], [0], [0], [1], [0, 0, 1, 1], [], []>} : vector<128x32xbf16>, vector<32x32xbf16>, vector<128x32xf32> -> vector<128x32xf32>
    %53 = arith.truncf %52 : vector<128x32xf32> to vector<128x32xbf16>
    %cst_29 = arith.constant dense<0.000000e+00> : vector<128x32xf32>
    %54 = tpu.matmul %1, %53, %cst_29 {dimension_numbers = #tpu.dot_dimension_numbers<[1], [0], [0], [1], [0, 0, 1, 1], [], []>} : vector<128x128xbf16>, vector<128x32xbf16>, vector<128x32xf32> -> vector<128x32xf32>
    %cst_30 = arith.constant 0.000000e+00 : f32
    %55 = vector.broadcast %cst_30 : f32 to vector<128x32xf32>
    %56 = arith.maximumf %54, %55 : vector<128x32xf32>
    %57 = arith.mulf %56, %56 : vector<128x32xf32>
    %cst_31 = arith.constant dense<0.000000e+00> : vector<128xf32>
    %58 = vector.multi_reduction <add>, %57, %cst_31 [1] : vector<128x32xf32> to vector<128xf32>
    %59 = vector.shape_cast %58 : vector<128xf32> to vector<128x1xf32>
    %cst_32 = arith.constant 1.000000e-24 : f32
    %60 = vector.broadcast %cst_32 : f32 to vector<128x1xf32>
    %61 = arith.maximumf %59, %60 : vector<128x1xf32>
    %62 = math.rsqrt %61 : vector<128x1xf32>
    %63 = vector.broadcast %62 : vector<128x1xf32> to vector<128x32xf32>
    %64 = arith.mulf %56, %63 : vector<128x32xf32>
    %65 = arith.truncf %64 : vector<128x32xf32> to vector<128x32xbf16>
    %c384 = arith.constant 384 : index
    %c0_33 = arith.constant 0 : index
    %66 = vector.load %arg11[%c384, %c0_33] : memref<1152x32xbf16, #tpu.memory_space<vmem>>, vector<128x32xbf16>
    tpu.vector_store %arg11[%c384, %c0_33], %65 {strides = array<i32>} : memref<1152x32xbf16, #tpu.memory_space<vmem>>, vector<128x32xbf16>,
    %c3 = arith.constant 3 : index
    %c0_34 = arith.constant 0 : index
    %c0_35 = arith.constant 0 : index
    %67 = vector.load %arg3[%c3, %c0_34, %c0_35] : memref<8x32x32xbf16, #tpu.memory_space<vmem>>, vector<1x32x32xbf16>
    %68 = vector.shape_cast %67 : vector<1x32x32xbf16> to vector<32x32xbf16>
    %cst_36 = arith.constant dense<0.000000e+00> : vector<128x32xf32>
    %69 = tpu.matmul %65, %68, %cst_36 {dimension_numbers = #tpu.dot_dimension_numbers<[1], [0], [0], [1], [0, 0, 1, 1], [], []>} : vector<128x32xbf16>, vector<32x32xbf16>, vector<128x32xf32> -> vector<128x32xf32>
    %70 = arith.truncf %69 : vector<128x32xf32> to vector<128x32xbf16>
    %cst_37 = arith.constant dense<0.000000e+00> : vector<128x32xf32>
    %71 = tpu.matmul %1, %70, %cst_37 {dimension_numbers = #tpu.dot_dimension_numbers<[1], [0], [0], [1], [0, 0, 1, 1], [], []>} : vector<128x128xbf16>, vector<128x32xbf16>, vector<128x32xf32> -> vector<128x32xf32>
    %cst_38 = arith.constant 0.000000e+00 : f32
    %72 = vector.broadcast %cst_38 : f32 to vector<128x32xf32>
    %73 = arith.maximumf %71, %72 : vector<128x32xf32>
    %74 = arith.mulf %73, %73 : vector<128x32xf32>
    %cst_39 = arith.constant dense<0.000000e+00> : vector<128xf32>
    %75 = vector.multi_reduction <add>, %74, %cst_39 [1] : vector<128x32xf32> to vector<128xf32>
    %76 = vector.shape_cast %75 : vector<128xf32> to vector<128x1xf32>
    %cst_40 = arith.constant 1.000000e-24 : f32
    %77 = vector.broadcast %cst_40 : f32 to vector<128x1xf32>
    %78 = arith.maximumf %76, %77 : vector<128x1xf32>
    %79 = math.rsqrt %78 : vector<128x1xf32>
    %80 = vector.broadcast %79 : vector<128x1xf32> to vector<128x32xf32>
    %81 = arith.mulf %73, %80 : vector<128x32xf32>
    %82 = arith.truncf %81 : vector<128x32xf32> to vector<128x32xbf16>
    %c512 = arith.constant 512 : index
    %c0_41 = arith.constant 0 : index
    %83 = vector.load %arg11[%c512, %c0_41] : memref<1152x32xbf16, #tpu.memory_space<vmem>>, vector<128x32xbf16>
    tpu.vector_store %arg11[%c512, %c0_41], %82 {strides = array<i32>} : memref<1152x32xbf16, #tpu.memory_space<vmem>>, vector<128x32xbf16>,
    %c4 = arith.constant 4 : index
    %c0_42 = arith.constant 0 : index
    %c0_43 = arith.constant 0 : index
    %84 = vector.load %arg3[%c4, %c0_42, %c0_43] : memref<8x32x32xbf16, #tpu.memory_space<vmem>>, vector<1x32x32xbf16>
    %85 = vector.shape_cast %84 : vector<1x32x32xbf16> to vector<32x32xbf16>
    %cst_44 = arith.constant dense<0.000000e+00> : vector<128x32xf32>
    %86 = tpu.matmul %82, %85, %cst_44 {dimension_numbers = #tpu.dot_dimension_numbers<[1], [0], [0], [1], [0, 0, 1, 1], [], []>} : vector<128x32xbf16>, vector<32x32xbf16>, vector<128x32xf32> -> vector<128x32xf32>
    %87 = arith.truncf %86 : vector<128x32xf32> to vector<128x32xbf16>
    %cst_45 = arith.constant dense<0.000000e+00> : vector<128x32xf32>
    %88 = tpu.matmul %1, %87, %cst_45 {dimension_numbers = #tpu.dot_dimension_numbers<[1], [0], [0], [1], [0, 0, 1, 1], [], []>} : vector<128x128xbf16>, vector<128x32xbf16>, vector<128x32xf32> -> vector<128x32xf32>
    %cst_46 = arith.constant 0.000000e+00 : f32
    %89 = vector.broadcast %cst_46 : f32 to vector<128x32xf32>
    %90 = arith.maximumf %88, %89 : vector<128x32xf32>
    %91 = arith.mulf %90, %90 : vector<128x32xf32>
    %cst_47 = arith.constant dense<0.000000e+00> : vector<128xf32>
    %92 = vector.multi_reduction <add>, %91, %cst_47 [1] : vector<128x32xf32> to vector<128xf32>
    %93 = vector.shape_cast %92 : vector<128xf32> to vector<128x1xf32>
    %cst_48 = arith.constant 1.000000e-24 : f32
    %94 = vector.broadcast %cst_48 : f32 to vector<128x1xf32>
    %95 = arith.maximumf %93, %94 : vector<128x1xf32>
    %96 = math.rsqrt %95 : vector<128x1xf32>
    %97 = vector.broadcast %96 : vector<128x1xf32> to vector<128x32xf32>
    %98 = arith.mulf %90, %97 : vector<128x32xf32>
    %99 = arith.truncf %98 : vector<128x32xf32> to vector<128x32xbf16>
    %c640 = arith.constant 640 : index
    %c0_49 = arith.constant 0 : index
    %100 = vector.load %arg11[%c640, %c0_49] : memref<1152x32xbf16, #tpu.memory_space<vmem>>, vector<128x32xbf16>
    tpu.vector_store %arg11[%c640, %c0_49], %99 {strides = array<i32>} : memref<1152x32xbf16, #tpu.memory_space<vmem>>, vector<128x32xbf16>,
    %c5 = arith.constant 5 : index
    %c0_50 = arith.constant 0 : index
    %c0_51 = arith.constant 0 : index
    %101 = vector.load %arg3[%c5, %c0_50, %c0_51] : memref<8x32x32xbf16, #tpu.memory_space<vmem>>, vector<1x32x32xbf16>
    %102 = vector.shape_cast %101 : vector<1x32x32xbf16> to vector<32x32xbf16>
    %cst_52 = arith.constant dense<0.000000e+00> : vector<128x32xf32>
    %103 = tpu.matmul %99, %102, %cst_52 {dimension_numbers = #tpu.dot_dimension_numbers<[1], [0], [0], [1], [0, 0, 1, 1], [], []>} : vector<128x32xbf16>, vector<32x32xbf16>, vector<128x32xf32> -> vector<128x32xf32>
    %104 = arith.truncf %103 : vector<128x32xf32> to vector<128x32xbf16>
    %cst_53 = arith.constant dense<0.000000e+00> : vector<128x32xf32>
    %105 = tpu.matmul %1, %104, %cst_53 {dimension_numbers = #tpu.dot_dimension_numbers<[1], [0], [0], [1], [0, 0, 1, 1], [], []>} : vector<128x128xbf16>, vector<128x32xbf16>, vector<128x32xf32> -> vector<128x32xf32>
    %cst_54 = arith.constant 0.000000e+00 : f32
    %106 = vector.broadcast %cst_54 : f32 to vector<128x32xf32>
    %107 = arith.maximumf %105, %106 : vector<128x32xf32>
    %108 = arith.mulf %107, %107 : vector<128x32xf32>
    %cst_55 = arith.constant dense<0.000000e+00> : vector<128xf32>
    %109 = vector.multi_reduction <add>, %108, %cst_55 [1] : vector<128x32xf32> to vector<128xf32>
    %110 = vector.shape_cast %109 : vector<128xf32> to vector<128x1xf32>
    %cst_56 = arith.constant 1.000000e-24 : f32
    %111 = vector.broadcast %cst_56 : f32 to vector<128x1xf32>
    %112 = arith.maximumf %110, %111 : vector<128x1xf32>
    %113 = math.rsqrt %112 : vector<128x1xf32>
    %114 = vector.broadcast %113 : vector<128x1xf32> to vector<128x32xf32>
    %115 = arith.mulf %107, %114 : vector<128x32xf32>
    %116 = arith.truncf %115 : vector<128x32xf32> to vector<128x32xbf16>
    %c768 = arith.constant 768 : index
    %c0_57 = arith.constant 0 : index
    %117 = vector.load %arg11[%c768, %c0_57] : memref<1152x32xbf16, #tpu.memory_space<vmem>>, vector<128x32xbf16>
    tpu.vector_store %arg11[%c768, %c0_57], %116 {strides = array<i32>} : memref<1152x32xbf16, #tpu.memory_space<vmem>>, vector<128x32xbf16>,
    %c6 = arith.constant 6 : index
    %c0_58 = arith.constant 0 : index
    %c0_59 = arith.constant 0 : index
    %118 = vector.load %arg3[%c6, %c0_58, %c0_59] : memref<8x32x32xbf16, #tpu.memory_space<vmem>>, vector<1x32x32xbf16>
    %119 = vector.shape_cast %118 : vector<1x32x32xbf16> to vector<32x32xbf16>
    %cst_60 = arith.constant dense<0.000000e+00> : vector<128x32xf32>
    %120 = tpu.matmul %116, %119, %cst_60 {dimension_numbers = #tpu.dot_dimension_numbers<[1], [0], [0], [1], [0, 0, 1, 1], [], []>} : vector<128x32xbf16>, vector<32x32xbf16>, vector<128x32xf32> -> vector<128x32xf32>
    %121 = arith.truncf %120 : vector<128x32xf32> to vector<128x32xbf16>
    %cst_61 = arith.constant dense<0.000000e+00> : vector<128x32xf32>
    %122 = tpu.matmul %1, %121, %cst_61 {dimension_numbers = #tpu.dot_dimension_numbers<[1], [0], [0], [1], [0, 0, 1, 1], [], []>} : vector<128x128xbf16>, vector<128x32xbf16>, vector<128x32xf32> -> vector<128x32xf32>
    %cst_62 = arith.constant 0.000000e+00 : f32
    %123 = vector.broadcast %cst_62 : f32 to vector<128x32xf32>
    %124 = arith.maximumf %122, %123 : vector<128x32xf32>
    %125 = arith.mulf %124, %124 : vector<128x32xf32>
    %cst_63 = arith.constant dense<0.000000e+00> : vector<128xf32>
    %126 = vector.multi_reduction <add>, %125, %cst_63 [1] : vector<128x32xf32> to vector<128xf32>
    %127 = vector.shape_cast %126 : vector<128xf32> to vector<128x1xf32>
    %cst_64 = arith.constant 1.000000e-24 : f32
    %128 = vector.broadcast %cst_64 : f32 to vector<128x1xf32>
    %129 = arith.maximumf %127, %128 : vector<128x1xf32>
    %130 = math.rsqrt %129 : vector<128x1xf32>
    %131 = vector.broadcast %130 : vector<128x1xf32> to vector<128x32xf32>
    %132 = arith.mulf %124, %131 : vector<128x32xf32>
    %133 = arith.truncf %132 : vector<128x32xf32> to vector<128x32xbf16>
    %c896 = arith.constant 896 : index
    %c0_65 = arith.constant 0 : index
    %134 = vector.load %arg11[%c896, %c0_65] : memref<1152x32xbf16, #tpu.memory_space<vmem>>, vector<128x32xbf16>
    tpu.vector_store %arg11[%c896, %c0_65], %133 {strides = array<i32>} : memref<1152x32xbf16, #tpu.memory_space<vmem>>, vector<128x32xbf16>,
    %c7 = arith.constant 7 : index
    %c0_66 = arith.constant 0 : index
    %c0_67 = arith.constant 0 : index
    %135 = vector.load %arg3[%c7, %c0_66, %c0_67] : memref<8x32x32xbf16, #tpu.memory_space<vmem>>, vector<1x32x32xbf16>
    %136 = vector.shape_cast %135 : vector<1x32x32xbf16> to vector<32x32xbf16>
    %cst_68 = arith.constant dense<0.000000e+00> : vector<128x32xf32>
    %137 = tpu.matmul %133, %136, %cst_68 {dimension_numbers = #tpu.dot_dimension_numbers<[1], [0], [0], [1], [0, 0, 1, 1], [], []>} : vector<128x32xbf16>, vector<32x32xbf16>, vector<128x32xf32> -> vector<128x32xf32>
    %138 = arith.truncf %137 : vector<128x32xf32> to vector<128x32xbf16>
    %cst_69 = arith.constant dense<0.000000e+00> : vector<128x32xf32>
    %139 = tpu.matmul %1, %138, %cst_69 {dimension_numbers = #tpu.dot_dimension_numbers<[1], [0], [0], [1], [0, 0, 1, 1], [], []>} : vector<128x128xbf16>, vector<128x32xbf16>, vector<128x32xf32> -> vector<128x32xf32>
    %cst_70 = arith.constant 0.000000e+00 : f32
    %140 = vector.broadcast %cst_70 : f32 to vector<128x32xf32>
    %141 = arith.maximumf %139, %140 : vector<128x32xf32>
    %142 = arith.truncf %141 : vector<128x32xf32> to vector<128x32xbf16>
    %c1024 = arith.constant 1024 : index
    %c0_71 = arith.constant 0 : index
    %143 = vector.load %arg11[%c1024, %c0_71] : memref<1152x32xbf16, #tpu.memory_space<vmem>>, vector<128x32xbf16>
    tpu.vector_store %arg11[%c1024, %c0_71], %142 {strides = array<i32>} : memref<1152x32xbf16, #tpu.memory_space<vmem>>, vector<128x32xbf16>,
    %c0_72 = arith.constant 0 : index
    %c0_73 = arith.constant 0 : index
    %144 = vector.load %arg11[%c0_72, %c0_73] : memref<1152x32xbf16, #tpu.memory_space<vmem>>, vector<1152x32xbf16>
    %c0_74 = arith.constant 0 : index
    %c0_75 = arith.constant 0 : index
    %145 = vector.load %arg4[%c0_74, %c0_75] : memref<32x64xbf16, #tpu.memory_space<vmem>>, vector<32x64xbf16>
    %cst_76 = arith.constant dense<0.000000e+00> : vector<1152x64xf32>
    %146 = tpu.matmul %144, %145, %cst_76 {dimension_numbers = #tpu.dot_dimension_numbers<[1], [0], [0], [1], [0, 0, 1, 1], [], []>} : vector<1152x32xbf16>, vector<32x64xbf16>, vector<1152x64xf32> -> vector<1152x64xf32>
    %c0_77 = arith.constant 0 : index
    %c0_78 = arith.constant 0 : index
    %147 = vector.load %arg5[%c0_77, %c0_78] : memref<1x64xf32, #tpu.memory_space<vmem>>, vector<1x64xf32>
    %148 = vector.broadcast %147 : vector<1x64xf32> to vector<1152x64xf32>
    %149 = arith.addf %146, %148 : vector<1152x64xf32>
    %cst_79 = arith.constant 0.000000e+00 : f32
    %150 = vector.broadcast %cst_79 : f32 to vector<1152x64xf32>
    %151 = arith.maximumf %149, %150 : vector<1152x64xf32>
    %152 = arith.truncf %151 : vector<1152x64xf32> to vector<1152x64xbf16>
    %c0_80 = arith.constant 0 : index
    %c0_81 = arith.constant 0 : index
    %153 = vector.load %arg6[%c0_80, %c0_81] : memref<64x64xbf16, #tpu.memory_space<vmem>>, vector<64x64xbf16>
    %cst_82 = arith.constant dense<0.000000e+00> : vector<1152x64xf32>
    %154 = tpu.matmul %152, %153, %cst_82 {dimension_numbers = #tpu.dot_dimension_numbers<[1], [0], [0], [1], [0, 0, 1, 1], [], []>} : vector<1152x64xbf16>, vector<64x64xbf16>, vector<1152x64xf32> -> vector<1152x64xf32>
    %c0_83 = arith.constant 0 : index
    %c0_84 = arith.constant 0 : index
    %155 = vector.load %arg7[%c0_83, %c0_84] : memref<1x64xf32, #tpu.memory_space<vmem>>, vector<1x64xf32>
    %156 = vector.broadcast %155 : vector<1x64xf32> to vector<1152x64xf32>
    %157 = arith.addf %154, %156 : vector<1152x64xf32>
    %cst_85 = arith.constant 0.000000e+00 : f32
    %158 = vector.broadcast %cst_85 : f32 to vector<1152x64xf32>
    %159 = arith.maximumf %157, %158 : vector<1152x64xf32>
    %160 = vector.extract_strided_slice %159 {offsets = [0, 0], sizes = [128, 64], strides = [1, 1]} : vector<1152x64xf32> to vector<128x64xf32>
    %161 = vector.extract_strided_slice %159 {offsets = [128, 0], sizes = [128, 64], strides = [1, 1]} : vector<1152x64xf32> to vector<128x64xf32>
    %162 = arith.addf %160, %161 : vector<128x64xf32>
    %163 = vector.extract_strided_slice %159 {offsets = [256, 0], sizes = [128, 64], strides = [1, 1]} : vector<1152x64xf32> to vector<128x64xf32>
    %164 = arith.addf %162, %163 : vector<128x64xf32>
    %165 = vector.extract_strided_slice %159 {offsets = [384, 0], sizes = [128, 64], strides = [1, 1]} : vector<1152x64xf32> to vector<128x64xf32>
    %166 = arith.addf %164, %165 : vector<128x64xf32>
    %167 = vector.extract_strided_slice %159 {offsets = [512, 0], sizes = [128, 64], strides = [1, 1]} : vector<1152x64xf32> to vector<128x64xf32>
    %168 = arith.addf %166, %167 : vector<128x64xf32>
    %169 = vector.extract_strided_slice %159 {offsets = [640, 0], sizes = [128, 64], strides = [1, 1]} : vector<1152x64xf32> to vector<128x64xf32>
    %170 = arith.addf %168, %169 : vector<128x64xf32>
    %171 = vector.extract_strided_slice %159 {offsets = [768, 0], sizes = [128, 64], strides = [1, 1]} : vector<1152x64xf32> to vector<128x64xf32>
    %172 = arith.addf %170, %171 : vector<128x64xf32>
    %173 = vector.extract_strided_slice %159 {offsets = [896, 0], sizes = [128, 64], strides = [1, 1]} : vector<1152x64xf32> to vector<128x64xf32>
    %174 = arith.addf %172, %173 : vector<128x64xf32>
    %175 = vector.extract_strided_slice %159 {offsets = [1024, 0], sizes = [128, 64], strides = [1, 1]} : vector<1152x64xf32> to vector<128x64xf32>
    %176 = arith.addf %174, %175 : vector<128x64xf32>
    %c0_86 = arith.constant 0 : index
    %c0_87 = arith.constant 0 : index
    %177 = vector.load %arg8[%c0_86, %c0_87] : memref<1x64xf32, #tpu.memory_space<vmem>>, vector<1x64xf32>
    %178 = vector.broadcast %177 : vector<1x64xf32> to vector<128x64xf32>
    %179 = arith.mulf %176, %178 : vector<128x64xf32>
    %cst_88 = arith.constant dense<0.000000e+00> : vector<128xf32>
    %180 = vector.multi_reduction <add>, %179, %cst_88 [1] : vector<128x64xf32> to vector<128xf32>
    %181 = vector.shape_cast %180 : vector<128xf32> to vector<128x1xf32>
    %c0_89 = arith.constant 0 : index
    %c0_90 = arith.constant 0 : index
    %182 = vector.load %arg9[%c0_89, %c0_90] : memref<1x1xf32, #tpu.memory_space<vmem>>, vector<1x1xf32>
    %cst_91 = arith.constant 9.000000e+00 : f32
    %183 = vector.broadcast %cst_91 : f32 to vector<1x1xf32>
    %184 = arith.mulf %183, %182 : vector<1x1xf32>
    %185 = vector.broadcast %184 : vector<1x1xf32> to vector<128x1xf32>
    %186 = arith.addf %181, %185 : vector<128x1xf32>
    %c0_92 = arith.constant 0 : index
    %c0_93 = arith.constant 0 : index
    %c0_94 = arith.constant 0 : index
    %187 = vector.load %arg10[%c0_92, %c0_93, %c0_94] : memref<1x128x1xf32, #tpu.memory_space<vmem>>, vector<1x128x1xf32>
    %188 = vector.shape_cast %187 : vector<1x128x1xf32> to vector<128x1xf32>
    %189 = vector.shape_cast %186 : vector<128x1xf32> to vector<1x128x1xf32>
    tpu.vector_store %arg10[%c0_92, %c0_93, %c0_94], %189 {strides = array<i32>} : memref<1x128x1xf32, #tpu.memory_space<vmem>>, vector<1x128x1xf32>,
    return
  }
  func.func @transform_0(%arg0: i32) -> (i32, i32, i32) {
    %c0_i32 = arith.constant 0 : i32
    %c0_i32_0 = arith.constant 0 : i32
    %c0_i32_1 = arith.constant 0 : i32
    return %arg0, %c0_i32, %c0_i32_0 : i32, i32, i32
  }
  func.func @transform_1(%arg0: i32) -> (i32, i32) {
    %c0_i32 = arith.constant 0 : i32
    %c0_i32_0 = arith.constant 0 : i32
    %c0_i32_1 = arith.constant 0 : i32
    return %c0_i32, %c0_i32_0 : i32, i32
  }
  func.func @transform_2(%arg0: i32) -> (i32, i32, i32) {
    %c0_i32 = arith.constant 0 : i32
    %c0_i32_0 = arith.constant 0 : i32
    %c0_i32_1 = arith.constant 0 : i32
    %c0_i32_2 = arith.constant 0 : i32
    return %c0_i32, %c0_i32_0, %c0_i32_1 : i32, i32, i32
  }
  func.func @transform_3(%arg0: i32) -> (i32, i32) {
    %c0_i32 = arith.constant 0 : i32
    %c0_i32_0 = arith.constant 0 : i32
    %c0_i32_1 = arith.constant 0 : i32
    return %c0_i32, %c0_i32_0 : i32, i32
  }
  func.func @transform_4(%arg0: i32) -> (i32, i32) {
    %c0_i32 = arith.constant 0 : i32
    %c0_i32_0 = arith.constant 0 : i32
    %c0_i32_1 = arith.constant 0 : i32
    return %c0_i32, %c0_i32_0 : i32, i32
  }
  func.func @transform_5(%arg0: i32) -> (i32, i32) {
    %c0_i32 = arith.constant 0 : i32
    %c0_i32_0 = arith.constant 0 : i32
    %c0_i32_1 = arith.constant 0 : i32
    return %c0_i32, %c0_i32_0 : i32, i32
  }
  func.func @transform_6(%arg0: i32) -> (i32, i32) {
    %c0_i32 = arith.constant 0 : i32
    %c0_i32_0 = arith.constant 0 : i32
    %c0_i32_1 = arith.constant 0 : i32
    return %c0_i32, %c0_i32_0 : i32, i32
  }
  func.func @transform_7(%arg0: i32) -> (i32, i32) {
    %c0_i32 = arith.constant 0 : i32
    %c0_i32_0 = arith.constant 0 : i32
    %c0_i32_1 = arith.constant 0 : i32
    return %c0_i32, %c0_i32_0 : i32, i32
  }
  func.func @transform_8(%arg0: i32) -> (i32, i32) {
    %c0_i32 = arith.constant 0 : i32
    %c0_i32_0 = arith.constant 0 : i32
    %c0_i32_1 = arith.constant 0 : i32
    return %c0_i32, %c0_i32_0 : i32, i32
  }
  func.func @transform_9(%arg0: i32) -> (i32, i32, i32) {
    %c0_i32 = arith.constant 0 : i32
    %c0_i32_0 = arith.constant 0 : i32
    %c0_i32_1 = arith.constant 0 : i32
    return %arg0, %c0_i32, %c0_i32_0 : i32, i32, i32
  }
}

</mosaic_0001>

<bundles_post_ra>
// kernel: gnn_bet8_forward.1
= control target key start
LH: loop header
LB: loop body
LE: loop exit
PB: predicated region body
PF: predicated region fallthrough
CT: control target
= control target key end

     0   :  { %s7930_s11 = smov 0   ;;  %s10084_s0 = inlined_call_operand.vmem [shape: bf16[2,128,128], index: 0, kind: input, shape index: {}]   ;;  %s10085_s1 = inlined_call_operand.vmem [shape: bf16[128,32], index: 1, kind: input, shape index: {}]   ;;  %s10086_s2 = inlined_call_operand.vmem [shape: bf16[8,32,32], index: 2, kind: input, shape index: {}]   ;;  %s10087_s3 = inlined_call_operand.vmem [shape: bf16[32,64], index: 3, kind: input, shape index: {}]   ;;  %s10088_s4 = inlined_call_operand.vmem [shape: f32[1,64], index: 4, kind: input, shape index: {}]   ;;  %s10089_s5 = inlined_call_operand.vmem [shape: bf16[64,64], index: 5, kind: input, shape index: {}]   ;;  %s10090_s6 = inlined_call_operand.vmem [shape: f32[1,64], index: 6, kind: input, shape index: {}]   ;;  %s10091_s7 = inlined_call_operand.vmem [shape: f32[1,64], index: 7, kind: input, shape index: {}]   ;;  %s10092_s8 = inlined_call_operand.<no memory space> [shape: f32[1,1], index: 8, kind: input, shape index: {}]   ;;  %s10093_s9 = inlined_call_operand.vmem [shape: f32[2,128,1], index: 9, kind: output, shape index: {}]  }
   0x1   :  { %v14_v0 = vstv %s10092_s8 }
   0x2   :  { %15 = vst [vmem:[#allocation3] sm:$0x1] %v14_v0 }
   0x3 LB: > { %s6129_s12 = sadd.s32 4294967295, %s7875_s11   ;;  %p6133_p0 = scmp.ge.s32.totalorder %s7875_s11, 1  ;;  %s7875_s11 = sphi %s7930_s11, %s21_s11  }
   0x4   : > { %p289_p1 = scmp.lt.s32.totalorder %s7875_s11, 3 }
   0x6   : > { %p290_p2 = pnand %p6133_p0, %p289_p1 }
   0x7   : > { %v7549_v1 = vld [vmem:[%s10085_s1] sm:$0xff] (!%p290_p2)   ;;  %p325_p3 = scmp.lt.s32.totalorder (!%p290_p2), %s6129_s12, 1  ;;  %v7550_v2 = vld [vmem:[%s10085_s1 + $0x8] sm:$0xff] (!%p290_p2)   ;;  %v7551_v3 = vld [vmem:[%s10085_s1 + $0x10] sm:$0xff] (!%p290_p2)   ;;  %vm593_vm0 = vcmask (!%p290_p2), 261120   ;;  %vm4864_vm1 = vcmask (!%p290_p2), 523264  }
   0x8   : > { %293 = sbr.rel (%p290_p2) target bundleno = 5943 (0x1737), region = 56  ;;  %6793 = vmatprep.subr.bf16.mxu0 (!%p290_p2), %v7549_v1  ;;  %v7552_v4 = vld [vmem:[%s10085_s1 + $0x18] sm:$0xff] (!%p290_p2)   ;;  %v7553_v6 = vld [vmem:[%s10085_s1 + $0x20] sm:$0xff] (!%p290_p2)   ;;  %v7554_v7 = vld [vmem:[%s10085_s1 + $0x28] sm:$0xff] (!%p290_p2)   ;;  %vm6057_vm2 = vcmask (!%p290_p2), 7168  }
   0x9   : > { %6794 = vmatpush3.bf16.msra.mxu0 (!%p290_p2), %v7549_v1  ;;  %v7555_v8 = vld [vmem:[%s10085_s1 + $0x30] sm:$0xff] (!%p290_p2)   ;;  %v7556_v9 = vld [vmem:[%s10085_s1 + $0x38] sm:$0xff] (!%p290_p2)  }
   0xa   : > { %6795 = vmatprep.subr.bf16.mxu0 (!%p290_p2), %v7550_v2 }
   0xd   : > { %6796 = vmatpush3.bf16.msra.mxu0 (!%p290_p2), %v7550_v2 }
   0xe   : > { %6797 = vmatprep.subr.bf16.mxu0 (!%p290_p2), %v7551_v3 }
   0xf   : > { %s10095_s12 = smov (!%p325_p3, %s6129_s12), 1 }
  0x10   : > { %s6417_s18 = sshll.u32 %s10095_s12, 6  ;;  %s6418_s30 = sshll.u32 %s10095_s12, 7 }
  0x11   : > { %s7953_s21 = scalar_lea.vmem %s10084_s0, %s6417_s18  ;;  %6798 = vmatpush3.bf16.msra.mxu0 %v7551_v3  ;;  %s10047_s14 = scalar_lea.vmem %s10093_s9, %s6418_s30 }
  0x12   : > { %v7959_v5 = vld [vmem:[%s7953_s21] sm:$0xff]   ;;  %6799 = vmatprep.subr.bf16.mxu0 %v7552_v4  ;;  %v7975_v10 = vld [vmem:[%s7953_s21 + $0x8] sm:$0xff]   ;;  %v7978_v11 = vld [vmem:[%s7953_s21 + $0x10] sm:$0xff]  }
  0x13   : > { %6809 = vmatprep.mubr.bf16.mxu0 %v7959_v5  ;;  %v7983_v12 = vld [vmem:[%s7953_s21 + $0x18] sm:$0xff]   ;;  %v7986_v13 = vld [vmem:[%s7953_s21 + $0x20] sm:$0xff]   ;;  %v7991_v14 = vld [vmem:[%s7953_s21 + $0x28] sm:$0xff]  }
  0x14   : > { %v7994_v15 = vld [vmem:[%s7953_s21 + $0x30] sm:$0xff]   ;;  %v7999_v16 = vld [vmem:[%s7953_s21 + $0x38] sm:$0xff]  }
  0x15   : > { %6800 = vmatpush3.bf16.msra.mxu0 %v7552_v4 }
  0x16   : > { %6801 = vmatprep.subr.bf16.mxu0 %v7553_v6 }
  0x19   : > { %6802 = vmatpush3.bf16.msra.mxu0 %v7553_v6 }
  0x1a   : > { %6803 = vmatprep.subr.bf16.mxu0 %v7554_v7 }
  0x1d   : > { %6804 = vmatpush3.bf16.msra.mxu0 %v7554_v7 }
  0x1e   : > { %6805 = vmatprep.subr.bf16.mxu0 %v7555_v8 }
  0x21   : > { %6806 = vmatpush3.bf16.msra.mxu0 %v7555_v8 }
  0x22   : > { %6807 = vmatprep.subr.bf16.mxu0 %v7556_v9 }
  0x25   : > { %6808 = vmatpush3.bf16.msra.mxu0 %v7556_v9 }
  0x28   : > { %6810 = vmatmul.mubr.bf16.vlgmr.msra.gmra.mrb[0].mxu0 %v7975_v10 }
  0x29   : > { %6813 = vmatprep.mubr.bf16.mxu0 %v7978_v11 }
  0x30   : > { %6814 = vmatmul.mubr.bf16.gmra.mrb[4].mxu0 %v7983_v12 }
  0x31   : > { %6817 = vmatprep.mubr.bf16.mxu0 %v7986_v13 }
  0x38   : > { %6818 = vmatmul.mubr.bf16.gmra.mrb[8].mxu0 %v7991_v14 }
  0x39   : > { %6821 = vmatprep.mubr.bf16.mxu0 %v7994_v15 }
  0x40   : > { %6822 = vmatmul.mubr.bf16.gmra.mrb[12].mxu0 %v7999_v16 }
  0xfb   : > { %v6811_v17 = vpop.f32.mrb[0].mxu0 }
  0xfc   : > { %v8002_v18 = vmax.f32 %v6811_v17, 0.0  ;;  %v498_v19 = vpop.f32.mrb[1].mxu0 }
  0xfd   : > { %v8004_v20 = vmax.f32 %v498_v19, 0.0  ;;  %v6812_v21 = vpop.f32.mrb[2].mxu0 }
  0xfe   : > { %v8006_v22 = vmax.f32 %v6812_v21, 0.0  ;;  %v501_v23 = vpop.f32.mrb[3].mxu0  ;;  %v579_v24 = vmul.f32 %v8002_v18, %v8002_v18 }
  0xff   : > { %v8010_v25 = vmax.f32 %v501_v23, 0.0  ;;  %v577_v26 = vmul.f32 %v8004_v20, %v8004_v20 }
 0x100   : > { %v600_v27 = vsel %vm593_vm0, %v579_v24, 0.0  ;;  %v580_v28 = vmul.f32 %v8006_v22, %v8006_v22 }
 0x101   : > { %601 = vadd.xlane.f32.xlu1 %v600_v27  ;;  %v594_v29 = vsel %vm593_vm0, %v577_v26, 0.0  ;;  %v578_v30 = vmul.f32 %v8010_v25, %v8010_v25  ;;  %v7565_v27 = vld [vmem:[%s10086_s2] sm:$0xff]  }
 0x102   : > { %595 = vadd.xlane.f32.xlu0 %v594_v29  ;;  %v603_v33 = vsel %vm593_vm0, %v580_v28, 0.0  ;;  %6825 = vmatprep.subr.bf16.mxu1 %v7565_v27 }
 0x103   : > { %v6815_v31 = vpop.f32.mrb[4].mxu0  ;;  %v597_v37 = vsel %vm593_vm0, %v578_v30, 0.0  ;;  %6826 = vmatpush3.bf16.msra.mxu1 %v7565_v27  ;;  %v7566_v30 = vld [vmem:[%s10086_s2 + $0x8] sm:$0xff]  }
 0x104   : > { %v514_v32 = vpop.f32.mrb[5].mxu0  ;;  %v8021_v34 = vmax.f32 %v6815_v31, 0.0  ;;  %6827 = vmatprep.subr.bf16.mxu1 %v7566_v30 }
 0x105   : > { %v8023_v35 = vmax.f32 %v514_v32, 0.0  ;;  %604 = vadd.xlane.f32.xlu1 %v603_v33  ;;  %v6816_v36 = vpop.f32.mrb[6].mxu0 }
 0x106   : > { %598 = vadd.xlane.f32.xlu0 %v597_v37  ;;  %v517_v38 = vpop.f32.mrb[7].mxu0  ;;  %v8026_v39 = vmax.f32 %v6816_v36, 0.0  ;;  %v583_v44 = vmul.f32 %v8021_v34, %v8021_v34 }
 0x107   : > { %v8028_v40 = vmax.f32 %v517_v38, 0.0  ;;  %v581_v41 = vmul.f32 %v8023_v35, %v8023_v35  ;;  %6828 = vmatpush3.bf16.msra.mxu1 %v7566_v30 }
 0x108   : > { %v584_v47 = vmul.f32 %v8026_v39, %v8026_v39  ;;  %v612_v52 = vsel %vm593_vm0, %v583_v44, 0.0 }
 0x109   : > { %v606_v42 = vsel %vm593_vm0, %v581_v41, 0.0  ;;  %v582_v43 = vmul.f32 %v8028_v40, %v8028_v40 }
 0x10a   : > { %607 = vadd.xlane.f32.xlu0 %v606_v42  ;;  %v615_v56 = vsel %vm593_vm0, %v584_v47, 0.0 }
 0x10b   : > { %v6819_v45 = vpop.f32.mrb[8].mxu0  ;;  %v609_v46 = vsel %vm593_vm0, %v582_v43, 0.0 }
 0x10c   : > { %610 = vadd.xlane.f32.xlu1 %v609_v46  ;;  %v530_v48 = vpop.f32.mrb[9].mxu0  ;;  %v8040_v49 = vmax.f32 %v6819_v45, 0.0 }
 0x10d   : > { %v8042_v50 = vmax.f32 %v530_v48, 0.0  ;;  %v6820_v51 = vpop.f32.mrb[10].mxu0 }
 0x10e   : > { %613 = vadd.xlane.f32.xlu0 %v612_v52  ;;  %v533_v53 = vpop.f32.mrb[11].mxu0  ;;  %v8045_v54 = vmax.f32 %v6820_v51, 0.0  ;;  %v587_v60 = vmul.f32 %v8040_v49, %v8040_v49 }
 0x10f   : > { %v8047_v55 = vmax.f32 %v533_v53, 0.0  ;;  %v585_v57 = vmul.f32 %v8042_v50, %v8042_v50 }
 0x110   : > { %616 = vadd.xlane.f32.xlu1 %v615_v56  ;;  %v588_v63 = vmul.f32 %v8045_v54, %v8045_v54  ;;  %v624_v4 = vsel %vm593_vm0, %v587_v60, 0.0 }
 0x111   : > { %v618_v58 = vsel %vm593_vm0, %v585_v57, 0.0  ;;  %v586_v59 = vmul.f32 %v8047_v55, %v8047_v55 }
 0x112   : > { %619 = vadd.xlane.f32.xlu0 %v618_v58  ;;  %v627_v9 = vsel %vm593_vm0, %v588_v63, 0.0 }
 0x113   : > { %v6823_v61 = vpop.f32.mrb[12].mxu0  ;;  %v621_v62 = vsel %vm593_vm0, %v586_v59, 0.0 }
 0x114   : > { %622 = vadd.xlane.f32.xlu1 %v621_v62  ;;  %v546_v0 = vpop.f32.mrb[13].mxu0  ;;  %v8060_v1 = vmax.f32 %v6823_v61, 0.0 }
 0x115   : > { %v8062_v2 = vmax.f32 %v546_v0, 0.0  ;;  %v6824_v3 = vpop.f32.mrb[14].mxu0 }
 0x116   : > { %625 = vadd.xlane.f32.xlu0 %v624_v4  ;;  %v549_v6 = vpop.f32.mrb[15].mxu0  ;;  %v8065_v7 = vmax.f32 %v6824_v3, 0.0  ;;  %v591_v23 = vmul.f32 %v8060_v1, %v8060_v1 }
 0x117   : > { %v8067_v8 = vmax.f32 %v549_v6, 0.0  ;;  %v589_v17 = vmul.f32 %v8062_v2, %v8062_v2 }
 0x118   : > { %628 = vadd.xlane.f32.xlu1 %v627_v9  ;;  %v592_v26 = vmul.f32 %v8065_v7, %v8065_v7  ;;  %v636_v28 = vsel %vm593_vm0, %v591_v23, 0.0 }
 0x119   : > { %v630_v19 = vsel %vm593_vm0, %v589_v17, 0.0  ;;  %v590_v21 = vmul.f32 %v8067_v8, %v8067_v8 }
 0x11a   : > { %631 = vadd.xlane.f32.xlu0 %v630_v19  ;;  %v639_v29 = vsel %vm593_vm0, %v592_v26, 0.0 }
 0x11b   : > { %v633_v24 = vsel %vm593_vm0, %v590_v21, 0.0 }
 0x11c   : > { %634 = vadd.xlane.f32.xlu1 %v633_v24 }
 0x11e   : > { %637 = vadd.xlane.f32.xlu0 %v636_v28 }
 0x120   : > { %640 = vadd.xlane.f32.xlu1 %v639_v29 }
 0x18e   : > { %v602_v31 = vpop.xlane.xlu1 %601 }
 0x18f   : > { %v644_v32 = vmax.f32 %v602_v31, 1e-24  ;;  %v596_v33 = vpop.xlane.xlu0 %595 }
 0x190   : > { %v642_v36 = vmax.f32 %v596_v33, 1e-24 }
 0x191   : > { %7587 = vrsqrt.f32 %v644_v32 }
 0x192   : > { %v605_v37 = vpop.xlane.xlu1 %604  ;;  %7589 = vrsqrt.f32 %v642_v36 }
 0x193   : > { %v645_v38 = vmax.f32 %v605_v37, 1e-24  ;;  %v599_v41 = vpop.xlane.xlu0 %598 }
 0x194   : > { %v643_v42 = vmax.f32 %v599_v41, 1e-24 }
 0x195   : > { %7591 = vrsqrt.f32 %v645_v38 }
 0x196   : > { %7593 = vrsqrt.f32 %v643_v42 }
 0x197   : > { %v608_v43 = vpop.xlane.xlu0 %607 }
 0x198   : > { %v646_v44 = vmax.f32 %v608_v43, 1e-24 }
 0x199   : > { %v611_v45 = vpop.xlane.xlu1 %610 }
 0x19a   : > { %7595 = vrsqrt.f32 %v646_v44  ;;  %v647_v46 = vmax.f32 %v611_v45, 1e-24 }
 0x19b   : > { %v614_v47 = vpop.xlane.xlu0 %613  ;;  %v7588_v51 = vpop.eup %7587 }
 0x19c   : > { %7597 = vrsqrt.f32 %v647_v46  ;;  %v648_v48 = vmax.f32 %v614_v47, 1e-24  ;;  %v7590_v53 = vpop.eup %7589  ;;  %v676_v61 = vmul.f32 %v7588_v51, %v8002_v18 }
 0x19d   : > { %v617_v52 = vpop.xlane.xlu1 %616  ;;  %v674_v0 = vmul.f32 %v7590_v53, %v8004_v20 }
 0x19e   : > { %7599 = vrsqrt.f32 %v648_v48  ;;  %v649_v56 = vmax.f32 %v617_v52, 1e-24 }
 0x19f   : > { %v7592_v57 = vpop.eup %7591  ;;  %v620_v58 = vpop.xlane.xlu0 %619 }
 0x1a0   : > { %v7594_v59 = vpop.eup %7593  ;;  %7601 = vrsqrt.f32 %v649_v56  ;;  %v650_v60 = vmax.f32 %v620_v58, 1e-24  ;;  %v677_v62 = vmul.f32 %v7592_v57, %v8006_v22 }
 0x1a1   : > { %v623_v63 = vpop.xlane.xlu1 %622  ;;  %v675_v3 = vmul.f32 %v7594_v59, %v8010_v25 }
 0x1a2   : > { %7603 = vrsqrt.f32 %v650_v60  ;;  %v651_v4 = vmax.f32 %v623_v63, 1e-24  ;;  %v691_v6 = vpack.c.bf16 %v677_v62, %v676_v61 }
 0x1a3   : > { %v626_v9 = vpop.xlane.xlu0 %625  ;;  %v690_v17 = vpack.c.bf16 %v675_v3, %v674_v0 }
 0x1a4   : > { %v7596_v19 = vpop.eup %7595  ;;  %7605 = vrsqrt.f32 %v651_v4  ;;  %v652_v21 = vmax.f32 %v626_v9, 1e-24  ;;  %699 = vst.msk [vmem:[#allocation2 + $0x8] sm:$0xff] %vm593_vm0, %v691_v6 }
 0x1a5   : > { %698 = vst.msk [vmem:[#allocation2] sm:$0xff] %vm593_vm0, %v690_v17  ;;  %6829 = vmatprep.mubr.msk.bf16.mxu1 %vm593_vm0, %v690_v17  ;;  %v629_v18 = vpop.xlane.xlu1 %628  ;;  %v678_v23 = vmul.f32 %v7596_v19, %v8023_v35 }
 0x1a6   : > { %v7598_v22 = vpop.eup %7597  ;;  %7607 = vrsqrt.f32 %v652_v21  ;;  %v653_v20 = vmax.f32 %v629_v18, 1e-24  ;;  %6830 = vmatmul.mubr.msk.bf16.vlgmr.msra.gmra.mrb[0].mxu1 %vm593_vm0, %v691_v6 }
 0x1a7   : > { %v632_v25 = vpop.xlane.xlu0 %631  ;;  %v679_v24 = vmul.f32 %v7598_v22, %v8028_v40 }
 0x1a8   : > { %v7600_v26 = vpop.eup %7599  ;;  %7609 = vrsqrt.f32 %v653_v20  ;;  %v654_v27 = vmax.f32 %v632_v25, 1e-24 }
 0x1a9   : > { %v635_v28 = vpop.xlane.xlu1 %634  ;;  %v692_v29 = vpack.c.bf16 %v679_v24, %v678_v23  ;;  %v680_v33 = vmul.f32 %v7600_v26, %v8021_v34 }
 0x1aa   : > { %v7602_v30 = vpop.eup %7601  ;;  %7611 = vrsqrt.f32 %v654_v27  ;;  %v655_v31 = vmax.f32 %v635_v28, 1e-24  ;;  %v7567_v27 = vld [vmem:[%s10086_s2 + $0x10] sm:$0xff]  }
 0x1ab   : > { %700 = vst.msk [vmem:[#allocation2 + $0x10] sm:$0xff] %vm593_vm0, %v692_v29  ;;  %6833 = vmatprep.mubr.msk.bf16.mxu1 %vm593_vm0, %v692_v29  ;;  %v638_v32 = vpop.xlane.xlu0 %637  ;;  %v681_v36 = vmul.f32 %v7602_v30, %v8026_v39  ;;  %6877 = vmatprep.subr.bf16.mxu0 %v7567_v27 }
 0x1ac   : > { %v7604_v35 = vpop.eup %7603  ;;  %7613 = vrsqrt.f32 %v655_v31  ;;  %v656_v40 = vmax.f32 %v638_v32, 1e-24  ;;  %6878 = vmatpush3.bf16.msra.mxu0 %v7567_v27 }
 0x1ad   : > { %v641_v37 = vpop.xlane.xlu1 %640  ;;  %v693_v38 = vpack.c.bf16 %v681_v36, %v680_v33  ;;  %v682_v43 = vmul.f32 %v7604_v35, %v8042_v50 }
 0x1ae   : > { %v7606_v41 = vpop.eup %7605  ;;  %7615 = vrsqrt.f32 %v656_v40  ;;  %v657_v42 = vmax.f32 %v641_v37, 1e-24 }
 0x1af   : > { %701 = vst.msk [vmem:[#allocation2 + $0x18] sm:$0xff] %vm593_vm0, %v693_v38  ;;  %6834 = vmatmul.mubr.msk.bf16.gmra.mrb[4].mxu1 %vm593_vm0, %v693_v38  ;;  %v683_v44 = vmul.f32 %v7606_v41, %v8047_v55 }
 0x1b0   : > { %v7608_v45 = vpop.eup %7607  ;;  %7617 = vrsqrt.f32 %v657_v42 }
 0x1b1   : > { %v694_v34 = vpack.c.bf16 %v683_v44, %v682_v43  ;;  %v684_v46 = vmul.f32 %v7608_v45, %v8040_v49 }
 0x1b2   : > { %v7610_v39 = vpop.eup %7609 }
 0x1b3   : > { %702 = vst.msk [vmem:[#allocation2 + $0x20] sm:$0xff] %vm593_vm0, %v694_v34  ;;  %6837 = vmatprep.mubr.msk.bf16.mxu1 %vm593_vm0, %v694_v34  ;;  %v685_v47 = vmul.f32 %v7610_v39, %v8045_v54 }
 0x1b4   : > { %v7612_v48 = vpop.eup %7611 }
 0x1b5   : > { %v695_v51 = vpack.c.bf16 %v685_v47, %v684_v46  ;;  %v686_v50 = vmul.f32 %v7612_v48, %v8062_v2 }
 0x1b6   : > { %v7614_v52 = vpop.eup %7613 }
 0x1b7   : > { %703 = vst.msk [vmem:[#allocation2 + $0x28] sm:$0xff] %vm593_vm0, %v695_v51  ;;  %6838 = vmatmul.mubr.msk.bf16.gmra.mrb[8].mxu1 %vm593_vm0, %v695_v51  ;;  %v687_v55 = vmul.f32 %v7614_v52, %v8067_v8 }
 0x1b8   : > { %v7616_v53 = vpop.eup %7615 }
 0x1b9   : > { %v696_v56 = vpack.c.bf16 %v687_v55, %v686_v50  ;;  %v688_v49 = vmul.f32 %v7616_v53, %v8060_v1 }
 0x1ba   : > { %v7618_v57 = vpop.eup %7617 }
 0x1bb   : > { %704 = vst.msk [vmem:[#allocation2 + $0x30] sm:$0xff] %vm593_vm0, %v696_v56  ;;  %6841 = vmatprep.mubr.msk.bf16.mxu1 %vm593_vm0, %v696_v56  ;;  %v689_v54 = vmul.f32 %v7618_v57, %v8065_v7 }
 0x1bd   : > { %v697_v58 = vpack.c.bf16 %v689_v54, %v688_v49 }
 0x1bf   : > { %705 = vst.msk [vmem:[#allocation2 + $0x38] sm:$0xff] %vm593_vm0, %v697_v58  ;;  %6842 = vmatmul.mubr.msk.bf16.gmra.mrb[12].mxu1 %vm593_vm0, %v697_v58 }
 0x1c0   : > { %6861 = vmatprep.mubr.bf16.mxu1 %v7959_v5 }
 0x279   : > { %v6831_v2 = vpop.f32.mrb[0].mxu1 }
 0x27a   : > { %v780_v8 = vpop.f32.mrb[1].mxu1 }
 0x27b   : > { %v6832_v59 = vpop.f32.mrb[2].mxu1 }
 0x27c   : > { %v844_v60 = vpack.c.bf16 %v6832_v59, %v6831_v2  ;;  %v783_v61 = vpop.f32.mrb[3].mxu1 }
 0x27d   : > { %v843_v62 = vpack.c.bf16 %v783_v61, %v780_v8 }
 0x27f   : > { %6845 = vmatprep.subr.bf16.mxu1 %v843_v62 }
 0x280   : > { %6846 = vmatpush3.bf16.msra.mxu1 %v843_v62 }
 0x281   : > { %6847 = vmatprep.subr.bf16.mxu1 %v844_v60 }
 0x282   : > { %v6835_v63 = vpop.f32.mrb[4].mxu1 }
 0x283   : > { %v796_v1 = vpop.f32.mrb[5].mxu1 }
 0x284   : > { %v6836_v0 = vpop.f32.mrb[6].mxu1  ;;  %6848 = vmatpush3.bf16.msra.mxu1 %v844_v60 }
 0x285   : > { %v846_v7 = vpack.c.bf16 %v6836_v0, %v6835_v63  ;;  %v799_v3 = vpop.f32.mrb[7].mxu1 }
 0x286   : > { %v845_v4 = vpack.c.bf16 %v799_v3, %v796_v1 }
 0x288   : > { %6849 = vmatprep.subr.bf16.mxu1 %v845_v4 }
 0x289   : > { %6850 = vmatpush3.bf16.msra.mxu1 %v845_v4 }
 0x28a   : > { %v6839_v6 = vpop.f32.mrb[8].mxu1  ;;  %6851 = vmatprep.subr.bf16.mxu1 %v846_v7 }
 0x28b   : > { %v812_v9 = vpop.f32.mrb[9].mxu1 }
 0x28c   : > { %v6840_v17 = vpop.f32.mrb[10].mxu1 }
 0x28d   : > { %v848_v19 = vpack.c.bf16 %v6840_v17, %v6839_v6  ;;  %v815_v21 = vpop.f32.mrb[11].mxu1  ;;  %6852 = vmatpush3.bf16.msra.mxu1 %v846_v7 }
 0x28e   : > { %v847_v18 = vpack.c.bf16 %v815_v21, %v812_v9 }
 0x290   : > { %6853 = vmatprep.subr.bf16.mxu1 %v847_v18 }
 0x291   : > { %6854 = vmatpush3.bf16.msra.mxu1 %v847_v18 }
 0x292   : > { %v6843_v22 = vpop.f32.mrb[12].mxu1  ;;  %6855 = vmatprep.subr.bf16.mxu1 %v848_v19 }
 0x293   : > { %v828_v20 = vpop.f32.mrb[13].mxu1 }
 0x294   : > { %v6844_v25 = vpop.f32.mrb[14].mxu1 }
 0x295   : > { %v850_v23 = vpack.c.bf16 %v6844_v25, %v6843_v22  ;;  %v831_v24 = vpop.f32.mrb[15].mxu1  ;;  %6856 = vmatpush3.bf16.msra.mxu1 %v848_v19 }
 0x296   : > { %v849_v26 = vpack.c.bf16 %v831_v24, %v828_v20 }
 0x298   : > { %6857 = vmatprep.subr.bf16.mxu1 %v849_v26 }
 0x299   : > { %6858 = vmatpush3.bf16.msra.mxu1 %v849_v26 }
 0x29a   : > { %6859 = vmatprep.subr.bf16.mxu1 %v850_v23 }
 0x29d   : > { %6860 = vmatpush3.bf16.msra.mxu1 %v850_v23 }
 0x2a0   : > { %6862 = vmatmul.mubr.bf16.vlgmr.msra.gmra.mrb[16].mxu1 %v7975_v10 }
 0x2a1   : > { %6865 = vmatprep.mubr.bf16.mxu1 %v7978_v11 }
 0x2a8   : > { %6866 = vmatmul.mubr.bf16.gmra.mrb[20].mxu1 %v7983_v12 }
 0x2a9   : > { %6869 = vmatprep.mubr.bf16.mxu1 %v7986_v13 }
 0x2b0   : > { %6870 = vmatmul.mubr.bf16.gmra.mrb[24].mxu1 %v7991_v14 }
 0x2b1   : > { %6873 = vmatprep.mubr.bf16.mxu1 %v7994_v15 }
 0x2b8   : > { %6874 = vmatmul.mubr.bf16.gmra.mrb[28].mxu1 %v7999_v16 }
 0x2b9   : > { %6913 = vmatprep.mubr.bf16.mxu1 %v7959_v5 }
 0x373   : > { %v6863_v28 = vpop.f32.mrb[16].mxu1 }
 0x374   : > { %v885_v29 = vpop.f32.mrb[17].mxu1  ;;  %v8132_v30 = vmax.f32 %v6863_v28, 0.0 }
 0x375   : > { %v8134_v31 = vmax.f32 %v885_v29, 0.0  ;;  %v6864_v32 = vpop.f32.mrb[18].mxu1 }
 0x376   : > { %v888_v33 = vpop.f32.mrb[19].mxu1  ;;  %v8136_v36 = vmax.f32 %v6864_v32, 0.0  ;;  %v966_v38 = vmul.f32 %v8132_v30, %v8132_v30 }
 0x377   : > { %v8138_v35 = vmax.f32 %v888_v33, 0.0  ;;  %v964_v5 = vmul.f32 %v8134_v31, %v8134_v31 }
 0x378   : > { %v967_v43 = vmul.f32 %v8136_v36, %v8136_v36  ;;  %v986_v46 = vsel %vm593_vm0, %v966_v38, 0.0  ;;  %v7568_v38 = vld [vmem:[%s10086_s2 + $0x18] sm:$0xff]  }
 0x379   : > { %v980_v40 = vsel %vm593_vm0, %v964_v5, 0.0  ;;  %v965_v37 = vmul.f32 %v8138_v35, %v8138_v35  ;;  %6879 = vmatprep.subr.bf16.mxu0 %v7568_v38 }
 0x37a   : > { %981 = vadd.xlane.f32.xlu0 %v980_v40  ;;  %v989_v52 = vsel %vm593_vm0, %v967_v43, 0.0  ;;  %6880 = vmatpush3.bf16.msra.mxu0 %v7568_v38 }
 0x37b   : > { %v6867_v41 = vpop.f32.mrb[20].mxu1  ;;  %v983_v42 = vsel %vm593_vm0, %v965_v37, 0.0 }
 0x37c   : > { %984 = vadd.xlane.f32.xlu1 %v983_v42  ;;  %v901_v44 = vpop.f32.mrb[21].mxu1  ;;  %v8150_v45 = vmax.f32 %v6867_v41, 0.0 }
 0x37d   : > { %v8152_v34 = vmax.f32 %v901_v44, 0.0  ;;  %v6868_v39 = vpop.f32.mrb[22].mxu1 }
 0x37e   : > { %987 = vadd.xlane.f32.xlu0 %v986_v46  ;;  %v904_v47 = vpop.f32.mrb[23].mxu1  ;;  %v8155_v48 = vmax.f32 %v6868_v39, 0.0  ;;  %v970_v56 = vmul.f32 %v8150_v45, %v8150_v45 }
 0x37f   : > { %v8157_v51 = vmax.f32 %v904_v47, 0.0  ;;  %v968_v50 = vmul.f32 %v8152_v34, %v8152_v34 }
 0x380   : > { %990 = vadd.xlane.f32.xlu1 %v989_v52  ;;  %v971_v54 = vmul.f32 %v8155_v48, %v8155_v48  ;;  %v998_v60 = vsel %vm593_vm0, %v970_v56, 0.0 }
 0x381   : > { %v992_v55 = vsel %vm593_vm0, %v968_v50, 0.0  ;;  %v969_v53 = vmul.f32 %v8157_v51, %v8157_v51 }
 0x382   : > { %993 = vadd.xlane.f32.xlu0 %v992_v55  ;;  %v1001_v1 = vsel %vm593_vm0, %v971_v54, 0.0 }
 0x383   : > { %v6871_v57 = vpop.f32.mrb[24].mxu1  ;;  %v995_v49 = vsel %vm593_vm0, %v969_v53, 0.0 }
 0x384   : > { %996 = vadd.xlane.f32.xlu1 %v995_v49  ;;  %v917_v58 = vpop.f32.mrb[25].mxu1  ;;  %v8170_v2 = vmax.f32 %v6871_v57, 0.0 }
 0x385   : > { %v8172_v8 = vmax.f32 %v917_v58, 0.0  ;;  %v6872_v59 = vpop.f32.mrb[26].mxu1 }
 0x386   : > { %999 = vadd.xlane.f32.xlu0 %v998_v60  ;;  %v920_v61 = vpop.f32.mrb[27].mxu1  ;;  %v8175_v62 = vmax.f32 %v6872_v59, 0.0  ;;  %v974_v4 = vmul.f32 %v8170_v2, %v8170_v2 }
 0x387   : > { %v8177_v63 = vmax.f32 %v920_v61, 0.0  ;;  %v972_v0 = vmul.f32 %v8172_v8, %v8172_v8 }
 0x388   : > { %1002 = vadd.xlane.f32.xlu1 %v1001_v1  ;;  %v975_v17 = vmul.f32 %v8175_v62, %v8175_v62  ;;  %v1010_v20 = vsel %vm593_vm0, %v974_v4, 0.0 }
 0x389   : > { %v1004_v7 = vsel %vm593_vm0, %v972_v0, 0.0  ;;  %v973_v3 = vmul.f32 %v8177_v63, %v8177_v63 }
 0x38a   : > { %1005 = vadd.xlane.f32.xlu0 %v1004_v7  ;;  %v1013_v26 = vsel %vm593_vm0, %v975_v17, 0.0 }
 0x38b   : > { %v6875_v6 = vpop.f32.mrb[28].mxu1  ;;  %v1007_v9 = vsel %vm593_vm0, %v973_v3, 0.0 }
 0x38c   : > { %1008 = vadd.xlane.f32.xlu1 %v1007_v9  ;;  %v933_v19 = vpop.f32.mrb[29].mxu1  ;;  %v8190_v21 = vmax.f32 %v6875_v6, 0.0 }
 0x38d   : > { %v8192_v18 = vmax.f32 %v933_v19, 0.0  ;;  %v6876_v22 = vpop.f32.mrb[30].mxu1 }
 0x38e   : > { %1011 = vadd.xlane.f32.xlu0 %v1010_v20  ;;  %v936_v25 = vpop.f32.mrb[31].mxu1  ;;  %v8195_v23 = vmax.f32 %v6876_v22, 0.0  ;;  %v978_v32 = vmul.f32 %v8190_v21, %v8190_v21 }
 0x38f   : > { %v8197_v24 = vmax.f32 %v936_v25, 0.0  ;;  %v976_v27 = vmul.f32 %v8192_v18, %v8192_v18 }
 0x390   : > { %1014 = vadd.xlane.f32.xlu1 %v1013_v26  ;;  %v979_v5 = vmul.f32 %v8195_v23, %v8195_v23  ;;  %v1022_v40 = vsel %vm593_vm0, %v978_v32, 0.0 }
 0x391   : > { %v1016_v28 = vsel %vm593_vm0, %v976_v27, 0.0  ;;  %v977_v29 = vmul.f32 %v8197_v24, %v8197_v24 }
 0x392   : > { %1017 = vadd.xlane.f32.xlu0 %v1016_v28  ;;  %v1025_v37 = vsel %vm593_vm0, %v979_v5, 0.0 }
 0x393   : > { %v1019_v33 = vsel %vm593_vm0, %v977_v29, 0.0 }
 0x394   : > { %1020 = vadd.xlane.f32.xlu1 %v1019_v33 }
 0x396   : > { %1023 = vadd.xlane.f32.xlu0 %v1022_v40 }
 0x398   : > { %1026 = vadd.xlane.f32.xlu1 %v1025_v37 }
 0x407   : > { %v982_v41 = vpop.xlane.xlu0 %981 }
 0x408   : > { %v1028_v42 = vmax.f32 %v982_v41, 1e-24 }
 0x409   : > { %v985_v43 = vpop.xlane.xlu1 %984 }
 0x40a   : > { %7619 = vrsqrt.f32 %v1028_v42  ;;  %v1029_v44 = vmax.f32 %v985_v43, 1e-24 }
 0x40b   : > { %v988_v39 = vpop.xlane.xlu0 %987 }
 0x40c   : > { %7621 = vrsqrt.f32 %v1029_v44  ;;  %v1030_v46 = vmax.f32 %v988_v39, 1e-24 }
 0x40d   : > { %v991_v47 = vpop.xlane.xlu1 %990 }
 0x40e   : > { %7623 = vrsqrt.f32 %v1030_v46  ;;  %v1031_v52 = vmax.f32 %v991_v47, 1e-24 }
 0x40f   : > { %v994_v50 = vpop.xlane.xlu0 %993 }
 0x410   : > { %7625 = vrsqrt.f32 %v1031_v52  ;;  %v1032_v55 = vmax.f32 %v994_v50, 1e-24 }
 0x411   : > { %v997_v53 = vpop.xlane.xlu1 %996 }
 0x412   : > { %7627 = vrsqrt.f32 %v1032_v55  ;;  %v1033_v56 = vmax.f32 %v997_v53, 1e-24 }
 0x413   : > { %v1000_v57 = vpop.xlane.xlu0 %999 }
 0x414   : > { %v7620_v49 = vpop.eup %7619  ;;  %7629 = vrsqrt.f32 %v1033_v56  ;;  %v1034_v54 = vmax.f32 %v1000_v57, 1e-24 }
 0x415   : > { %v1003_v58 = vpop.xlane.xlu1 %1002  ;;  %v1060_v1 = vmul.f32 %v7620_v49, %v8134_v31 }
 0x416   : > { %v7622_v59 = vpop.eup %7621  ;;  %7631 = vrsqrt.f32 %v1034_v54  ;;  %v1035_v60 = vmax.f32 %v1003_v58, 1e-24 }
 0x417   : > { %v1006_v61 = vpop.xlane.xlu0 %1005  ;;  %v1061_v0 = vmul.f32 %v7622_v59, %v8138_v35 }
 0x418   : > { %v7624_v7 = vpop.eup %7623  ;;  %7633 = vrsqrt.f32 %v1035_v60  ;;  %v1036_v3 = vmax.f32 %v1006_v61, 1e-24 }
 0x419   : > { %v1009_v4 = vpop.xlane.xlu1 %1008  ;;  %v1076_v6 = vpack.c.bf16 %v1061_v0, %v1060_v1  ;;  %v1062_v19 = vmul.f32 %v7624_v7, %v8132_v30 }
 0x41a   : > { %v7626_v9 = vpop.eup %7625  ;;  %7635 = vrsqrt.f32 %v1036_v3  ;;  %v1037_v17 = vmax.f32 %v1009_v4, 1e-24 }
 0x41b   : > { %v1063_v22 = vmul.f32 %v7626_v9, %v8136_v36  ;;  %1084 = vst.msk [vmem:[#allocation2 + $0x40] sm:$0xff] %vm593_vm0, %v1076_v6  ;;  %6881 = vmatprep.mubr.msk.bf16.mxu0 %vm593_vm0, %v1076_v6  ;;  %v1012_v20 = vpop.xlane.xlu0 %1011 }
 0x41c   : > { %v7628_v31 = vpop.eup %7627  ;;  %7637 = vrsqrt.f32 %v1037_v17  ;;  %v1038_v35 = vmax.f32 %v1012_v20, 1e-24 }
 0x41d   : > { %v1077_v25 = vpack.c.bf16 %v1063_v22, %v1062_v19  ;;  %v1015_v26 = vpop.xlane.xlu1 %1014  ;;  %v1064_v36 = vmul.f32 %v7628_v31, %v8152_v34 }
 0x41e   : > { %v7630_v27 = vpop.eup %7629  ;;  %7639 = vrsqrt.f32 %v1038_v35  ;;  %v1039_v28 = vmax.f32 %v1015_v26, 1e-24 }
 0x41f   : > { %1085 = vst.msk [vmem:[#allocation2 + $0x48] sm:$0xff] %vm593_vm0, %v1077_v25  ;;  %6882 = vmatmul.mubr.msk.bf16.vlgmr.msra.gmra.mrb[16].mxu0 %vm593_vm0, %v1077_v25  ;;  %v1018_v30 = vpop.xlane.xlu0 %1017  ;;  %v1065_v29 = vmul.f32 %v7630_v27, %v8157_v51 }
 0x420   : > { %v7632_v32 = vpop.eup %7631  ;;  %7641 = vrsqrt.f32 %v1039_v28  ;;  %v1040_v33 = vmax.f32 %v1018_v30, 1e-24 }
 0x421   : > { %v1021_v5 = vpop.xlane.xlu1 %1020  ;;  %v1078_v40 = vpack.c.bf16 %v1065_v29, %v1064_v36  ;;  %v1066_v42 = vmul.f32 %v7632_v32, %v8150_v45  ;;  %v8255_v32 = vld [vmem:[%s7953_s21] sm:$0xff]  }
 0x422   : > { %v7634_v37 = vpop.eup %7633  ;;  %7643 = vrsqrt.f32 %v1040_v33  ;;  %v1041_v38 = vmax.f32 %v1021_v5, 1e-24 }
 0x423   : > { %1086 = vst.msk [vmem:[#allocation2 + $0x50] sm:$0xff] %vm593_vm0, %v1078_v40  ;;  %6885 = vmatprep.mubr.msk.bf16.mxu0 %vm593_vm0, %v1078_v40  ;;  %v1024_v41 = vpop.xlane.xlu0 %1023  ;;  %v1067_v43 = vmul.f32 %v7634_v37, %v8155_v48 }
 0x424   : > { %v7636_v34 = vpop.eup %7635  ;;  %7645 = vrsqrt.f32 %v1041_v38  ;;  %v1042_v51 = vmax.f32 %v1024_v41, 1e-24 }
 0x425   : > { %v1027_v44 = vpop.xlane.xlu1 %1026  ;;  %v1079_v39 = vpack.c.bf16 %v1067_v43, %v1066_v42  ;;  %v1068_v52 = vmul.f32 %v7636_v34, %v8172_v8 }
 0x426   : > { %v7638_v46 = vpop.eup %7637  ;;  %7647 = vrsqrt.f32 %v1042_v51  ;;  %v1043_v47 = vmax.f32 %v1027_v44, 1e-24 }
 0x427   : > { %1087 = vst.msk [vmem:[#allocation2 + $0x58] sm:$0xff] %vm593_vm0, %v1079_v39  ;;  %6886 = vmatmul.mubr.msk.bf16.gmra.mrb[20].mxu0 %vm593_vm0, %v1079_v39  ;;  %v1069_v50 = vmul.f32 %v7638_v46, %v8177_v63 }
 0x428   : > { %v7640_v55 = vpop.eup %7639  ;;  %7649 = vrsqrt.f32 %v1043_v47 }
 0x429   : > { %v1080_v45 = vpack.c.bf16 %v1069_v50, %v1068_v52  ;;  %v1070_v53 = vmul.f32 %v7640_v55, %v8170_v2 }
 0x42a   : > { %v7642_v48 = vpop.eup %7641 }
 0x42b   : > { %1088 = vst.msk [vmem:[#allocation2 + $0x60] sm:$0xff] %vm593_vm0, %v1080_v45  ;;  %6889 = vmatprep.mubr.msk.bf16.mxu0 %vm593_vm0, %v1080_v45  ;;  %v1071_v56 = vmul.f32 %v7642_v48, %v8175_v62 }
 0x42c   : > { %v7644_v57 = vpop.eup %7643 }
 0x42d   : > { %v1081_v49 = vpack.c.bf16 %v1071_v56, %v1070_v53  ;;  %v1072_v8 = vmul.f32 %v7644_v57, %v8192_v18 }
 0x42e   : > { %v7646_v54 = vpop.eup %7645 }
 0x42f   : > { %1089 = vst.msk [vmem:[#allocation2 + $0x68] sm:$0xff] %vm593_vm0, %v1081_v49  ;;  %6890 = vmatmul.mubr.msk.bf16.gmra.mrb[24].mxu0 %vm593_vm0, %v1081_v49  ;;  %v1073_v63 = vmul.f32 %v7646_v54, %v8197_v24 }
 0x430   : > { %v7648_v58 = vpop.eup %7647 }
 0x431   : > { %v1082_v59 = vpack.c.bf16 %v1073_v63, %v1072_v8  ;;  %v1074_v2 = vmul.f32 %v7648_v58, %v8190_v21 }
 0x432   : > { %v7650_v60 = vpop.eup %7649 }
 0x433   : > { %1090 = vst.msk [vmem:[#allocation2 + $0x70] sm:$0xff] %vm593_vm0, %v1082_v59  ;;  %6893 = vmatprep.mubr.msk.bf16.mxu0 %vm593_vm0, %v1082_v59  ;;  %v1075_v62 = vmul.f32 %v7650_v60, %v8195_v23 }
 0x435   : > { %v1083_v61 = vpack.c.bf16 %v1075_v62, %v1074_v2 }
 0x437   : > { %1091 = vst.msk [vmem:[#allocation2 + $0x78] sm:$0xff] %vm593_vm0, %v1083_v61  ;;  %6894 = vmatmul.mubr.msk.bf16.gmra.mrb[28].mxu0 %vm593_vm0, %v1083_v61 }
 0x4f2   : > { %v6883_v1 = vpop.f32.mrb[16].mxu0 }
 0x4f3   : > { %v1167_v18 = vpop.f32.mrb[17].mxu0 }
 0x4f4   : > { %v6884_v0 = vpop.f32.mrb[18].mxu0 }
 0x4f5   : > { %v1231_v24 = vpack.c.bf16 %v6884_v0, %v6883_v1  ;;  %v1170_v7 = vpop.f32.mrb[19].mxu0 }
 0x4f6   : > { %v1230_v3 = vpack.c.bf16 %v1170_v7, %v1167_v18 }
 0x4f8   : > { %6897 = vmatprep.subr.bf16.mxu1 %v1230_v3 }
 0x4f9   : > { %6898 = vmatpush3.bf16.msra.mxu1 %v1230_v3 }
 0x4fa   : > { %v6887_v4 = vpop.f32.mrb[20].mxu0  ;;  %6899 = vmatprep.subr.bf16.mxu1 %v1231_v24 }
 0x4fb   : > { %v1183_v6 = vpop.f32.mrb[21].mxu0 }
 0x4fc   : > { %v6888_v9 = vpop.f32.mrb[22].mxu0 }
 0x4fd   : > { %v1233_v21 = vpack.c.bf16 %v6888_v9, %v6887_v4  ;;  %v1186_v17 = vpop.f32.mrb[23].mxu0  ;;  %6900 = vmatpush3.bf16.msra.mxu1 %v1231_v24 }
 0x4fe   : > { %v1232_v23 = vpack.c.bf16 %v1186_v17, %v1183_v6 }
 0x500   : > { %6901 = vmatprep.subr.bf16.mxu1 %v1232_v23 }
 0x501   : > { %6902 = vmatpush3.bf16.msra.mxu1 %v1232_v23 }
 0x502   : > { %v6891_v19 = vpop.f32.mrb[24].mxu0  ;;  %6903 = vmatprep.subr.bf16.mxu1 %v1233_v21 }
 0x503   : > { %v1199_v22 = vpop.f32.mrb[25].mxu0 }
 0x504   : > { %v6892_v20 = vpop.f32.mrb[26].mxu0 }
 0x505   : > { %v1235_v31 = vpack.c.bf16 %v6892_v20, %v6891_v19  ;;  %v1202_v35 = vpop.f32.mrb[27].mxu0  ;;  %6904 = vmatpush3.bf16.msra.mxu1 %v1233_v21 }
 0x506   : > { %v1234_v25 = vpack.c.bf16 %v1202_v35, %v1199_v22 }
 0x508   : > { %6905 = vmatprep.subr.bf16.mxu1 %v1234_v25 }
 0x509   : > { %6906 = vmatpush3.bf16.msra.mxu1 %v1234_v25 }
 0x50a   : > { %v6895_v26 = vpop.f32.mrb[28].mxu0  ;;  %6907 = vmatprep.subr.bf16.mxu1 %v1235_v31 }
 0x50b   : > { %v1215_v27 = vpop.f32.mrb[29].mxu0 }
 0x50c   : > { %v6896_v28 = vpop.f32.mrb[30].mxu0 }
 0x50d   : > { %v1237_v30 = vpack.c.bf16 %v6896_v28, %v6895_v26  ;;  %v1218_v36 = vpop.f32.mrb[31].mxu0  ;;  %6908 = vmatpush3.bf16.msra.mxu1 %v1235_v31 }
 0x50e   : > { %v1236_v29 = vpack.c.bf16 %v1218_v36, %v1215_v27 }
 0x510   : > { %6909 = vmatprep.subr.bf16.mxu1 %v1236_v29 }
 0x511   : > { %6910 = vmatpush3.bf16.msra.mxu1 %v1236_v29 }
 0x512   : > { %6911 = vmatprep.subr.bf16.mxu1 %v1237_v30 }
 0x515   : > { %6912 = vmatpush3.bf16.msra.mxu1 %v1237_v30 }
 0x518   : > { %6914 = vmatmul.mubr.bf16.vlgmr.msra.gmra.mrb[32].mxu1 %v7975_v10  ;;  %v7569_v10 = vld [vmem:[%s10086_s2 + $0x20] sm:$0xff]  }
 0x519   : > { %6917 = vmatprep.mubr.bf16.mxu1 %v7978_v11  ;;  %6929 = vmatprep.subr.bf16.mxu0 %v7569_v10 }
 0x51a   : > { %6930 = vmatpush3.bf16.msra.mxu0 %v7569_v10 }
 0x520   : > { %6918 = vmatmul.mubr.bf16.gmra.mrb[36].mxu1 %v7983_v12 }
 0x521   : > { %6921 = vmatprep.mubr.bf16.mxu1 %v7986_v13 }
 0x528   : > { %6922 = vmatmul.mubr.bf16.gmra.mrb[40].mxu1 %v7991_v14 }
 0x529   : > { %6925 = vmatprep.mubr.bf16.mxu1 %v7994_v15 }
 0x530   : > { %6926 = vmatmul.mubr.bf16.gmra.mrb[44].mxu1 %v7999_v16 }
 0x531   : > { %6965 = vmatprep.mubr.bf16.mxu1 %v8255_v32 }
 0x5eb   : > { %v6915_v11 = vpop.f32.mrb[32].mxu1 }
 0x5ec   : > { %v1272_v12 = vpop.f32.mrb[33].mxu1  ;;  %v8261_v33 = vmax.f32 %v6915_v11, 0.0 }
 0x5ed   : > { %v8263_v13 = vmax.f32 %v1272_v12, 0.0  ;;  %v6916_v14 = vpop.f32.mrb[34].mxu1  ;;  %v7570_v12 = vld [vmem:[%s10086_s2 + $0x28] sm:$0xff]  }
 0x5ee   : > { %v1275_v15 = vpop.f32.mrb[35].mxu1  ;;  %v8265_v5 = vmax.f32 %v6916_v14, 0.0  ;;  %v1353_v41 = vmul.f32 %v8261_v33, %v8261_v33  ;;  %6931 = vmatprep.subr.bf16.mxu0 %v7570_v12 }
 0x5ef   : > { %v8267_v16 = vmax.f32 %v1275_v15, 0.0  ;;  %v1351_v40 = vmul.f32 %v8263_v13, %v8263_v13  ;;  %6932 = vmatpush3.bf16.msra.mxu0 %v7570_v12 }
 0x5f0   : > { %v1354_v34 = vmul.f32 %v8265_v5, %v8265_v5  ;;  %v1373_v47 = vsel %vm593_vm0, %v1353_v41, 0.0 }
 0x5f1   : > { %v1367_v37 = vsel %vm593_vm0, %v1351_v40, 0.0  ;;  %v1352_v38 = vmul.f32 %v8267_v16, %v8267_v16 }
 0x5f2   : > { %1368 = vadd.xlane.f32.xlu0 %v1367_v37  ;;  %v1376_v45 = vsel %vm593_vm0, %v1354_v34, 0.0 }
 0x5f3   : > { %v6919_v42 = vpop.f32.mrb[36].mxu1  ;;  %v1370_v43 = vsel %vm593_vm0, %v1352_v38, 0.0 }
 0x5f4   : > { %1371 = vadd.xlane.f32.xlu1 %v1370_v43  ;;  %v1288_v51 = vpop.f32.mrb[37].mxu1  ;;  %v8279_v44 = vmax.f32 %v6919_v42, 0.0 }
 0x5f5   : > { %v8281_v39 = vmax.f32 %v1288_v51, 0.0  ;;  %v6920_v46 = vpop.f32.mrb[38].mxu1 }
 0x5f6   : > { %1374 = vadd.xlane.f32.xlu0 %v1373_v47  ;;  %v1291_v52 = vpop.f32.mrb[39].mxu1  ;;  %v8284_v50 = vmax.f32 %v6920_v46, 0.0  ;;  %v1357_v57 = vmul.f32 %v8279_v44, %v8279_v44 }
 0x5f7   : > { %v8286_v55 = vmax.f32 %v1291_v52, 0.0  ;;  %v1355_v48 = vmul.f32 %v8281_v39, %v8281_v39 }
 0x5f8   : > { %1377 = vadd.xlane.f32.xlu1 %v1376_v45  ;;  %v1358_v8 = vmul.f32 %v8284_v50, %v8284_v50  ;;  %v1385_v2 = vsel %vm593_vm0, %v1357_v57, 0.0 }
 0x5f9   : > { %v1379_v53 = vsel %vm593_vm0, %v1355_v48, 0.0  ;;  %v1356_v56 = vmul.f32 %v8286_v55, %v8286_v55 }
 0x5fa   : > { %1380 = vadd.xlane.f32.xlu0 %v1379_v53  ;;  %v1388_v18 = vsel %vm593_vm0, %v1358_v8, 0.0 }
 0x5fb   : > { %v6923_v49 = vpop.f32.mrb[40].mxu1  ;;  %v1382_v54 = vsel %vm593_vm0, %v1356_v56, 0.0 }
 0x5fc   : > { %1383 = vadd.xlane.f32.xlu1 %v1382_v54  ;;  %v1304_v63 = vpop.f32.mrb[41].mxu1  ;;  %v8299_v58 = vmax.f32 %v6923_v49, 0.0 }
 0x5fd   : > { %v8301_v59 = vmax.f32 %v1304_v63, 0.0  ;;  %v6924_v60 = vpop.f32.mrb[42].mxu1 }
 0x5fe   : > { %1386 = vadd.xlane.f32.xlu0 %v1385_v2  ;;  %v1307_v62 = vpop.f32.mrb[43].mxu1  ;;  %v8304_v61 = vmax.f32 %v6924_v60, 0.0  ;;  %v1361_v3 = vmul.f32 %v8299_v58, %v8299_v58 }
 0x5ff   : > { %v8306_v1 = vmax.f32 %v1307_v62, 0.0  ;;  %v1359_v0 = vmul.f32 %v8301_v59, %v8301_v59 }
 0x600   : > { %1389 = vadd.xlane.f32.xlu1 %v1388_v18  ;;  %v1362_v9 = vmul.f32 %v8304_v61, %v8304_v61  ;;  %v1397_v22 = vsel %vm593_vm0, %v1361_v3, 0.0 }
 0x601   : > { %v1391_v24 = vsel %vm593_vm0, %v1359_v0, 0.0  ;;  %v1360_v7 = vmul.f32 %v8306_v1, %v8306_v1 }
 0x602   : > { %1392 = vadd.xlane.f32.xlu0 %v1391_v24  ;;  %v1400_v25 = vsel %vm593_vm0, %v1362_v9, 0.0 }
 0x603   : > { %v6927_v4 = vpop.f32.mrb[44].mxu1  ;;  %v1394_v6 = vsel %vm593_vm0, %v1360_v7, 0.0 }
 0x604   : > { %1395 = vadd.xlane.f32.xlu1 %v1394_v6  ;;  %v1320_v21 = vpop.f32.mrb[45].mxu1  ;;  %v8319_v17 = vmax.f32 %v6927_v4, 0.0 }
 0x605   : > { %v8321_v23 = vmax.f32 %v1320_v21, 0.0  ;;  %v6928_v19 = vpop.f32.mrb[46].mxu1 }
 0x606   : > { %1398 = vadd.xlane.f32.xlu0 %v1397_v22  ;;  %v1323_v20 = vpop.f32.mrb[47].mxu1  ;;  %v8324_v31 = vmax.f32 %v6928_v19, 0.0  ;;  %v1365_v30 = vmul.f32 %v8319_v17, %v8319_v17 }
 0x607   : > { %v8326_v35 = vmax.f32 %v1323_v20, 0.0  ;;  %v1363_v26 = vmul.f32 %v8321_v23, %v8321_v23 }
 0x608   : > { %1401 = vadd.xlane.f32.xlu1 %v1400_v25  ;;  %v1366_v29 = vmul.f32 %v8324_v31, %v8324_v31  ;;  %v1409_v10 = vsel %vm593_vm0, %v1365_v30, 0.0 }
 0x609   : > { %v1403_v27 = vsel %vm593_vm0, %v1363_v26, 0.0  ;;  %v1364_v28 = vmul.f32 %v8326_v35, %v8326_v35 }
 0x60a   : > { %1404 = vadd.xlane.f32.xlu0 %v1403_v27  ;;  %v1412_v11 = vsel %vm593_vm0, %v1366_v29, 0.0 }
 0x60b   : > { %v1406_v36 = vsel %vm593_vm0, %v1364_v28, 0.0 }
 0x60c   : > { %1407 = vadd.xlane.f32.xlu1 %v1406_v36 }
 0x60e   : > { %1410 = vadd.xlane.f32.xlu0 %v1409_v10 }
 0x610   : > { %1413 = vadd.xlane.f32.xlu1 %v1412_v11 }
 0x67f   : > { %v1369_v14 = vpop.xlane.xlu0 %1368 }
 0x680   : > { %v1415_v15 = vmax.f32 %v1369_v14, 1e-24 }
 0x681   : > { %v1372_v40 = vpop.xlane.xlu1 %1371 }
 0x682   : > { %7651 = vrsqrt.f32 %v1415_v15  ;;  %v1416_v37 = vmax.f32 %v1372_v40, 1e-24 }
 0x683   : > { %v1375_v38 = vpop.xlane.xlu0 %1374 }
 0x684   : > { %7653 = vrsqrt.f32 %v1416_v37  ;;  %v1417_v41 = vmax.f32 %v1375_v38, 1e-24 }
 0x685   : > { %v1378_v42 = vpop.xlane.xlu1 %1377 }
 0x686   : > { %7655 = vrsqrt.f32 %v1417_v41  ;;  %v1418_v43 = vmax.f32 %v1378_v42, 1e-24 }
 0x687   : > { %v1381_v34 = vpop.xlane.xlu0 %1380 }
 0x688   : > { %7657 = vrsqrt.f32 %v1418_v43  ;;  %v1419_v51 = vmax.f32 %v1381_v34, 1e-24 }
 0x689   : > { %v1384_v46 = vpop.xlane.xlu1 %1383 }
 0x68a   : > { %7659 = vrsqrt.f32 %v1419_v51  ;;  %v1420_v47 = vmax.f32 %v1384_v46, 1e-24 }
 0x68b   : > { %v1387_v52 = vpop.xlane.xlu0 %1386 }
 0x68c   : > { %v7652_v45 = vpop.eup %7651  ;;  %7661 = vrsqrt.f32 %v1420_v47  ;;  %v1421_v48 = vmax.f32 %v1387_v52, 1e-24 }
 0x68d   : > { %v1390_v53 = vpop.xlane.xlu1 %1389  ;;  %v1447_v54 = vmul.f32 %v7652_v45, %v8263_v13 }
 0x68e   : > { %v7654_v56 = vpop.eup %7653  ;;  %7663 = vrsqrt.f32 %v1421_v48  ;;  %v1422_v57 = vmax.f32 %v1390_v53, 1e-24 }
 0x68f   : > { %v1393_v49 = vpop.xlane.xlu0 %1392  ;;  %v1448_v8 = vmul.f32 %v7654_v56, %v8267_v16 }
 0x690   : > { %v7656_v63 = vpop.eup %7655  ;;  %7665 = vrsqrt.f32 %v1422_v57  ;;  %v1423_v60 = vmax.f32 %v1393_v49, 1e-24 }
 0x691   : > { %v1396_v2 = vpop.xlane.xlu1 %1395  ;;  %v1463_v62 = vpack.c.bf16 %v1448_v8, %v1447_v54  ;;  %v1449_v24 = vmul.f32 %v7656_v63, %v8261_v33 }
 0x692   : > { %v7658_v18 = vpop.eup %7657  ;;  %7667 = vrsqrt.f32 %v1423_v60  ;;  %v1424_v0 = vmax.f32 %v1396_v2, 1e-24 }
 0x693   : > { %v1450_v7 = vmul.f32 %v7658_v18, %v8265_v5  ;;  %1471 = vst.msk [vmem:[#allocation2 + $0x80] sm:$0xff] %vm593_vm0, %v1463_v62  ;;  %6933 = vmatprep.mubr.msk.bf16.mxu0 %vm593_vm0, %v1463_v62  ;;  %v1399_v3 = vpop.xlane.xlu0 %1398 }
 0x694   : > { %v7660_v13 = vpop.eup %7659  ;;  %7669 = vrsqrt.f32 %v1424_v0  ;;  %v1425_v16 = vmax.f32 %v1399_v3, 1e-24 }
 0x695   : > { %v1464_v4 = vpack.c.bf16 %v1450_v7, %v1449_v24  ;;  %v1402_v6 = vpop.xlane.xlu1 %1401  ;;  %v1451_v5 = vmul.f32 %v7660_v13, %v8281_v39 }
 0x696   : > { %v7662_v9 = vpop.eup %7661  ;;  %7671 = vrsqrt.f32 %v1425_v16  ;;  %v1426_v21 = vmax.f32 %v1402_v6, 1e-24  ;;  %v8377_v6 = vld [vmem:[%s7953_s21 + $0x8] sm:$0xff]  }
 0x697   : > { %1472 = vst.msk [vmem:[#allocation2 + $0x88] sm:$0xff] %vm593_vm0, %v1464_v4  ;;  %6934 = vmatmul.mubr.msk.bf16.vlgmr.msra.gmra.mrb[32].mxu0 %vm593_vm0, %v1464_v4  ;;  %v1405_v33 = vpop.xlane.xlu0 %1404  ;;  %v1452_v19 = vmul.f32 %v7662_v9, %v8286_v55  ;;  %v8381_v9 = vld [vmem:[%s7953_s21 + $0x10] sm:$0xff]  }
 0x698   : > { %v7664_v22 = vpop.eup %7663  ;;  %7673 = vrsqrt.f32 %v1426_v21  ;;  %v1427_v20 = vmax.f32 %v1405_v33, 1e-24  ;;  %v8385_v21 = vld [vmem:[%s7953_s21 + $0x18] sm:$0xff]   ;;  %v8389_v33 = vld [vmem:[%s7953_s21 + $0x20] sm:$0xff]  }
 0x699   : > { %v1408_v25 = vpop.xlane.xlu1 %1407  ;;  %v1465_v26 = vpack.c.bf16 %v1452_v19, %v1451_v5  ;;  %v1453_v36 = vmul.f32 %v7664_v22, %v8279_v44  ;;  %v8393_v5 = vld [vmem:[%s7953_s21 + $0x28] sm:$0xff]   ;;  %v8397_v19 = vld [vmem:[%s7953_s21 + $0x30] sm:$0xff]   ;;  %v8401_v22 = vld [vmem:[%s7953_s21 + $0x38] sm:$0xff]  }
 0x69a   : > { %v7666_v27 = vpop.eup %7665  ;;  %7675 = vrsqrt.f32 %v1427_v20  ;;  %v1428_v28 = vmax.f32 %v1408_v25, 1e-24  ;;  %v7571_v20 = vld [vmem:[%s10086_s2 + $0x30] sm:$0xff]  }
 0x69b   : > { %1473 = vst.msk [vmem:[#allocation2 + $0x90] sm:$0xff] %vm593_vm0, %v1465_v26  ;;  %6937 = vmatprep.mubr.msk.bf16.mxu0 %vm593_vm0, %v1465_v26  ;;  %v1411_v30 = vpop.xlane.xlu0 %1410  ;;  %v1454_v29 = vmul.f32 %v7666_v27, %v8284_v50  ;;  %6981 = vmatprep.subr.bf16.mxu0 %v7571_v20 }
 0x69c   : > { %v7668_v39 = vpop.eup %7667  ;;  %7677 = vrsqrt.f32 %v1428_v28  ;;  %v1429_v55 = vmax.f32 %v1411_v30, 1e-24  ;;  %6982 = vmatpush3.bf16.msra.mxu0 %v7571_v20 }
 0x69d   : > { %v1414_v10 = vpop.xlane.xlu1 %1413  ;;  %v1466_v11 = vpack.c.bf16 %v1454_v29, %v1453_v36  ;;  %v1455_v15 = vmul.f32 %v7668_v39, %v8301_v59 }
 0x69e   : > { %v7670_v12 = vpop.eup %7669  ;;  %7679 = vrsqrt.f32 %v1429_v55  ;;  %v1430_v14 = vmax.f32 %v1414_v10, 1e-24 }
 0x69f   : > { %1474 = vst.msk [vmem:[#allocation2 + $0x98] sm:$0xff] %vm593_vm0, %v1466_v11  ;;  %6938 = vmatmul.mubr.msk.bf16.gmra.mrb[36].mxu0 %vm593_vm0, %v1466_v11  ;;  %v1456_v40 = vmul.f32 %v7670_v12, %v8306_v1 }
 0x6a0   : > { %v7672_v37 = vpop.eup %7671  ;;  %7681 = vrsqrt.f32 %v1430_v14 }
 0x6a1   : > { %v1467_v44 = vpack.c.bf16 %v1456_v40, %v1455_v15  ;;  %v1457_v38 = vmul.f32 %v7672_v37, %v8299_v58 }
 0x6a2   : > { %v7674_v50 = vpop.eup %7673 }
 0x6a3   : > { %1475 = vst.msk [vmem:[#allocation2 + $0xa0] sm:$0xff] %vm593_vm0, %v1467_v44  ;;  %6941 = vmatprep.mubr.msk.bf16.mxu0 %vm593_vm0, %v1467_v44  ;;  %v1458_v41 = vmul.f32 %v7674_v50, %v8304_v61 }
 0x6a4   : > { %v7676_v42 = vpop.eup %7675 }
 0x6a5   : > { %v1468_v43 = vpack.c.bf16 %v1458_v41, %v1457_v38  ;;  %v1459_v59 = vmul.f32 %v7676_v42, %v8321_v23 }
 0x6a6   : > { %v7678_v34 = vpop.eup %7677 }
 0x6a7   : > { %1476 = vst.msk [vmem:[#allocation2 + $0xa8] sm:$0xff] %vm593_vm0, %v1468_v43  ;;  %6942 = vmatmul.mubr.msk.bf16.gmra.mrb[40].mxu0 %vm593_vm0, %v1468_v43  ;;  %v1460_v1 = vmul.f32 %v7678_v34, %v8326_v35 }
 0x6a8   : > { %v7680_v51 = vpop.eup %7679 }
 0x6a9   : > { %v1469_v46 = vpack.c.bf16 %v1460_v1, %v1459_v59  ;;  %v1461_v58 = vmul.f32 %v7680_v51, %v8319_v17 }
 0x6aa   : > { %v7682_v47 = vpop.eup %7681 }
 0x6ab   : > { %1477 = vst.msk [vmem:[#allocation2 + $0xb0] sm:$0xff] %vm593_vm0, %v1469_v46  ;;  %6945 = vmatprep.mubr.msk.bf16.mxu0 %vm593_vm0, %v1469_v46  ;;  %v1462_v61 = vmul.f32 %v7682_v47, %v8324_v31 }
 0x6ad   : > { %v1470_v52 = vpack.c.bf16 %v1462_v61, %v1461_v58 }
 0x6af   : > { %1478 = vst.msk [vmem:[#allocation2 + $0xb8] sm:$0xff] %vm593_vm0, %v1470_v52  ;;  %6946 = vmatmul.mubr.msk.bf16.gmra.mrb[44].mxu0 %vm593_vm0, %v1470_v52 }
 0x76a   : > { %v6935_v45 = vpop.f32.mrb[32].mxu0 }
 0x76b   : > { %v1554_v23 = vpop.f32.mrb[33].mxu0 }
 0x76c   : > { %v6936_v48 = vpop.f32.mrb[34].mxu0 }
 0x76d   : > { %v1618_v35 = vpack.c.bf16 %v6936_v48, %v6935_v45  ;;  %v1557_v53 = vpop.f32.mrb[35].mxu0 }
 0x76e   : > { %v1617_v56 = vpack.c.bf16 %v1557_v53, %v1554_v23 }
 0x770   : > { %6949 = vmatprep.subr.bf16.mxu1 %v1617_v56 }
 0x771   : > { %6950 = vmatpush3.bf16.msra.mxu1 %v1617_v56 }
 0x772   : > { %v6939_v57 = vpop.f32.mrb[36].mxu0  ;;  %6951 = vmatprep.subr.bf16.mxu1 %v1618_v35 }
 0x773   : > { %v1570_v49 = vpop.f32.mrb[37].mxu0 }
 0x774   : > { %v6940_v54 = vpop.f32.mrb[38].mxu0 }
 0x775   : > { %v1620_v17 = vpack.c.bf16 %v6940_v54, %v6939_v57  ;;  %v1573_v8 = vpop.f32.mrb[39].mxu0  ;;  %6952 = vmatpush3.bf16.msra.mxu1 %v1618_v35 }
 0x776   : > { %v1619_v31 = vpack.c.bf16 %v1573_v8, %v1570_v49 }
 0x778   : > { %6953 = vmatprep.subr.bf16.mxu1 %v1619_v31 }
 0x779   : > { %6954 = vmatpush3.bf16.msra.mxu1 %v1619_v31 }
 0x77a   : > { %v6943_v63 = vpop.f32.mrb[40].mxu0  ;;  %6955 = vmatprep.subr.bf16.mxu1 %v1620_v17 }
 0x77b   : > { %v1586_v60 = vpop.f32.mrb[41].mxu0 }
 0x77c   : > { %v6944_v2 = vpop.f32.mrb[42].mxu0 }
 0x77d   : > { %v1622_v62 = vpack.c.bf16 %v6944_v2, %v6943_v63  ;;  %v1589_v18 = vpop.f32.mrb[43].mxu0  ;;  %6956 = vmatpush3.bf16.msra.mxu1 %v1620_v17 }
 0x77e   : > { %v1621_v0 = vpack.c.bf16 %v1589_v18, %v1586_v60 }
 0x780   : > { %6957 = vmatprep.subr.bf16.mxu1 %v1621_v0 }
 0x781   : > { %6958 = vmatpush3.bf16.msra.mxu1 %v1621_v0 }
 0x782   : > { %v6947_v24 = vpop.f32.mrb[44].mxu0  ;;  %6959 = vmatprep.subr.bf16.mxu1 %v1622_v62 }
 0x783   : > { %v1602_v7 = vpop.f32.mrb[45].mxu0 }
 0x784   : > { %v6948_v3 = vpop.f32.mrb[46].mxu0 }
 0x785   : > { %v1624_v13 = vpack.c.bf16 %v6948_v3, %v6947_v24  ;;  %v1605_v16 = vpop.f32.mrb[47].mxu0  ;;  %6960 = vmatpush3.bf16.msra.mxu1 %v1622_v62 }
 0x786   : > { %v1623_v4 = vpack.c.bf16 %v1605_v16, %v1602_v7 }
 0x788   : > { %6961 = vmatprep.subr.bf16.mxu1 %v1623_v4 }
 0x789   : > { %6962 = vmatpush3.bf16.msra.mxu1 %v1623_v4 }
 0x78a   : > { %6963 = vmatprep.subr.bf16.mxu1 %v1624_v13 }
 0x78d   : > { %6964 = vmatpush3.bf16.msra.mxu1 %v1624_v13 }
 0x790   : > { %6966 = vmatmul.mubr.bf16.vlgmr.msra.gmra.mrb[48].mxu1 %v8377_v6 }
 0x791   : > { %6969 = vmatprep.mubr.bf16.mxu1 %v8381_v9 }
 0x798   : > { %6970 = vmatmul.mubr.bf16.gmra.mrb[52].mxu1 %v8385_v21 }
 0x799   : > { %6973 = vmatprep.mubr.bf16.mxu1 %v8389_v33 }
 0x7a0   : > { %6974 = vmatmul.mubr.bf16.gmra.mrb[56].mxu1 %v8393_v5 }
 0x7a1   : > { %6977 = vmatprep.mubr.bf16.mxu1 %v8397_v19 }
 0x7a8   : > { %6978 = vmatmul.mubr.bf16.gmra.mrb[60].mxu1 %v8401_v22 }
 0x7a9   : > { %7017 = vmatprep.mubr.bf16.mxu1 %v8255_v32 }
 0x863   : > { %v6967_v25 = vpop.f32.mrb[48].mxu1 }
 0x864   : > { %v1659_v26 = vpop.f32.mrb[49].mxu1  ;;  %v8408_v27 = vmax.f32 %v6967_v25, 0.0 }
 0x865   : > { %v8410_v28 = vmax.f32 %v1659_v26, 0.0  ;;  %v6968_v30 = vpop.f32.mrb[50].mxu1 }
 0x866   : > { %v1662_v36 = vpop.f32.mrb[51].mxu1  ;;  %v8412_v29 = vmax.f32 %v6968_v30, 0.0  ;;  %v1740_v12 = vmul.f32 %v8408_v27, %v8408_v27 }
 0x867   : > { %v8414_v39 = vmax.f32 %v1662_v36, 0.0  ;;  %v1738_v55 = vmul.f32 %v8410_v28, %v8410_v28 }
 0x868   : > { %v1741_v40 = vmul.f32 %v8412_v29, %v8412_v29  ;;  %v1760_v41 = vsel %vm593_vm0, %v1740_v12, 0.0 }
 0x869   : > { %v1754_v10 = vsel %vm593_vm0, %v1738_v55, 0.0  ;;  %v1739_v11 = vmul.f32 %v8414_v39, %v8414_v39 }
 0x86a   : > { %1755 = vadd.xlane.f32.xlu0 %v1754_v10  ;;  %v1763_v59 = vsel %vm593_vm0, %v1741_v40, 0.0 }
 0x86b   : > { %v6971_v14 = vpop.f32.mrb[52].mxu1  ;;  %v1757_v15 = vsel %vm593_vm0, %v1739_v11, 0.0 }
 0x86c   : > { %1758 = vadd.xlane.f32.xlu1 %v1757_v15  ;;  %v1675_v37 = vpop.f32.mrb[53].mxu1  ;;  %v8426_v44 = vmax.f32 %v6971_v14, 0.0  ;;  %v7572_v14 = vld [vmem:[%s10086_s2 + $0x38] sm:$0xff]  }
 0x86d   : > { %v8428_v50 = vmax.f32 %v1675_v37, 0.0  ;;  %v6972_v38 = vpop.f32.mrb[54].mxu1  ;;  %6983 = vmatprep.subr.bf16.mxu0 %v7572_v14 }
 0x86e   : > { %1761 = vadd.xlane.f32.xlu0 %v1760_v41  ;;  %v1678_v42 = vpop.f32.mrb[55].mxu1  ;;  %v8431_v43 = vmax.f32 %v6972_v38, 0.0  ;;  %v1744_v47 = vmul.f32 %v8426_v44, %v8426_v44  ;;  %6984 = vmatpush3.bf16.msra.mxu0 %v7572_v14 }
 0x86f   : > { %v8433_v34 = vmax.f32 %v1678_v42, 0.0  ;;  %v1742_v1 = vmul.f32 %v8428_v50, %v8428_v50 }
 0x870   : > { %1764 = vadd.xlane.f32.xlu1 %v1763_v59  ;;  %v1745_v52 = vmul.f32 %v8431_v43, %v8431_v43  ;;  %v1772_v53 = vsel %vm593_vm0, %v1744_v47, 0.0 }
 0x871   : > { %v1766_v51 = vsel %vm593_vm0, %v1742_v1, 0.0  ;;  %v1743_v46 = vmul.f32 %v8433_v34, %v8433_v34 }
 0x872   : > { %1767 = vadd.xlane.f32.xlu0 %v1766_v51  ;;  %v1775_v54 = vsel %vm593_vm0, %v1745_v52, 0.0 }
 0x873   : > { %v6975_v58 = vpop.f32.mrb[56].mxu1  ;;  %v1769_v61 = vsel %vm593_vm0, %v1743_v46, 0.0 }
 0x874   : > { %1770 = vadd.xlane.f32.xlu1 %v1769_v61  ;;  %v1691_v45 = vpop.f32.mrb[57].mxu1  ;;  %v8446_v23 = vmax.f32 %v6975_v58, 0.0 }
 0x875   : > { %v8448_v48 = vmax.f32 %v1691_v45, 0.0  ;;  %v6976_v35 = vpop.f32.mrb[58].mxu1 }
 0x876   : > { %1773 = vadd.xlane.f32.xlu0 %v1772_v53  ;;  %v1694_v56 = vpop.f32.mrb[59].mxu1  ;;  %v8451_v57 = vmax.f32 %v6976_v35, 0.0  ;;  %v1748_v63 = vmul.f32 %v8446_v23, %v8446_v23 }
 0x877   : > { %v8453_v49 = vmax.f32 %v1694_v56, 0.0  ;;  %v1746_v17 = vmul.f32 %v8448_v48, %v8448_v48 }
 0x878   : > { %1776 = vadd.xlane.f32.xlu1 %v1775_v54  ;;  %v1749_v62 = vmul.f32 %v8451_v57, %v8451_v57  ;;  %v1784_v3 = vsel %vm593_vm0, %v1748_v63, 0.0 }
 0x879   : > { %v1778_v8 = vsel %vm593_vm0, %v1746_v17, 0.0  ;;  %v1747_v31 = vmul.f32 %v8453_v49, %v8453_v49 }
 0x87a   : > { %1779 = vadd.xlane.f32.xlu0 %v1778_v8  ;;  %v1787_v20 = vsel %vm593_vm0, %v1749_v62, 0.0 }
 0x87b   : > { %v6979_v60 = vpop.f32.mrb[60].mxu1  ;;  %v1781_v2 = vsel %vm593_vm0, %v1747_v31, 0.0 }
 0x87c   : > { %1782 = vadd.xlane.f32.xlu1 %v1781_v2  ;;  %v1707_v18 = vpop.f32.mrb[61].mxu1  ;;  %v8466_v0 = vmax.f32 %v6979_v60, 0.0 }
 0x87d   : > { %v8468_v24 = vmax.f32 %v1707_v18, 0.0  ;;  %v6980_v7 = vpop.f32.mrb[62].mxu1 }
 0x87e   : > { %1785 = vadd.xlane.f32.xlu0 %v1784_v3  ;;  %v1710_v13 = vpop.f32.mrb[63].mxu1  ;;  %v8471_v16 = vmax.f32 %v6980_v7, 0.0  ;;  %v1752_v36 = vmul.f32 %v8466_v0, %v8466_v0 }
 0x87f   : > { %v8473_v4 = vmax.f32 %v1710_v13, 0.0  ;;  %v1750_v25 = vmul.f32 %v8468_v24, %v8468_v24 }
 0x880   : > { %1788 = vadd.xlane.f32.xlu1 %v1787_v20  ;;  %v1753_v10 = vmul.f32 %v8471_v16, %v8471_v16  ;;  %v1796_v11 = vsel %vm593_vm0, %v1752_v36, 0.0 }
 0x881   : > { %v1790_v26 = vsel %vm593_vm0, %v1750_v25, 0.0  ;;  %v1751_v30 = vmul.f32 %v8473_v4, %v8473_v4 }
 0x882   : > { %1791 = vadd.xlane.f32.xlu0 %v1790_v26  ;;  %v1799_v12 = vsel %vm593_vm0, %v1753_v10, 0.0 }
 0x883   : > { %v1793_v55 = vsel %vm593_vm0, %v1751_v30, 0.0 }
 0x884   : > { %1794 = vadd.xlane.f32.xlu1 %v1793_v55 }
 0x886   : > { %1797 = vadd.xlane.f32.xlu0 %v1796_v11 }
 0x888   : > { %1800 = vadd.xlane.f32.xlu1 %v1799_v12 }
 0x8f7   : > { %v1756_v15 = vpop.xlane.xlu0 %1755 }
 0x8f8   : > { %v1802_v40 = vmax.f32 %v1756_v15, 1e-24 }
 0x8f9   : > { %v1759_v37 = vpop.xlane.xlu1 %1758 }
 0x8fa   : > { %7683 = vrsqrt.f32 %v1802_v40  ;;  %v1803_v38 = vmax.f32 %v1759_v37, 1e-24 }
 0x8fb   : > { %v1762_v41 = vpop.xlane.xlu0 %1761 }
 0x8fc   : > { %7685 = vrsqrt.f32 %v1803_v38  ;;  %v1804_v42 = vmax.f32 %v1762_v41, 1e-24 }
 0x8fd   : > { %v1765_v59 = vpop.xlane.xlu1 %1764 }
 0x8fe   : > { %7687 = vrsqrt.f32 %v1804_v42  ;;  %v1805_v1 = vmax.f32 %v1765_v59, 1e-24 }
 0x8ff   : > { %v1768_v51 = vpop.xlane.xlu0 %1767 }
 0x900   : > { %7689 = vrsqrt.f32 %v1805_v1  ;;  %v1806_v46 = vmax.f32 %v1768_v51, 1e-24 }
 0x901   : > { %v1771_v47 = vpop.xlane.xlu1 %1770 }
 0x902   : > { %7691 = vrsqrt.f32 %v1806_v46  ;;  %v1807_v58 = vmax.f32 %v1771_v47, 1e-24 }
 0x903   : > { %v1774_v61 = vpop.xlane.xlu0 %1773 }
 0x904   : > { %v7684_v52 = vpop.eup %7683  ;;  %7693 = vrsqrt.f32 %v1807_v58  ;;  %v1808_v45 = vmax.f32 %v1774_v61, 1e-24 }
 0x905   : > { %v1777_v35 = vpop.xlane.xlu1 %1776  ;;  %v1834_v17 = vmul.f32 %v7684_v52, %v8410_v28 }
 0x906   : > { %v7686_v53 = vpop.eup %7685  ;;  %7695 = vrsqrt.f32 %v1808_v45  ;;  %v1809_v56 = vmax.f32 %v1777_v35, 1e-24 }
 0x907   : > { %v1780_v54 = vpop.xlane.xlu0 %1779  ;;  %v1835_v8 = vmul.f32 %v7686_v53, %v8414_v39 }
 0x908   : > { %v7688_v31 = vpop.eup %7687  ;;  %7697 = vrsqrt.f32 %v1809_v56  ;;  %v1810_v63 = vmax.f32 %v1780_v54, 1e-24 }
 0x909   : > { %v1783_v60 = vpop.xlane.xlu1 %1782  ;;  %v1850_v2 = vpack.c.bf16 %v1835_v8, %v1834_v17  ;;  %v1836_v7 = vmul.f32 %v7688_v31, %v8408_v27 }
 0x90a   : > { %v7690_v62 = vpop.eup %7689  ;;  %7699 = vrsqrt.f32 %v1810_v63  ;;  %v1811_v18 = vmax.f32 %v1783_v60, 1e-24 }
 0x90b   : > { %v1837_v3 = vmul.f32 %v7690_v62, %v8412_v29  ;;  %1858 = vst.msk [vmem:[#allocation2 + $0xc0] sm:$0xff] %vm593_vm0, %v1850_v2  ;;  %6985 = vmatprep.mubr.msk.bf16.mxu0 %vm593_vm0, %v1850_v2  ;;  %v1786_v13 = vpop.xlane.xlu0 %1785 }
 0x90c   : > { %v7692_v28 = vpop.eup %7691  ;;  %7701 = vrsqrt.f32 %v1811_v18  ;;  %v1812_v39 = vmax.f32 %v1786_v13, 1e-24 }
 0x90d   : > { %v1851_v20 = vpack.c.bf16 %v1837_v3, %v1836_v7  ;;  %v1789_v25 = vpop.xlane.xlu1 %1788  ;;  %v1838_v29 = vmul.f32 %v7692_v28, %v8428_v50 }
 0x90e   : > { %v7694_v26 = vpop.eup %7693  ;;  %7703 = vrsqrt.f32 %v1812_v39  ;;  %v1813_v30 = vmax.f32 %v1789_v25, 1e-24 }
 0x90f   : > { %1859 = vst.msk [vmem:[#allocation2 + $0xc8] sm:$0xff] %vm593_vm0, %v1851_v20  ;;  %6986 = vmatmul.mubr.msk.bf16.vlgmr.msra.gmra.mrb[48].mxu0 %vm593_vm0, %v1851_v20  ;;  %v1792_v27 = vpop.xlane.xlu0 %1791  ;;  %v1839_v36 = vmul.f32 %v7694_v26, %v8433_v34 }
 0x910   : > { %v7696_v55 = vpop.eup %7695  ;;  %7705 = vrsqrt.f32 %v1813_v30  ;;  %v1814_v10 = vmax.f32 %v1792_v27, 1e-24 }
 0x911   : > { %v1795_v11 = vpop.xlane.xlu1 %1794  ;;  %v1852_v12 = vpack.c.bf16 %v1839_v36, %v1838_v29  ;;  %v1840_v37 = vmul.f32 %v7696_v55, %v8426_v44 }
 0x912   : > { %v7698_v14 = vpop.eup %7697  ;;  %7707 = vrsqrt.f32 %v1814_v10  ;;  %v1815_v15 = vmax.f32 %v1795_v11, 1e-24  ;;  %v7573_v10 = vld [vmem:[%s10086_s2 + $0x40] sm:$0xff]  }
 0x913   : > { %1860 = vst.msk [vmem:[#allocation2 + $0xd0] sm:$0xff] %vm593_vm0, %v1852_v12  ;;  %6989 = vmatprep.mubr.msk.bf16.mxu0 %vm593_vm0, %v1852_v12  ;;  %v1798_v40 = vpop.xlane.xlu0 %1797  ;;  %v1841_v38 = vmul.f32 %v7698_v14, %v8431_v43  ;;  %7033 = vmatprep.subr.bf16.mxu0 %v7573_v10 }
 0x914   : > { %v7700_v50 = vpop.eup %7699  ;;  %7709 = vrsqrt.f32 %v1815_v15  ;;  %v1816_v34 = vmax.f32 %v1798_v40, 1e-24  ;;  %7034 = vmatpush3.bf16.msra.mxu0 %v7573_v10 }
 0x915   : > { %v1801_v41 = vpop.xlane.xlu1 %1800  ;;  %v1853_v42 = vpack.c.bf16 %v1841_v38, %v1840_v37  ;;  %v1842_v51 = vmul.f32 %v7700_v50, %v8448_v48 }
 0x916   : > { %v7702_v59 = vpop.eup %7701  ;;  %7711 = vrsqrt.f32 %v1816_v34  ;;  %v1817_v1 = vmax.f32 %v1801_v41, 1e-24 }
 0x917   : > { %1861 = vst.msk [vmem:[#allocation2 + $0xd8] sm:$0xff] %vm593_vm0, %v1853_v42  ;;  %6990 = vmatmul.mubr.msk.bf16.gmra.mrb[52].mxu0 %vm593_vm0, %v1853_v42  ;;  %v1843_v46 = vmul.f32 %v7702_v59, %v8453_v49 }
 0x918   : > { %v7704_v47 = vpop.eup %7703  ;;  %7713 = vrsqrt.f32 %v1817_v1 }
 0x919   : > { %v1854_v44 = vpack.c.bf16 %v1843_v46, %v1842_v51  ;;  %v1844_v58 = vmul.f32 %v7704_v47, %v8446_v23 }
 0x91a   : > { %v7706_v43 = vpop.eup %7705 }
 0x91b   : > { %1862 = vst.msk [vmem:[#allocation2 + $0xe0] sm:$0xff] %vm593_vm0, %v1854_v44  ;;  %6993 = vmatprep.mubr.msk.bf16.mxu0 %vm593_vm0, %v1854_v44  ;;  %v1845_v61 = vmul.f32 %v7706_v43, %v8451_v57 }
 0x91c   : > { %v7708_v52 = vpop.eup %7707 }
 0x91d   : > { %v1855_v45 = vpack.c.bf16 %v1845_v61, %v1844_v58  ;;  %v1846_v48 = vmul.f32 %v7708_v52, %v8468_v24 }
 0x91e   : > { %v7710_v35 = vpop.eup %7709 }
 0x91f   : > { %1863 = vst.msk [vmem:[#allocation2 + $0xe8] sm:$0xff] %vm593_vm0, %v1855_v45  ;;  %6994 = vmatmul.mubr.msk.bf16.gmra.mrb[56].mxu0 %vm593_vm0, %v1855_v45  ;;  %v1847_v49 = vmul.f32 %v7710_v35, %v8473_v4 }
 0x920   : > { %v7712_v53 = vpop.eup %7711 }
 0x921   : > { %v1856_v56 = vpack.c.bf16 %v1847_v49, %v1846_v48  ;;  %v1848_v23 = vmul.f32 %v7712_v53, %v8466_v0 }
 0x922   : > { %v7714_v54 = vpop.eup %7713 }
 0x923   : > { %1864 = vst.msk [vmem:[#allocation2 + $0xf0] sm:$0xff] %vm593_vm0, %v1856_v56  ;;  %6997 = vmatprep.mubr.msk.bf16.mxu0 %vm593_vm0, %v1856_v56  ;;  %v1849_v57 = vmul.f32 %v7714_v54, %v8471_v16 }
 0x925   : > { %v1857_v17 = vpack.c.bf16 %v1849_v57, %v1848_v23 }
 0x927   : > { %1865 = vst.msk [vmem:[#allocation2 + $0xf8] sm:$0xff] %vm593_vm0, %v1857_v17  ;;  %6998 = vmatmul.mubr.msk.bf16.gmra.mrb[60].mxu0 %vm593_vm0, %v1857_v17 }
 0x9e2   : > { %v6987_v8 = vpop.f32.mrb[48].mxu0 }
 0x9e3   : > { %v1941_v24 = vpop.f32.mrb[49].mxu0 }
 0x9e4   : > { %v6988_v31 = vpop.f32.mrb[50].mxu0 }
 0x9e5   : > { %v2005_v4 = vpack.c.bf16 %v6988_v31, %v6987_v8  ;;  %v1944_v63 = vpop.f32.mrb[51].mxu0 }
 0x9e6   : > { %v2004_v60 = vpack.c.bf16 %v1944_v63, %v1941_v24 }
 0x9e8   : > { %7001 = vmatprep.subr.bf16.mxu1 %v2004_v60 }
 0x9e9   : > { %7002 = vmatpush3.bf16.msra.mxu1 %v2004_v60 }
 0x9ea   : > { %v6991_v2 = vpop.f32.mrb[52].mxu0  ;;  %7003 = vmatprep.subr.bf16.mxu1 %v2005_v4 }
 0x9eb   : > { %v1957_v62 = vpop.f32.mrb[53].mxu0 }
 0x9ec   : > { %v6992_v18 = vpop.f32.mrb[54].mxu0 }
 0x9ed   : > { %v2007_v0 = vpack.c.bf16 %v6992_v18, %v6991_v2  ;;  %v1960_v7 = vpop.f32.mrb[55].mxu0  ;;  %7004 = vmatpush3.bf16.msra.mxu1 %v2005_v4 }
 0x9ee   : > { %v2006_v16 = vpack.c.bf16 %v1960_v7, %v1957_v62 }
 0x9f0   : > { %7005 = vmatprep.subr.bf16.mxu1 %v2006_v16 }
 0x9f1   : > { %7006 = vmatpush3.bf16.msra.mxu1 %v2006_v16 }
 0x9f2   : > { %v6995_v3 = vpop.f32.mrb[56].mxu0  ;;  %7007 = vmatprep.subr.bf16.mxu1 %v2007_v0 }
 0x9f3   : > { %v1973_v13 = vpop.f32.mrb[57].mxu0 }
 0x9f4   : > { %v6996_v28 = vpop.f32.mrb[58].mxu0 }
 0x9f5   : > { %v2009_v39 = vpack.c.bf16 %v6996_v28, %v6995_v3  ;;  %v1976_v20 = vpop.f32.mrb[59].mxu0  ;;  %7008 = vmatpush3.bf16.msra.mxu1 %v2007_v0 }
 0x9f6   : > { %v2008_v25 = vpack.c.bf16 %v1976_v20, %v1973_v13 }
 0x9f8   : > { %7009 = vmatprep.subr.bf16.mxu1 %v2008_v25 }
 0x9f9   : > { %7010 = vmatpush3.bf16.msra.mxu1 %v2008_v25 }
 0x9fa   : > { %v6999_v26 = vpop.f32.mrb[60].mxu0  ;;  %7011 = vmatprep.subr.bf16.mxu1 %v2009_v39 }
 0x9fb   : > { %v1989_v30 = vpop.f32.mrb[61].mxu0 }
 0x9fc   : > { %v7000_v27 = vpop.f32.mrb[62].mxu0 }
 0x9fd   : > { %v2011_v29 = vpack.c.bf16 %v7000_v27, %v6999_v26  ;;  %v1992_v36 = vpop.f32.mrb[63].mxu0  ;;  %7012 = vmatpush3.bf16.msra.mxu1 %v2009_v39 }
 0x9fe   : > { %v2010_v55 = vpack.c.bf16 %v1992_v36, %v1989_v30 }
 0xa00   : > { %7013 = vmatprep.subr.bf16.mxu1 %v2010_v55 }
 0xa01   : > { %7014 = vmatpush3.bf16.msra.mxu1 %v2010_v55 }
 0xa02   : > { %7015 = vmatprep.subr.bf16.mxu1 %v2011_v29 }
 0xa05   : > { %7016 = vmatpush3.bf16.msra.mxu1 %v2011_v29 }
 0xa08   : > { %7018 = vmatmul.mubr.bf16.vlgmr.msra.gmra.mrb[64].mxu1 %v8377_v6 }
 0xa09   : > { %7021 = vmatprep.mubr.bf16.mxu1 %v8381_v9 }
 0xa10   : > { %7022 = vmatmul.mubr.bf16.gmra.mrb[68].mxu1 %v8385_v21 }
 0xa11   : > { %7025 = vmatprep.mubr.bf16.mxu1 %v8389_v33 }
 0xa18   : > { %7026 = vmatmul.mubr.bf16.gmra.mrb[72].mxu1 %v8393_v5 }
 0xa19   : > { %7029 = vmatprep.mubr.bf16.mxu1 %v8397_v19 }
 0xa20   : > { %7030 = vmatmul.mubr.bf16.gmra.mrb[76].mxu1 %v8401_v22 }
 0xa21   : > { %7069 = vmatprep.mubr.bf16.mxu1 %v8255_v32 }
 0xadb   : > { %v7019_v11 = vpop.f32.mrb[64].mxu1 }
 0xadc   : > { %v2046_v12 = vpop.f32.mrb[65].mxu1  ;;  %v8534_v14 = vmax.f32 %v7019_v11, 0.0 }
 0xadd   : > { %v8536_v15 = vmax.f32 %v2046_v12, 0.0  ;;  %v7020_v40 = vpop.f32.mrb[66].mxu1 }
 0xade   : > { %v2049_v37 = vpop.f32.mrb[67].mxu1  ;;  %v8538_v38 = vmax.f32 %v7020_v40, 0.0  ;;  %v2127_v42 = vmul.f32 %v8534_v14, %v8534_v14 }
 0xadf   : > { %v8540_v50 = vmax.f32 %v2049_v37, 0.0  ;;  %v2125_v32 = vmul.f32 %v8536_v15, %v8536_v15 }
 0xae0   : > { %v2128_v51 = vmul.f32 %v8538_v38, %v8538_v38  ;;  %v2147_v58 = vsel %vm593_vm0, %v2127_v42, 0.0  ;;  %v7574_v42 = vld [vmem:[%s10086_s2 + $0x48] sm:$0xff]  }
 0xae1   : > { %v2141_v34 = vsel %vm593_vm0, %v2125_v32, 0.0  ;;  %v2126_v41 = vmul.f32 %v8540_v50, %v8540_v50  ;;  %7035 = vmatprep.subr.bf16.mxu0 %v7574_v42 }
 0xae2   : > { %2142 = vadd.xlane.f32.xlu0 %v2141_v34  ;;  %v2150_v35 = vsel %vm593_vm0, %v2128_v51, 0.0  ;;  %7036 = vmatpush3.bf16.msra.mxu0 %v7574_v42 }
 0xae3   : > { %v7023_v59 = vpop.f32.mrb[68].mxu1  ;;  %v2144_v1 = vsel %vm593_vm0, %v2126_v41, 0.0 }
 0xae4   : > { %2145 = vadd.xlane.f32.xlu1 %v2144_v1  ;;  %v2062_v46 = vpop.f32.mrb[69].mxu1  ;;  %v8552_v47 = vmax.f32 %v7023_v59, 0.0 }
 0xae5   : > { %v8554_v44 = vmax.f32 %v2062_v46, 0.0  ;;  %v7024_v43 = vpop.f32.mrb[70].mxu1 }
 0xae6   : > { %2148 = vadd.xlane.f32.xlu0 %v2147_v58  ;;  %v2065_v61 = vpop.f32.mrb[71].mxu1  ;;  %v8557_v52 = vmax.f32 %v7024_v43, 0.0  ;;  %v2131_v56 = vmul.f32 %v8552_v47, %v8552_v47 }
 0xae7   : > { %v8559_v45 = vmax.f32 %v2065_v61, 0.0  ;;  %v2129_v48 = vmul.f32 %v8554_v44, %v8554_v44 }
 0xae8   : > { %2151 = vadd.xlane.f32.xlu1 %v2150_v35  ;;  %v2132_v57 = vmul.f32 %v8557_v52, %v8557_v52  ;;  %v2159_v4 = vsel %vm593_vm0, %v2131_v56, 0.0 }
 0xae9   : > { %v2153_v49 = vsel %vm593_vm0, %v2129_v48, 0.0  ;;  %v2130_v53 = vmul.f32 %v8559_v45, %v8559_v45 }
 0xaea   : > { %2154 = vadd.xlane.f32.xlu0 %v2153_v49  ;;  %v2162_v62 = vsel %vm593_vm0, %v2132_v57, 0.0 }
 0xaeb   : > { %v7027_v54 = vpop.f32.mrb[72].mxu1  ;;  %v2156_v23 = vsel %vm593_vm0, %v2130_v53, 0.0 }
 0xaec   : > { %2157 = vadd.xlane.f32.xlu1 %v2156_v23  ;;  %v2078_v17 = vpop.f32.mrb[73].mxu1  ;;  %v8572_v8 = vmax.f32 %v7027_v54, 0.0 }
 0xaed   : > { %v8574_v24 = vmax.f32 %v2078_v17, 0.0  ;;  %v7028_v31 = vpop.f32.mrb[74].mxu1 }
 0xaee   : > { %2160 = vadd.xlane.f32.xlu0 %v2159_v4  ;;  %v2081_v63 = vpop.f32.mrb[75].mxu1  ;;  %v8577_v60 = vmax.f32 %v7028_v31, 0.0  ;;  %v2135_v16 = vmul.f32 %v8572_v8, %v8572_v8 }
 0xaef   : > { %v8579_v2 = vmax.f32 %v2081_v63, 0.0  ;;  %v2133_v18 = vmul.f32 %v8574_v24, %v8574_v24 }
 0xaf0   : > { %2163 = vadd.xlane.f32.xlu1 %v2162_v62  ;;  %v2136_v28 = vmul.f32 %v8577_v60, %v8577_v60  ;;  %v2171_v30 = vsel %vm593_vm0, %v2135_v16, 0.0 }
 0xaf1   : > { %v2165_v0 = vsel %vm593_vm0, %v2133_v18, 0.0  ;;  %v2134_v7 = vmul.f32 %v8579_v2, %v8579_v2 }
 0xaf2   : > { %2166 = vadd.xlane.f32.xlu0 %v2165_v0  ;;  %v2174_v55 = vsel %vm593_vm0, %v2136_v28, 0.0 }
 0xaf3   : > { %v7031_v3 = vpop.f32.mrb[76].mxu1  ;;  %v2168_v13 = vsel %vm593_vm0, %v2134_v7, 0.0 }
 0xaf4   : > { %2169 = vadd.xlane.f32.xlu1 %v2168_v13  ;;  %v2094_v39 = vpop.f32.mrb[77].mxu1  ;;  %v8592_v20 = vmax.f32 %v7031_v3, 0.0 }
 0xaf5   : > { %v8594_v25 = vmax.f32 %v2094_v39, 0.0  ;;  %v7032_v26 = vpop.f32.mrb[78].mxu1 }
 0xaf6   : > { %2172 = vadd.xlane.f32.xlu0 %v2171_v30  ;;  %v2097_v27 = vpop.f32.mrb[79].mxu1  ;;  %v8597_v29 = vmax.f32 %v7032_v26, 0.0  ;;  %v2139_v40 = vmul.f32 %v8592_v20, %v8592_v20 }
 0xaf7   : > { %v8599_v36 = vmax.f32 %v2097_v27, 0.0  ;;  %v2137_v10 = vmul.f32 %v8594_v25, %v8594_v25 }
 0xaf8   : > { %2175 = vadd.xlane.f32.xlu1 %v2174_v55  ;;  %v2140_v32 = vmul.f32 %v8597_v29, %v8597_v29  ;;  %v2183_v34 = vsel %vm593_vm0, %v2139_v40, 0.0 }
 0xaf9   : > { %v2177_v11 = vsel %vm593_vm0, %v2137_v10, 0.0  ;;  %v2138_v12 = vmul.f32 %v8599_v36, %v8599_v36 }
 0xafa   : > { %2178 = vadd.xlane.f32.xlu0 %v2177_v11  ;;  %v2186_v41 = vsel %vm593_vm0, %v2140_v32, 0.0 }
 0xafb   : > { %v2180_v37 = vsel %vm593_vm0, %v2138_v12, 0.0 }
 0xafc   : > { %2181 = vadd.xlane.f32.xlu1 %v2180_v37 }
 0xafe   : > { %2184 = vadd.xlane.f32.xlu0 %v2183_v34 }
 0xb00   : > { %2187 = vadd.xlane.f32.xlu1 %v2186_v41 }
 0xb6f   : > { %v2143_v59 = vpop.xlane.xlu0 %2142 }
 0xb70   : > { %v2189_v1 = vmax.f32 %v2143_v59, 1e-24 }
 0xb71   : > { %v2146_v51 = vpop.xlane.xlu1 %2145 }
 0xb72   : > { %7715 = vrsqrt.f32 %v2189_v1  ;;  %v2190_v46 = vmax.f32 %v2146_v51, 1e-24 }
 0xb73   : > { %v2149_v43 = vpop.xlane.xlu0 %2148 }
 0xb74   : > { %7717 = vrsqrt.f32 %v2190_v46  ;;  %v2191_v58 = vmax.f32 %v2149_v43, 1e-24 }
 0xb75   : > { %v2152_v61 = vpop.xlane.xlu1 %2151 }
 0xb76   : > { %7719 = vrsqrt.f32 %v2191_v58  ;;  %v2192_v35 = vmax.f32 %v2152_v61, 1e-24 }
 0xb77   : > { %v2155_v48 = vpop.xlane.xlu0 %2154 }
 0xb78   : > { %7721 = vrsqrt.f32 %v2192_v35  ;;  %v2193_v49 = vmax.f32 %v2155_v48, 1e-24 }
 0xb79   : > { %v2158_v53 = vpop.xlane.xlu1 %2157 }
 0xb7a   : > { %7723 = vrsqrt.f32 %v2193_v49  ;;  %v2194_v56 = vmax.f32 %v2158_v53, 1e-24 }
 0xb7b   : > { %v2161_v54 = vpop.xlane.xlu0 %2160 }
 0xb7c   : > { %v7716_v23 = vpop.eup %7715  ;;  %7725 = vrsqrt.f32 %v2194_v56  ;;  %v2195_v57 = vmax.f32 %v2161_v54, 1e-24 }
 0xb7d   : > { %v2164_v17 = vpop.xlane.xlu1 %2163  ;;  %v2221_v62 = vmul.f32 %v7716_v23, %v8536_v15 }
 0xb7e   : > { %v7718_v31 = vpop.eup %7717  ;;  %7727 = vrsqrt.f32 %v2195_v57  ;;  %v2196_v4 = vmax.f32 %v2164_v17, 1e-24 }
 0xb7f   : > { %v2167_v63 = vpop.xlane.xlu0 %2166  ;;  %v2222_v18 = vmul.f32 %v7718_v31, %v8540_v50 }
 0xb80   : > { %v7720_v0 = vpop.eup %7719  ;;  %7729 = vrsqrt.f32 %v2196_v4  ;;  %v2197_v7 = vmax.f32 %v2167_v63, 1e-24 }
 0xb81   : > { %v2170_v16 = vpop.xlane.xlu1 %2169  ;;  %v2237_v3 = vpack.c.bf16 %v2222_v18, %v2221_v62  ;;  %v2223_v39 = vmul.f32 %v7720_v0, %v8534_v14 }
 0xb82   : > { %v7722_v13 = vpop.eup %7721  ;;  %7731 = vrsqrt.f32 %v2197_v7  ;;  %v2198_v28 = vmax.f32 %v2170_v16, 1e-24 }
 0xb83   : > { %v2224_v26 = vmul.f32 %v7722_v13, %v8538_v38  ;;  %2245 = vst.msk [vmem:[#allocation2 + $0x100] sm:$0xff] %vm593_vm0, %v2237_v3  ;;  %7037 = vmatprep.mubr.msk.bf16.mxu0 %vm593_vm0, %v2237_v3  ;;  %v2173_v30 = vpop.xlane.xlu0 %2172 }
 0xb84   : > { %v7724_v15 = vpop.eup %7723  ;;  %7733 = vrsqrt.f32 %v2198_v28  ;;  %v2199_v50 = vmax.f32 %v2173_v30, 1e-24 }
 0xb85   : > { %v2238_v27 = vpack.c.bf16 %v2224_v26, %v2223_v39  ;;  %v2176_v55 = vpop.xlane.xlu1 %2175  ;;  %v2225_v38 = vmul.f32 %v7724_v15, %v8554_v44 }
 0xb86   : > { %v7726_v10 = vpop.eup %7725  ;;  %7735 = vrsqrt.f32 %v2199_v50  ;;  %v2200_v11 = vmax.f32 %v2176_v55, 1e-24 }
 0xb87   : > { %2246 = vst.msk [vmem:[#allocation2 + $0x108] sm:$0xff] %vm593_vm0, %v2238_v27  ;;  %7038 = vmatmul.mubr.msk.bf16.vlgmr.msra.gmra.mrb[64].mxu0 %vm593_vm0, %v2238_v27  ;;  %v2179_v14 = vpop.xlane.xlu0 %2178  ;;  %v2226_v12 = vmul.f32 %v7726_v10, %v8559_v45 }
 0xb88   : > { %v7728_v40 = vpop.eup %7727  ;;  %7737 = vrsqrt.f32 %v2200_v11  ;;  %v2201_v37 = vmax.f32 %v2179_v14, 1e-24 }
 0xb89   : > { %v2182_v32 = vpop.xlane.xlu1 %2181  ;;  %v2239_v34 = vpack.c.bf16 %v2226_v12, %v2225_v38  ;;  %v2227_v1 = vmul.f32 %v7728_v40, %v8552_v47  ;;  %v8657_v40 = vld [vmem:[%s7953_s21] sm:$0xff]  }
 0xb8a   : > { %v7730_v41 = vpop.eup %7729  ;;  %7739 = vrsqrt.f32 %v2201_v37  ;;  %v2202_v42 = vmax.f32 %v2182_v32, 1e-24 }
 0xb8b   : > { %2247 = vst.msk [vmem:[#allocation2 + $0x110] sm:$0xff] %vm593_vm0, %v2239_v34  ;;  %7041 = vmatprep.mubr.msk.bf16.mxu0 %vm593_vm0, %v2239_v34  ;;  %v2185_v59 = vpop.xlane.xlu0 %2184  ;;  %v2228_v51 = vmul.f32 %v7730_v41, %v8557_v52 }
 0xb8c   : > { %v7732_v44 = vpop.eup %7731  ;;  %7741 = vrsqrt.f32 %v2202_v42  ;;  %v2203_v45 = vmax.f32 %v2185_v59, 1e-24 }
 0xb8d   : > { %v2188_v46 = vpop.xlane.xlu1 %2187  ;;  %v2240_v43 = vpack.c.bf16 %v2228_v51, %v2227_v1  ;;  %v2229_v35 = vmul.f32 %v7732_v44, %v8574_v24 }
 0xb8e   : > { %v7734_v58 = vpop.eup %7733  ;;  %7743 = vrsqrt.f32 %v2203_v45  ;;  %v2204_v61 = vmax.f32 %v2188_v46, 1e-24 }
 0xb8f   : > { %2248 = vst.msk [vmem:[#allocation2 + $0x118] sm:$0xff] %vm593_vm0, %v2240_v43  ;;  %7042 = vmatmul.mubr.msk.bf16.gmra.mrb[68].mxu0 %vm593_vm0, %v2240_v43  ;;  %v2230_v48 = vmul.f32 %v7734_v58, %v8579_v2 }
 0xb90   : > { %v7736_v49 = vpop.eup %7735  ;;  %7745 = vrsqrt.f32 %v2204_v61 }
 0xb91   : > { %v2241_v47 = vpack.c.bf16 %v2230_v48, %v2229_v35  ;;  %v2231_v53 = vmul.f32 %v7736_v49, %v8572_v8 }
 0xb92   : > { %v7738_v52 = vpop.eup %7737 }
 0xb93   : > { %2249 = vst.msk [vmem:[#allocation2 + $0x120] sm:$0xff] %vm593_vm0, %v2241_v47  ;;  %7045 = vmatprep.mubr.msk.bf16.mxu0 %vm593_vm0, %v2241_v47  ;;  %v2232_v56 = vmul.f32 %v7738_v52, %v8577_v60 }
 0xb94   : > { %v7740_v54 = vpop.eup %7739 }
 0xb95   : > { %v2242_v23 = vpack.c.bf16 %v2232_v56, %v2231_v53  ;;  %v2233_v24 = vmul.f32 %v7740_v54, %v8594_v25 }
 0xb96   : > { %v7742_v57 = vpop.eup %7741 }
 0xb97   : > { %2250 = vst.msk [vmem:[#allocation2 + $0x128] sm:$0xff] %vm593_vm0, %v2242_v23  ;;  %7046 = vmatmul.mubr.msk.bf16.gmra.mrb[72].mxu0 %vm593_vm0, %v2242_v23  ;;  %v2234_v2 = vmul.f32 %v7742_v57, %v8599_v36 }
 0xb98   : > { %v7744_v17 = vpop.eup %7743 }
 0xb99   : > { %v2243_v31 = vpack.c.bf16 %v2234_v2, %v2233_v24  ;;  %v2235_v8 = vmul.f32 %v7744_v17, %v8592_v20 }
 0xb9a   : > { %v7746_v4 = vpop.eup %7745 }
 0xb9b   : > { %2251 = vst.msk [vmem:[#allocation2 + $0x130] sm:$0xff] %vm593_vm0, %v2243_v31  ;;  %7049 = vmatprep.mubr.msk.bf16.mxu0 %vm593_vm0, %v2243_v31  ;;  %v2236_v60 = vmul.f32 %v7746_v4, %v8597_v29 }
 0xb9d   : > { %v2244_v63 = vpack.c.bf16 %v2236_v60, %v2235_v8 }
 0xb9f   : > { %2252 = vst.msk [vmem:[#allocation2 + $0x138] sm:$0xff] %vm593_vm0, %v2244_v63  ;;  %7050 = vmatmul.mubr.msk.bf16.gmra.mrb[76].mxu0 %vm593_vm0, %v2244_v63 }
 0xc5a   : > { %v7039_v62 = vpop.f32.mrb[64].mxu0 }
 0xc5b   : > { %v2328_v25 = vpop.f32.mrb[65].mxu0 }
 0xc5c   : > { %v7040_v18 = vpop.f32.mrb[66].mxu0 }
 0xc5d   : > { %v2392_v36 = vpack.c.bf16 %v7040_v18, %v7039_v62  ;;  %v2331_v0 = vpop.f32.mrb[67].mxu0 }
 0xc5e   : > { %v2391_v7 = vpack.c.bf16 %v2331_v0, %v2328_v25 }
 0xc60   : > { %7053 = vmatprep.subr.bf16.mxu1 %v2391_v7 }
 0xc61   : > { %7054 = vmatpush3.bf16.msra.mxu1 %v2391_v7 }
 0xc62   : > { %v7043_v16 = vpop.f32.mrb[68].mxu0  ;;  %7055 = vmatprep.subr.bf16.mxu1 %v2392_v36 }
 0xc63   : > { %v2344_v3 = vpop.f32.mrb[69].mxu0 }
 0xc64   : > { %v7044_v13 = vpop.f32.mrb[70].mxu0 }
 0xc65   : > { %v2394_v20 = vpack.c.bf16 %v7044_v13, %v7043_v16  ;;  %v2347_v28 = vpop.f32.mrb[71].mxu0  ;;  %7056 = vmatpush3.bf16.msra.mxu1 %v2392_v36 }
 0xc66   : > { %v2393_v29 = vpack.c.bf16 %v2347_v28, %v2344_v3 }
 0xc68   : > { %7057 = vmatprep.subr.bf16.mxu1 %v2393_v29 }
 0xc69   : > { %7058 = vmatpush3.bf16.msra.mxu1 %v2393_v29 }
 0xc6a   : > { %v7047_v39 = vpop.f32.mrb[72].mxu0  ;;  %7059 = vmatprep.subr.bf16.mxu1 %v2394_v20 }
 0xc6b   : > { %v2360_v26 = vpop.f32.mrb[73].mxu0 }
 0xc6c   : > { %v7048_v30 = vpop.f32.mrb[74].mxu0 }
 0xc6d   : > { %v2396_v15 = vpack.c.bf16 %v7048_v30, %v7047_v39  ;;  %v2363_v50 = vpop.f32.mrb[75].mxu0  ;;  %7060 = vmatpush3.bf16.msra.mxu1 %v2394_v20 }
 0xc6e   : > { %v2395_v27 = vpack.c.bf16 %v2363_v50, %v2360_v26 }
 0xc70   : > { %7061 = vmatprep.subr.bf16.mxu1 %v2395_v27 }
 0xc71   : > { %7062 = vmatpush3.bf16.msra.mxu1 %v2395_v27 }
 0xc72   : > { %v7051_v55 = vpop.f32.mrb[76].mxu0  ;;  %7063 = vmatprep.subr.bf16.mxu1 %v2396_v15 }
 0xc73   : > { %v2376_v10 = vpop.f32.mrb[77].mxu0 }
 0xc74   : > { %v7052_v11 = vpop.f32.mrb[78].mxu0 }
 0xc75   : > { %v2398_v14 = vpack.c.bf16 %v7052_v11, %v7051_v55  ;;  %v2379_v38 = vpop.f32.mrb[79].mxu0  ;;  %7064 = vmatpush3.bf16.msra.mxu1 %v2396_v15 }
 0xc76   : > { %v2397_v12 = vpack.c.bf16 %v2379_v38, %v2376_v10 }
 0xc78   : > { %7065 = vmatprep.subr.bf16.mxu1 %v2397_v12 }
 0xc79   : > { %7066 = vmatpush3.bf16.msra.mxu1 %v2397_v12 }
 0xc7a   : > { %7067 = vmatprep.subr.bf16.mxu1 %v2398_v14 }
 0xc7d   : > { %7068 = vmatpush3.bf16.msra.mxu1 %v2398_v14 }
 0xc80   : > { %7070 = vmatmul.mubr.bf16.vlgmr.msra.gmra.mrb[80].mxu1 %v8377_v6  ;;  %v7575_v6 = vld [vmem:[%s10086_s2 + $0x50] sm:$0xff]  }
 0xc81   : > { %7073 = vmatprep.mubr.bf16.mxu1 %v8381_v9  ;;  %7085 = vmatprep.subr.bf16.mxu0 %v7575_v6 }
 0xc82   : > { %7086 = vmatpush3.bf16.msra.mxu0 %v7575_v6 }
 0xc88   : > { %7074 = vmatmul.mubr.bf16.gmra.mrb[84].mxu1 %v8385_v21 }
 0xc89   : > { %7077 = vmatprep.mubr.bf16.mxu1 %v8389_v33 }
 0xc90   : > { %7078 = vmatmul.mubr.bf16.gmra.mrb[88].mxu1 %v8393_v5 }
 0xc91   : > { %7081 = vmatprep.mubr.bf16.mxu1 %v8397_v19 }
 0xc98   : > { %7082 = vmatmul.mubr.bf16.gmra.mrb[92].mxu1 %v8401_v22 }
 0xc99   : > { %7121 = vmatprep.mubr.bf16.mxu1 %v8657_v40 }
 0xd53   : > { %v7071_v9 = vpop.f32.mrb[80].mxu1 }
 0xd54   : > { %v2433_v21 = vpop.f32.mrb[81].mxu1  ;;  %v8663_v37 = vmax.f32 %v7071_v9, 0.0 }
 0xd55   : > { %v8665_v33 = vmax.f32 %v2433_v21, 0.0  ;;  %v7072_v5 = vpop.f32.mrb[82].mxu1  ;;  %v7576_v21 = vld [vmem:[%s10086_s2 + $0x58] sm:$0xff]  }
 0xd56   : > { %v2436_v19 = vpop.f32.mrb[83].mxu1  ;;  %v8667_v32 = vmax.f32 %v7072_v5, 0.0  ;;  %v2514_v59 = vmul.f32 %v8663_v37, %v8663_v37  ;;  %7087 = vmatprep.subr.bf16.mxu0 %v7576_v21 }
 0xd57   : > { %v8669_v22 = vmax.f32 %v2436_v19, 0.0  ;;  %v2512_v34 = vmul.f32 %v8665_v33, %v8665_v33  ;;  %7088 = vmatpush3.bf16.msra.mxu0 %v7576_v21 }
 0xd58   : > { %v2515_v44 = vmul.f32 %v8667_v32, %v8667_v32  ;;  %v2534_v61 = vsel %vm593_vm0, %v2514_v59, 0.0 }
 0xd59   : > { %v2528_v41 = vsel %vm593_vm0, %v2512_v34, 0.0  ;;  %v2513_v42 = vmul.f32 %v8669_v22, %v8669_v22 }
 0xd5a   : > { %2529 = vadd.xlane.f32.xlu0 %v2528_v41  ;;  %v2537_v47 = vsel %vm593_vm0, %v2515_v44, 0.0 }
 0xd5b   : > { %v7075_v1 = vpop.f32.mrb[84].mxu1  ;;  %v2531_v51 = vsel %vm593_vm0, %v2513_v42, 0.0 }
 0xd5c   : > { %2532 = vadd.xlane.f32.xlu1 %v2531_v51  ;;  %v2449_v45 = vpop.f32.mrb[85].mxu1  ;;  %v8681_v46 = vmax.f32 %v7075_v1, 0.0 }
 0xd5d   : > { %v8683_v43 = vmax.f32 %v2449_v45, 0.0  ;;  %v7076_v58 = vpop.f32.mrb[86].mxu1 }
 0xd5e   : > { %2535 = vadd.xlane.f32.xlu0 %v2534_v61  ;;  %v2452_v35 = vpop.f32.mrb[87].mxu1  ;;  %v8686_v48 = vmax.f32 %v7076_v58, 0.0  ;;  %v2518_v54 = vmul.f32 %v8681_v46, %v8681_v46 }
 0xd5f   : > { %v8688_v49 = vmax.f32 %v2452_v35, 0.0  ;;  %v2516_v52 = vmul.f32 %v8683_v43, %v8683_v43 }
 0xd60   : > { %2538 = vadd.xlane.f32.xlu1 %v2537_v47  ;;  %v2519_v24 = vmul.f32 %v8686_v48, %v8686_v48  ;;  %v2546_v8 = vsel %vm593_vm0, %v2518_v54, 0.0 }
 0xd61   : > { %v2540_v53 = vsel %vm593_vm0, %v2516_v52, 0.0  ;;  %v2517_v56 = vmul.f32 %v8688_v49, %v8688_v49 }
 0xd62   : > { %2541 = vadd.xlane.f32.xlu0 %v2540_v53  ;;  %v2549_v25 = vsel %vm593_vm0, %v2519_v24, 0.0 }
 0xd63   : > { %v7079_v23 = vpop.f32.mrb[88].mxu1  ;;  %v2543_v57 = vsel %vm593_vm0, %v2517_v56, 0.0 }
 0xd64   : > { %2544 = vadd.xlane.f32.xlu1 %v2543_v57  ;;  %v2465_v2 = vpop.f32.mrb[89].mxu1  ;;  %v8701_v17 = vmax.f32 %v7079_v23, 0.0 }
 0xd65   : > { %v8703_v31 = vmax.f32 %v2465_v2, 0.0  ;;  %v7080_v4 = vpop.f32.mrb[90].mxu1 }
 0xd66   : > { %2547 = vadd.xlane.f32.xlu0 %v2546_v8  ;;  %v2468_v60 = vpop.f32.mrb[91].mxu1  ;;  %v8706_v63 = vmax.f32 %v7080_v4, 0.0  ;;  %v2522_v7 = vmul.f32 %v8701_v17, %v8701_v17 }
 0xd67   : > { %v8708_v62 = vmax.f32 %v2468_v60, 0.0  ;;  %v2520_v18 = vmul.f32 %v8703_v31, %v8703_v31 }
 0xd68   : > { %2550 = vadd.xlane.f32.xlu1 %v2549_v25  ;;  %v2523_v13 = vmul.f32 %v8706_v63, %v8706_v63  ;;  %v2558_v26 = vsel %vm593_vm0, %v2522_v7, 0.0 }
 0xd69   : > { %v2552_v36 = vsel %vm593_vm0, %v2520_v18, 0.0  ;;  %v2521_v0 = vmul.f32 %v8708_v62, %v8708_v62 }
 0xd6a   : > { %2553 = vadd.xlane.f32.xlu0 %v2552_v36  ;;  %v2561_v27 = vsel %vm593_vm0, %v2523_v13, 0.0 }
 0xd6b   : > { %v7083_v16 = vpop.f32.mrb[92].mxu1  ;;  %v2555_v3 = vsel %vm593_vm0, %v2521_v0, 0.0 }
 0xd6c   : > { %2556 = vadd.xlane.f32.xlu1 %v2555_v3  ;;  %v2481_v20 = vpop.f32.mrb[93].mxu1  ;;  %v8721_v28 = vmax.f32 %v7083_v16, 0.0 }
 0xd6d   : > { %v8723_v29 = vmax.f32 %v2481_v20, 0.0  ;;  %v7084_v39 = vpop.f32.mrb[94].mxu1 }
 0xd6e   : > { %2559 = vadd.xlane.f32.xlu0 %v2558_v26  ;;  %v2484_v30 = vpop.f32.mrb[95].mxu1  ;;  %v8726_v15 = vmax.f32 %v7084_v39, 0.0  ;;  %v2526_v14 = vmul.f32 %v8721_v28, %v8721_v28 }
 0xd6f   : > { %v8728_v50 = vmax.f32 %v2484_v30, 0.0  ;;  %v2524_v55 = vmul.f32 %v8723_v29, %v8723_v29 }
 0xd70   : > { %2562 = vadd.xlane.f32.xlu1 %v2561_v27  ;;  %v2527_v12 = vmul.f32 %v8726_v15, %v8726_v15  ;;  %v2570_v6 = vsel %vm593_vm0, %v2526_v14, 0.0 }
 0xd71   : > { %v2564_v10 = vsel %vm593_vm0, %v2524_v55, 0.0  ;;  %v2525_v11 = vmul.f32 %v8728_v50, %v8728_v50 }
 0xd72   : > { %2565 = vadd.xlane.f32.xlu0 %v2564_v10  ;;  %v2573_v9 = vsel %vm593_vm0, %v2527_v12, 0.0 }
 0xd73   : > { %v2567_v38 = vsel %vm593_vm0, %v2525_v11, 0.0 }
 0xd74   : > { %2568 = vadd.xlane.f32.xlu1 %v2567_v38 }
 0xd76   : > { %2571 = vadd.xlane.f32.xlu0 %v2570_v6 }
 0xd78   : > { %2574 = vadd.xlane.f32.xlu1 %v2573_v9 }
 0xde7   : > { %v2530_v5 = vpop.xlane.xlu0 %2529 }
 0xde8   : > { %v2576_v19 = vmax.f32 %v2530_v5, 1e-24 }
 0xde9   : > { %v2533_v34 = vpop.xlane.xlu1 %2532 }
 0xdea   : > { %7747 = vrsqrt.f32 %v2576_v19  ;;  %v2577_v41 = vmax.f32 %v2533_v34, 1e-24 }
 0xdeb   : > { %v2536_v42 = vpop.xlane.xlu0 %2535 }
 0xdec   : > { %7749 = vrsqrt.f32 %v2577_v41  ;;  %v2578_v59 = vmax.f32 %v2536_v42, 1e-24 }
 0xded   : > { %v2539_v1 = vpop.xlane.xlu1 %2538 }
 0xdee   : > { %7751 = vrsqrt.f32 %v2578_v59  ;;  %v2579_v51 = vmax.f32 %v2539_v1, 1e-24 }
 0xdef   : > { %v2542_v44 = vpop.xlane.xlu0 %2541 }
 0xdf0   : > { %7753 = vrsqrt.f32 %v2579_v51  ;;  %v2580_v45 = vmax.f32 %v2542_v44, 1e-24 }
 0xdf1   : > { %v2545_v58 = vpop.xlane.xlu1 %2544 }
 0xdf2   : > { %7755 = vrsqrt.f32 %v2580_v45  ;;  %v2581_v61 = vmax.f32 %v2545_v58, 1e-24 }
 0xdf3   : > { %v2548_v35 = vpop.xlane.xlu0 %2547 }
 0xdf4   : > { %v7748_v47 = vpop.eup %7747  ;;  %7757 = vrsqrt.f32 %v2581_v61  ;;  %v2582_v52 = vmax.f32 %v2548_v35, 1e-24 }
 0xdf5   : > { %v2551_v53 = vpop.xlane.xlu1 %2550  ;;  %v2608_v57 = vmul.f32 %v7748_v47, %v8665_v33 }
 0xdf6   : > { %v7750_v56 = vpop.eup %7749  ;;  %7759 = vrsqrt.f32 %v2582_v52  ;;  %v2583_v54 = vmax.f32 %v2551_v53, 1e-24 }
 0xdf7   : > { %v2554_v23 = vpop.xlane.xlu0 %2553  ;;  %v2609_v24 = vmul.f32 %v7750_v56, %v8669_v22 }
 0xdf8   : > { %v7752_v2 = vpop.eup %7751  ;;  %7761 = vrsqrt.f32 %v2583_v54  ;;  %v2584_v4 = vmax.f32 %v2554_v23, 1e-24 }
 0xdf9   : > { %v2557_v8 = vpop.xlane.xlu1 %2556  ;;  %v2624_v60 = vpack.c.bf16 %v2609_v24, %v2608_v57  ;;  %v2610_v36 = vmul.f32 %v7752_v2, %v8663_v37 }
 0xdfa   : > { %v7754_v25 = vpop.eup %7753  ;;  %7763 = vrsqrt.f32 %v2584_v4  ;;  %v2585_v18 = vmax.f32 %v2557_v8, 1e-24 }
 0xdfb   : > { %v2611_v0 = vmul.f32 %v7754_v25, %v8667_v32  ;;  %2632 = vst.msk [vmem:[#allocation2 + $0x140] sm:$0xff] %vm593_vm0, %v2624_v60  ;;  %7089 = vmatprep.mubr.msk.bf16.mxu0 %vm593_vm0, %v2624_v60  ;;  %v2560_v7 = vpop.xlane.xlu0 %2559 }
 0xdfc   : > { %v7756_v33 = vpop.eup %7755  ;;  %7765 = vrsqrt.f32 %v2585_v18  ;;  %v2586_v22 = vmax.f32 %v2560_v7, 1e-24 }
 0xdfd   : > { %v2625_v16 = vpack.c.bf16 %v2611_v0, %v2610_v36  ;;  %v2563_v3 = vpop.xlane.xlu1 %2562  ;;  %v2612_v32 = vmul.f32 %v7756_v33, %v8683_v43 }
 0xdfe   : > { %v7758_v13 = vpop.eup %7757  ;;  %7767 = vrsqrt.f32 %v2586_v22  ;;  %v2587_v20 = vmax.f32 %v2563_v3, 1e-24  ;;  %v8779_v3 = vld [vmem:[%s7953_s21 + $0x8] sm:$0xff]  }
 0xdff   : > { %2633 = vst.msk [vmem:[#allocation2 + $0x148] sm:$0xff] %vm593_vm0, %v2625_v16  ;;  %7090 = vmatmul.mubr.msk.bf16.vlgmr.msra.gmra.mrb[80].mxu0 %vm593_vm0, %v2625_v16  ;;  %v2566_v37 = vpop.xlane.xlu0 %2565  ;;  %v2613_v39 = vmul.f32 %v7758_v13, %v8688_v49  ;;  %v8783_v13 = vld [vmem:[%s7953_s21 + $0x10] sm:$0xff]  }
 0xe00   : > { %v7760_v26 = vpop.eup %7759  ;;  %7769 = vrsqrt.f32 %v2587_v20  ;;  %v2588_v30 = vmax.f32 %v2566_v37, 1e-24  ;;  %v8787_v20 = vld [vmem:[%s7953_s21 + $0x18] sm:$0xff]   ;;  %v8791_v37 = vld [vmem:[%s7953_s21 + $0x20] sm:$0xff]  }
 0xe01   : > { %v2569_v27 = vpop.xlane.xlu1 %2568  ;;  %v2626_v55 = vpack.c.bf16 %v2613_v39, %v2612_v32  ;;  %v2614_v38 = vmul.f32 %v7760_v26, %v8681_v46  ;;  %v8795_v32 = vld [vmem:[%s7953_s21 + $0x28] sm:$0xff]   ;;  %v8799_v39 = vld [vmem:[%s7953_s21 + $0x30] sm:$0xff]   ;;  %v8803_v26 = vld [vmem:[%s7953_s21 + $0x38] sm:$0xff]  }
 0xe02   : > { %v7762_v10 = vpop.eup %7761  ;;  %7771 = vrsqrt.f32 %v2588_v30  ;;  %v2589_v11 = vmax.f32 %v2569_v27, 1e-24  ;;  %v7577_v30 = vld [vmem:[%s10086_s2 + $0x60] sm:$0xff]  }
 0xe03   : > { %2634 = vst.msk [vmem:[#allocation2 + $0x150] sm:$0xff] %vm593_vm0, %v2626_v55  ;;  %7093 = vmatprep.mubr.msk.bf16.mxu0 %vm593_vm0, %v2626_v55  ;;  %v2572_v14 = vpop.xlane.xlu0 %2571  ;;  %v2615_v12 = vmul.f32 %v7762_v10, %v8686_v48  ;;  %7137 = vmatprep.subr.bf16.mxu0 %v7577_v30 }
 0xe04   : > { %v7764_v43 = vpop.eup %7763  ;;  %7773 = vrsqrt.f32 %v2589_v11  ;;  %v2590_v49 = vmax.f32 %v2572_v14, 1e-24  ;;  %7138 = vmatpush3.bf16.msra.mxu0 %v7577_v30 }
 0xe05   : > { %v2575_v6 = vpop.xlane.xlu1 %2574  ;;  %v2627_v9 = vpack.c.bf16 %v2615_v12, %v2614_v38  ;;  %v2616_v19 = vmul.f32 %v7764_v43, %v8703_v31 }
 0xe06   : > { %v7766_v21 = vpop.eup %7765  ;;  %7775 = vrsqrt.f32 %v2590_v49  ;;  %v2591_v5 = vmax.f32 %v2575_v6, 1e-24 }
 0xe07   : > { %2635 = vst.msk [vmem:[#allocation2 + $0x158] sm:$0xff] %vm593_vm0, %v2627_v9  ;;  %7094 = vmatmul.mubr.msk.bf16.gmra.mrb[84].mxu0 %vm593_vm0, %v2627_v9  ;;  %v2617_v34 = vmul.f32 %v7766_v21, %v8708_v62 }
 0xe08   : > { %v7768_v41 = vpop.eup %7767  ;;  %7777 = vrsqrt.f32 %v2591_v5 }
 0xe09   : > { %v2628_v46 = vpack.c.bf16 %v2617_v34, %v2616_v19  ;;  %v2618_v42 = vmul.f32 %v7768_v41, %v8701_v17 }
 0xe0a   : > { %v7770_v48 = vpop.eup %7769 }
 0xe0b   : > { %2636 = vst.msk [vmem:[#allocation2 + $0x160] sm:$0xff] %vm593_vm0, %v2628_v46  ;;  %7097 = vmatprep.mubr.msk.bf16.mxu0 %vm593_vm0, %v2628_v46  ;;  %v2619_v59 = vmul.f32 %v7770_v48, %v8706_v63 }
 0xe0c   : > { %v7772_v1 = vpop.eup %7771 }
 0xe0d   : > { %v2629_v51 = vpack.c.bf16 %v2619_v59, %v2618_v42  ;;  %v2620_v31 = vmul.f32 %v7772_v1, %v8723_v29 }
 0xe0e   : > { %v7774_v44 = vpop.eup %7773 }
 0xe0f   : > { %2637 = vst.msk [vmem:[#allocation2 + $0x168] sm:$0xff] %vm593_vm0, %v2629_v51  ;;  %7098 = vmatmul.mubr.msk.bf16.gmra.mrb[88].mxu0 %vm593_vm0, %v2629_v51  ;;  %v2621_v62 = vmul.f32 %v7774_v44, %v8728_v50 }
 0xe10   : > { %v7776_v45 = vpop.eup %7775 }
 0xe11   : > { %v2630_v58 = vpack.c.bf16 %v2621_v62, %v2620_v31  ;;  %v2622_v17 = vmul.f32 %v7776_v45, %v8721_v28 }
 0xe12   : > { %v7778_v61 = vpop.eup %7777 }
 0xe13   : > { %2638 = vst.msk [vmem:[#allocation2 + $0x170] sm:$0xff] %vm593_vm0, %v2630_v58  ;;  %7101 = vmatprep.mubr.msk.bf16.mxu0 %vm593_vm0, %v2630_v58  ;;  %v2623_v63 = vmul.f32 %v7778_v61, %v8726_v15 }
 0xe15   : > { %v2631_v35 = vpack.c.bf16 %v2623_v63, %v2622_v17 }
 0xe17   : > { %2639 = vst.msk [vmem:[#allocation2 + $0x178] sm:$0xff] %vm593_vm0, %v2631_v35  ;;  %7102 = vmatmul.mubr.msk.bf16.gmra.mrb[92].mxu0 %vm593_vm0, %v2631_v35 }
 0xed2   : > { %v7091_v47 = vpop.f32.mrb[80].mxu0 }
 0xed3   : > { %v2715_v29 = vpop.f32.mrb[81].mxu0 }
 0xed4   : > { %v7092_v52 = vpop.f32.mrb[82].mxu0 }
 0xed5   : > { %v2779_v50 = vpack.c.bf16 %v7092_v52, %v7091_v47  ;;  %v2718_v53 = vpop.f32.mrb[83].mxu0 }
 0xed6   : > { %v2778_v56 = vpack.c.bf16 %v2718_v53, %v2715_v29 }
 0xed8   : > { %7105 = vmatprep.subr.bf16.mxu1 %v2778_v56 }
 0xed9   : > { %7106 = vmatpush3.bf16.msra.mxu1 %v2778_v56 }
 0xeda   : > { %v7095_v54 = vpop.f32.mrb[84].mxu0  ;;  %7107 = vmatprep.subr.bf16.mxu1 %v2779_v50 }
 0xedb   : > { %v2731_v23 = vpop.f32.mrb[85].mxu0 }
 0xedc   : > { %v7096_v57 = vpop.f32.mrb[86].mxu0 }
 0xedd   : > { %v2781_v28 = vpack.c.bf16 %v7096_v57, %v7095_v54  ;;  %v2734_v24 = vpop.f32.mrb[87].mxu0  ;;  %7108 = vmatpush3.bf16.msra.mxu1 %v2779_v50 }
 0xede   : > { %v2780_v15 = vpack.c.bf16 %v2734_v24, %v2731_v23 }
 0xee0   : > { %7109 = vmatprep.subr.bf16.mxu1 %v2780_v15 }
 0xee1   : > { %7110 = vmatpush3.bf16.msra.mxu1 %v2780_v15 }
 0xee2   : > { %v7099_v2 = vpop.f32.mrb[88].mxu0  ;;  %7111 = vmatprep.subr.bf16.mxu1 %v2781_v28 }
 0xee3   : > { %v2747_v4 = vpop.f32.mrb[89].mxu0 }
 0xee4   : > { %v7100_v8 = vpop.f32.mrb[90].mxu0 }
 0xee5   : > { %v2783_v60 = vpack.c.bf16 %v7100_v8, %v7099_v2  ;;  %v2750_v25 = vpop.f32.mrb[91].mxu0  ;;  %7112 = vmatpush3.bf16.msra.mxu1 %v2781_v28 }
 0xee6   : > { %v2782_v18 = vpack.c.bf16 %v2750_v25, %v2747_v4 }
 0xee8   : > { %7113 = vmatprep.subr.bf16.mxu1 %v2782_v18 }
 0xee9   : > { %7114 = vmatpush3.bf16.msra.mxu1 %v2782_v18 }
 0xeea   : > { %v7103_v36 = vpop.f32.mrb[92].mxu0  ;;  %7115 = vmatprep.subr.bf16.mxu1 %v2783_v60 }
 0xeeb   : > { %v2763_v0 = vpop.f32.mrb[93].mxu0 }
 0xeec   : > { %v7104_v7 = vpop.f32.mrb[94].mxu0 }
 0xeed   : > { %v2785_v33 = vpack.c.bf16 %v7104_v7, %v7103_v36  ;;  %v2766_v22 = vpop.f32.mrb[95].mxu0  ;;  %7116 = vmatpush3.bf16.msra.mxu1 %v2783_v60 }
 0xeee   : > { %v2784_v16 = vpack.c.bf16 %v2766_v22, %v2763_v0 }
 0xef0   : > { %7117 = vmatprep.subr.bf16.mxu1 %v2784_v16 }
 0xef1   : > { %7118 = vmatpush3.bf16.msra.mxu1 %v2784_v16 }
 0xef2   : > { %7119 = vmatprep.subr.bf16.mxu1 %v2785_v33 }
 0xef5   : > { %7120 = vmatpush3.bf16.msra.mxu1 %v2785_v33 }
 0xef8   : > { %7122 = vmatmul.mubr.bf16.vlgmr.msra.gmra.mrb[96].mxu1 %v8779_v3 }
 0xef9   : > { %7125 = vmatprep.mubr.bf16.mxu1 %v8783_v13 }
 0xf00   : > { %7126 = vmatmul.mubr.bf16.gmra.mrb[100].mxu1 %v8787_v20 }
 0xf01   : > { %7129 = vmatprep.mubr.bf16.mxu1 %v8791_v37 }
 0xf08   : > { %7130 = vmatmul.mubr.bf16.gmra.mrb[104].mxu1 %v8795_v32 }
 0xf09   : > { %7133 = vmatprep.mubr.bf16.mxu1 %v8799_v39 }
 0xf10   : > { %7134 = vmatmul.mubr.bf16.gmra.mrb[108].mxu1 %v8803_v26 }
 0xf11   : > { %7173 = vmatprep.mubr.bf16.mxu1 %v8657_v40 }
 0xfcb   : > { %v7123_v27 = vpop.f32.mrb[96].mxu1 }
 0xfcc   : > { %v2820_v55 = vpop.f32.mrb[97].mxu1  ;;  %v8810_v10 = vmax.f32 %v7123_v27, 0.0 }
 0xfcd   : > { %v8812_v11 = vmax.f32 %v2820_v55, 0.0  ;;  %v7124_v14 = vpop.f32.mrb[98].mxu1 }
 0xfce   : > { %v2823_v38 = vpop.f32.mrb[99].mxu1  ;;  %v8814_v12 = vmax.f32 %v7124_v14, 0.0  ;;  %v2901_v6 = vmul.f32 %v8810_v10, %v8810_v10 }
 0xfcf   : > { %v8816_v43 = vmax.f32 %v2823_v38, 0.0  ;;  %v2899_v49 = vmul.f32 %v8812_v11, %v8812_v11 }
 0xfd0   : > { %v2902_v5 = vmul.f32 %v8814_v12, %v8814_v12  ;;  %v2921_v59 = vsel %vm593_vm0, %v2901_v6, 0.0 }
 0xfd1   : > { %v2915_v9 = vsel %vm593_vm0, %v2899_v49, 0.0  ;;  %v2900_v21 = vmul.f32 %v8816_v43, %v8816_v43 }
 0xfd2   : > { %2916 = vadd.xlane.f32.xlu0 %v2915_v9  ;;  %v2924_v62 = vsel %vm593_vm0, %v2902_v5, 0.0  ;;  %v7578_v5 = vld [vmem:[%s10086_s2 + $0x68] sm:$0xff]  }
 0xfd3   : > { %v7127_v19 = vpop.f32.mrb[100].mxu1  ;;  %v2918_v34 = vsel %vm593_vm0, %v2900_v21, 0.0  ;;  %7139 = vmatprep.subr.bf16.mxu0 %v7578_v5 }
 0xfd4   : > { %2919 = vadd.xlane.f32.xlu1 %v2918_v34  ;;  %v2836_v41 = vpop.f32.mrb[101].mxu1  ;;  %v8828_v46 = vmax.f32 %v7127_v19, 0.0  ;;  %7140 = vmatpush3.bf16.msra.mxu0 %v7578_v5 }
 0xfd5   : > { %v8830_v48 = vmax.f32 %v2836_v41, 0.0  ;;  %v7128_v42 = vpop.f32.mrb[102].mxu1 }
 0xfd6   : > { %2922 = vadd.xlane.f32.xlu0 %v2921_v59  ;;  %v2839_v1 = vpop.f32.mrb[103].mxu1  ;;  %v8835_v44 = vmax.f32 %v7128_v42, 0.0  ;;  %v2905_v45 = vmul.f32 %v8828_v46, %v8828_v46 }
 0xfd7   : > { %v2903_v51 = vmul.f32 %v8830_v48, %v8830_v48  ;;  %v8837_v31 = vmax.f32 %v2839_v1, 0.0 }
 0xfd8   : > { %2925 = vadd.xlane.f32.xlu1 %v2924_v62  ;;  %v2906_v17 = vmul.f32 %v8835_v44, %v8835_v44  ;;  %v2933_v53 = vsel %vm593_vm0, %v2905_v45, 0.0 }
 0xfd9   : > { %v2904_v58 = vmul.f32 %v8837_v31, %v8837_v31  ;;  %v2927_v61 = vsel %vm593_vm0, %v2903_v51, 0.0 }
 0xfda   : > { %2928 = vadd.xlane.f32.xlu0 %v2927_v61  ;;  %v2936_v28 = vsel %vm593_vm0, %v2906_v17, 0.0 }
 0xfdb   : > { %v7131_v63 = vpop.f32.mrb[104].mxu1  ;;  %v2930_v35 = vsel %vm593_vm0, %v2904_v58, 0.0 }
 0xfdc   : > { %2931 = vadd.xlane.f32.xlu1 %v2930_v35  ;;  %v2852_v47 = vpop.f32.mrb[105].mxu1  ;;  %v8848_v29 = vmax.f32 %v7131_v63, 0.0 }
 0xfdd   : > { %v8850_v52 = vmax.f32 %v2852_v47, 0.0  ;;  %v7132_v50 = vpop.f32.mrb[106].mxu1 }
 0xfde   : > { %2934 = vadd.xlane.f32.xlu0 %v2933_v53  ;;  %v2855_v56 = vpop.f32.mrb[107].mxu1  ;;  %v8855_v23 = vmax.f32 %v7132_v50, 0.0  ;;  %v2909_v24 = vmul.f32 %v8848_v29, %v8848_v29 }
 0xfdf   : > { %v2907_v54 = vmul.f32 %v8850_v52, %v8850_v52  ;;  %v8857_v57 = vmax.f32 %v2855_v56, 0.0 }
 0xfe0   : > { %2937 = vadd.xlane.f32.xlu1 %v2936_v28  ;;  %v2910_v4 = vmul.f32 %v8855_v23, %v8855_v23  ;;  %v2945_v7 = vsel %vm593_vm0, %v2909_v24, 0.0 }
 0xfe1   : > { %v2908_v15 = vmul.f32 %v8857_v57, %v8857_v57  ;;  %v2939_v2 = vsel %vm593_vm0, %v2907_v54, 0.0 }
 0xfe2   : > { %2940 = vadd.xlane.f32.xlu0 %v2939_v2  ;;  %v2948_v27 = vsel %vm593_vm0, %v2910_v4, 0.0 }
 0xfe3   : > { %v7135_v8 = vpop.f32.mrb[108].mxu1  ;;  %v2942_v60 = vsel %vm593_vm0, %v2908_v15, 0.0 }
 0xfe4   : > { %2943 = vadd.xlane.f32.xlu1 %v2942_v60  ;;  %v2868_v25 = vpop.f32.mrb[109].mxu1  ;;  %v8868_v18 = vmax.f32 %v7135_v8, 0.0 }
 0xfe5   : > { %v8870_v36 = vmax.f32 %v2868_v25, 0.0  ;;  %v7136_v0 = vpop.f32.mrb[110].mxu1 }
 0xfe6   : > { %2946 = vadd.xlane.f32.xlu0 %v2945_v7  ;;  %v2871_v33 = vpop.f32.mrb[111].mxu1  ;;  %v8875_v16 = vmax.f32 %v7136_v0, 0.0  ;;  %v2913_v55 = vmul.f32 %v8868_v18, %v8868_v18 }
 0xfe7   : > { %v2911_v22 = vmul.f32 %v8870_v36, %v8870_v36  ;;  %v8877_v30 = vmax.f32 %v2871_v33, 0.0 }
 0xfe8   : > { %2949 = vadd.xlane.f32.xlu1 %v2948_v27  ;;  %v2914_v49 = vmul.f32 %v8875_v16, %v8875_v16  ;;  %v2957_v9 = vsel %vm593_vm0, %v2913_v55, 0.0 }
 0xfe9   : > { %v2912_v14 = vmul.f32 %v8877_v30, %v8877_v30  ;;  %v2951_v38 = vsel %vm593_vm0, %v2911_v22, 0.0 }
 0xfea   : > { %2952 = vadd.xlane.f32.xlu0 %v2951_v38  ;;  %v2960_v21 = vsel %vm593_vm0, %v2914_v49, 0.0 }
 0xfeb   : > { %v2954_v6 = vsel %vm593_vm0, %v2912_v14, 0.0 }
 0xfec   : > { %2955 = vadd.xlane.f32.xlu1 %v2954_v6 }
 0xfee   : > { %2958 = vadd.xlane.f32.xlu0 %v2957_v9 }
 0xff0   : > { %2961 = vadd.xlane.f32.xlu1 %v2960_v21 }
0x105f   : > { %v2917_v19 = vpop.xlane.xlu0 %2916 }
0x1060   : > { %v2963_v34 = vmax.f32 %v2917_v19, 1e-24 }
0x1061   : > { %v2920_v41 = vpop.xlane.xlu1 %2919 }
0x1062   : > { %7779 = vrsqrt.f32 %v2963_v34  ;;  %v2964_v42 = vmax.f32 %v2920_v41, 1e-24 }
0x1063   : > { %v2923_v59 = vpop.xlane.xlu0 %2922 }
0x1064   : > { %7781 = vrsqrt.f32 %v2964_v42  ;;  %v2965_v1 = vmax.f32 %v2923_v59, 1e-24 }
0x1065   : > { %v2926_v51 = vpop.xlane.xlu1 %2925 }
0x1066   : > { %7783 = vrsqrt.f32 %v2965_v1  ;;  %v2966_v62 = vmax.f32 %v2926_v51, 1e-24 }
0x1067   : > { %v2929_v45 = vpop.xlane.xlu0 %2928 }
0x1068   : > { %7785 = vrsqrt.f32 %v2966_v62  ;;  %v2967_v58 = vmax.f32 %v2929_v45, 1e-24 }
0x1069   : > { %v2932_v61 = vpop.xlane.xlu1 %2931 }
0x106a   : > { %7787 = vrsqrt.f32 %v2967_v58  ;;  %v2968_v17 = vmax.f32 %v2932_v61, 1e-24 }
0x106b   : > { %v2935_v63 = vpop.xlane.xlu0 %2934 }
0x106c   : > { %v7780_v35 = vpop.eup %7779  ;;  %7789 = vrsqrt.f32 %v2968_v17  ;;  %v2969_v47 = vmax.f32 %v2935_v63, 1e-24 }
0x106d   : > { %v2938_v50 = vpop.xlane.xlu1 %2937  ;;  %v2995_v28 = vmul.f32 %v7780_v35, %v8812_v11 }
0x106e   : > { %v7782_v53 = vpop.eup %7781  ;;  %7791 = vrsqrt.f32 %v2969_v47  ;;  %v2970_v56 = vmax.f32 %v2938_v50, 1e-24 }
0x106f   : > { %v2941_v54 = vpop.xlane.xlu0 %2940  ;;  %v2996_v24 = vmul.f32 %v7782_v53, %v8816_v43 }
0x1070   : > { %v7784_v15 = vpop.eup %7783  ;;  %7793 = vrsqrt.f32 %v2970_v56  ;;  %v2971_v2 = vmax.f32 %v2941_v54, 1e-24 }
0x1071   : > { %v2944_v4 = vpop.xlane.xlu1 %2943  ;;  %v3011_v8 = vpack.c.bf16 %v2996_v24, %v2995_v28  ;;  %v2997_v0 = vmul.f32 %v7784_v15, %v8810_v10 }
0x1072   : > { %v7786_v60 = vpop.eup %7785  ;;  %7795 = vrsqrt.f32 %v2971_v2  ;;  %v2972_v25 = vmax.f32 %v2944_v4, 1e-24 }
0x1073   : > { %v2998_v7 = vmul.f32 %v7786_v60, %v8814_v12  ;;  %3019 = vst.msk [vmem:[#allocation2 + $0x180] sm:$0xff] %vm593_vm0, %v3011_v8  ;;  %7141 = vmatprep.mubr.msk.bf16.mxu0 %vm593_vm0, %v3011_v8  ;;  %v2947_v33 = vpop.xlane.xlu0 %2946 }
0x1074   : > { %v7788_v11 = vpop.eup %7787  ;;  %7797 = vrsqrt.f32 %v2972_v25  ;;  %v2973_v43 = vmax.f32 %v2947_v33, 1e-24 }
0x1075   : > { %v3012_v22 = vpack.c.bf16 %v2998_v7, %v2997_v0  ;;  %v2950_v27 = vpop.xlane.xlu1 %2949  ;;  %v2999_v12 = vmul.f32 %v7788_v11, %v8830_v48 }
0x1076   : > { %v7790_v55 = vpop.eup %7789  ;;  %7799 = vrsqrt.f32 %v2973_v43  ;;  %v2974_v14 = vmax.f32 %v2950_v27, 1e-24 }
0x1077   : > { %3020 = vst.msk [vmem:[#allocation2 + $0x188] sm:$0xff] %vm593_vm0, %v3012_v22  ;;  %7142 = vmatmul.mubr.msk.bf16.vlgmr.msra.gmra.mrb[96].mxu0 %vm593_vm0, %v3012_v22  ;;  %v2953_v10 = vpop.xlane.xlu0 %2952  ;;  %v3000_v38 = vmul.f32 %v7790_v55, %v8837_v31 }
0x1078   : > { %v7792_v49 = vpop.eup %7791  ;;  %7801 = vrsqrt.f32 %v2974_v14  ;;  %v2975_v6 = vmax.f32 %v2953_v10, 1e-24 }
0x1079   : > { %v2956_v9 = vpop.xlane.xlu1 %2955  ;;  %v3013_v21 = vpack.c.bf16 %v3000_v38, %v2999_v12  ;;  %v3001_v41 = vmul.f32 %v7792_v49, %v8828_v46 }
0x107a   : > { %v7794_v5 = vpop.eup %7793  ;;  %7803 = vrsqrt.f32 %v2975_v6  ;;  %v2976_v19 = vmax.f32 %v2956_v9, 1e-24  ;;  %v7579_v6 = vld [vmem:[%s10086_s2 + $0x70] sm:$0xff]  }
0x107b   : > { %3021 = vst.msk [vmem:[#allocation2 + $0x190] sm:$0xff] %vm593_vm0, %v3013_v21  ;;  %7145 = vmatprep.mubr.msk.bf16.mxu0 %vm593_vm0, %v3013_v21  ;;  %v2959_v34 = vpop.xlane.xlu0 %2958  ;;  %v3002_v42 = vmul.f32 %v7794_v5, %v8835_v44  ;;  %7189 = vmatprep.subr.bf16.mxu0 %v7579_v6 }
0x107c   : > { %v7796_v48 = vpop.eup %7795  ;;  %7805 = vrsqrt.f32 %v2976_v19  ;;  %v2977_v31 = vmax.f32 %v2959_v34, 1e-24  ;;  %7190 = vmatpush3.bf16.msra.mxu0 %v7579_v6 }
0x107d   : > { %v2962_v59 = vpop.xlane.xlu1 %2961  ;;  %v3014_v1 = vpack.c.bf16 %v3002_v42, %v3001_v41  ;;  %v3003_v45 = vmul.f32 %v7796_v48, %v8850_v52 }
0x107e   : > { %v7798_v51 = vpop.eup %7797  ;;  %7807 = vrsqrt.f32 %v2977_v31  ;;  %v2978_v62 = vmax.f32 %v2962_v59, 1e-24 }
0x107f   : > { %3022 = vst.msk [vmem:[#allocation2 + $0x198] sm:$0xff] %vm593_vm0, %v3014_v1  ;;  %7146 = vmatmul.mubr.msk.bf16.gmra.mrb[100].mxu0 %vm593_vm0, %v3014_v1  ;;  %v3004_v58 = vmul.f32 %v7798_v51, %v8857_v57 }
0x1080   : > { %v7800_v61 = vpop.eup %7799  ;;  %7809 = vrsqrt.f32 %v2978_v62 }
0x1081   : > { %v3015_v46 = vpack.c.bf16 %v3004_v58, %v3003_v45  ;;  %v3005_v17 = vmul.f32 %v7800_v61, %v8848_v29 }
0x1082   : > { %v7802_v44 = vpop.eup %7801 }
0x1083   : > { %3023 = vst.msk [vmem:[#allocation2 + $0x1a0] sm:$0xff] %vm593_vm0, %v3015_v46  ;;  %7149 = vmatprep.mubr.msk.bf16.mxu0 %vm593_vm0, %v3015_v46  ;;  %v3006_v63 = vmul.f32 %v7802_v44, %v8855_v23 }
0x1084   : > { %v7804_v35 = vpop.eup %7803 }
0x1085   : > { %v3016_v47 = vpack.c.bf16 %v3006_v63, %v3005_v17  ;;  %v3007_v52 = vmul.f32 %v7804_v35, %v8870_v36 }
0x1086   : > { %v7806_v50 = vpop.eup %7805 }
0x1087   : > { %3024 = vst.msk [vmem:[#allocation2 + $0x1a8] sm:$0xff] %vm593_vm0, %v3016_v47  ;;  %7150 = vmatmul.mubr.msk.bf16.gmra.mrb[104].mxu0 %vm593_vm0, %v3016_v47  ;;  %v3008_v57 = vmul.f32 %v7806_v50, %v8877_v30 }
0x1088   : > { %v7808_v53 = vpop.eup %7807 }
0x1089   : > { %v3017_v56 = vpack.c.bf16 %v3008_v57, %v3007_v52  ;;  %v3009_v29 = vmul.f32 %v7808_v53, %v8868_v18 }
0x108a   : > { %v7810_v54 = vpop.eup %7809 }
0x108b   : > { %3025 = vst.msk [vmem:[#allocation2 + $0x1b0] sm:$0xff] %vm593_vm0, %v3017_v56  ;;  %7153 = vmatprep.mubr.msk.bf16.mxu0 %vm593_vm0, %v3017_v56  ;;  %v3010_v23 = vmul.f32 %v7810_v54, %v8875_v16 }
0x108d   : > { %v3018_v28 = vpack.c.bf16 %v3010_v23, %v3009_v29 }
0x108f   : > { %3026 = vst.msk [vmem:[#allocation2 + $0x1b8] sm:$0xff] %vm593_vm0, %v3018_v28  ;;  %7154 = vmatmul.mubr.msk.bf16.gmra.mrb[108].mxu0 %vm593_vm0, %v3018_v28 }
0x114a   : > { %v7143_v24 = vpop.f32.mrb[96].mxu0 }
0x114b   : > { %v3102_v36 = vpop.f32.mrb[97].mxu0 }
0x114c   : > { %v7144_v15 = vpop.f32.mrb[98].mxu0 }
0x114d   : > { %v3166_v30 = vpack.c.bf16 %v7144_v15, %v7143_v24  ;;  %v3105_v2 = vpop.f32.mrb[99].mxu0 }
0x114e   : > { %v3165_v4 = vpack.c.bf16 %v3105_v2, %v3102_v36 }
0x1150   : > { %7157 = vmatprep.subr.bf16.mxu1 %v3165_v4 }
0x1151   : > { %7158 = vmatpush3.bf16.msra.mxu1 %v3165_v4 }
0x1152   : > { %v7147_v8 = vpop.f32.mrb[100].mxu0  ;;  %7159 = vmatprep.subr.bf16.mxu1 %v3166_v30 }
0x1153   : > { %v3118_v60 = vpop.f32.mrb[101].mxu0 }
0x1154   : > { %v7148_v25 = vpop.f32.mrb[102].mxu0 }
0x1155   : > { %v3168_v18 = vpack.c.bf16 %v7148_v25, %v7147_v8  ;;  %v3121_v0 = vpop.f32.mrb[103].mxu0  ;;  %7160 = vmatpush3.bf16.msra.mxu1 %v3166_v30 }
0x1156   : > { %v3167_v16 = vpack.c.bf16 %v3121_v0, %v3118_v60 }
0x1158   : > { %7161 = vmatprep.subr.bf16.mxu1 %v3167_v16 }
0x1159   : > { %7162 = vmatpush3.bf16.msra.mxu1 %v3167_v16 }
0x115a   : > { %v7151_v7 = vpop.f32.mrb[104].mxu0  ;;  %7163 = vmatprep.subr.bf16.mxu1 %v3168_v18 }
0x115b   : > { %v3134_v33 = vpop.f32.mrb[105].mxu0 }
0x115c   : > { %v7152_v11 = vpop.f32.mrb[106].mxu0 }
0x115d   : > { %v3170_v43 = vpack.c.bf16 %v7152_v11, %v7151_v7  ;;  %v3137_v22 = vpop.f32.mrb[107].mxu0  ;;  %7164 = vmatpush3.bf16.msra.mxu1 %v3168_v18 }
0x115e   : > { %v3169_v27 = vpack.c.bf16 %v3137_v22, %v3134_v33 }
0x1160   : > { %7165 = vmatprep.subr.bf16.mxu1 %v3169_v27 }
0x1161   : > { %7166 = vmatpush3.bf16.msra.mxu1 %v3169_v27 }
0x1162   : > { %v7155_v55 = vpop.f32.mrb[108].mxu0  ;;  %7167 = vmatprep.subr.bf16.mxu1 %v3170_v43 }
0x1163   : > { %v3150_v14 = vpop.f32.mrb[109].mxu0 }
0x1164   : > { %v7156_v10 = vpop.f32.mrb[110].mxu0 }
0x1165   : > { %v3172_v12 = vpack.c.bf16 %v7156_v10, %v7155_v55  ;;  %v3153_v38 = vpop.f32.mrb[111].mxu0  ;;  %7168 = vmatpush3.bf16.msra.mxu1 %v3170_v43 }
0x1166   : > { %v3171_v49 = vpack.c.bf16 %v3153_v38, %v3150_v14 }
0x1168   : > { %7169 = vmatprep.subr.bf16.mxu1 %v3171_v49 }
0x1169   : > { %7170 = vmatpush3.bf16.msra.mxu1 %v3171_v49 }
0x116a   : > { %7171 = vmatprep.subr.bf16.mxu1 %v3172_v12 }
0x116d   : > { %7172 = vmatpush3.bf16.msra.mxu1 %v3172_v12 }
0x1170   : > { %7174 = vmatmul.mubr.bf16.vlgmr.msra.gmra.mrb[112].mxu1 %v8779_v3 }
0x1171   : > { %7177 = vmatprep.mubr.bf16.mxu1 %v8783_v13 }
0x1178   : > { %7178 = vmatmul.mubr.bf16.gmra.mrb[116].mxu1 %v8787_v20 }
0x1179   : > { %7181 = vmatprep.mubr.bf16.mxu1 %v8791_v37 }
0x1180   : > { %7182 = vmatmul.mubr.bf16.gmra.mrb[120].mxu1 %v8795_v32 }
0x1181   : > { %7185 = vmatprep.mubr.bf16.mxu1 %v8799_v39 }
0x1188   : > { %7186 = vmatmul.mubr.bf16.gmra.mrb[124].mxu1 %v8803_v26 }
0x1189   : > { %7225 = vmatprep.mubr.bf16.mxu1 %v8657_v40 }
0x1243   : > { %v7175_v3 = vpop.f32.mrb[112].mxu1 }
0x1244   : > { %v3207_v13 = vpop.f32.mrb[113].mxu1  ;;  %v8936_v9 = vmax.f32 %v7175_v3, 0.0  ;;  %v7580_v3 = vld [vmem:[%s10086_s2 + $0x78] sm:$0xff]  }
0x1245   : > { %v8938_v20 = vmax.f32 %v3207_v13, 0.0  ;;  %v7176_v37 = vpop.f32.mrb[114].mxu1  ;;  %7191 = vmatprep.subr.bf16.mxu0 %v7580_v3  ;;  %v7581_v13 = vld [vmem:[%s10087_s3] sm:$0xff]  }
0x1246   : > { %v3210_v32 = vpop.f32.mrb[115].mxu1  ;;  %v8942_v26 = vmax.f32 %v7176_v37, 0.0  ;;  %v3288_v21 = vmul.f32 %v8936_v9, %v8936_v9  ;;  %7192 = vmatpush3.bf16.msra.mxu0 %v7580_v3 }
0x1247   : > { %v3286_v39 = vmul.f32 %v8938_v20, %v8938_v20  ;;  %v8944_v40 = vmax.f32 %v3210_v32, 0.0  ;;  %7241 = vmatprep.subr.bf16.mxu0 %v7581_v13 }
0x1248   : > { %v3289_v34 = vmul.f32 %v8942_v26, %v8942_v26  ;;  %v3308_v51 = vsel %vm593_vm0, %v3288_v21, 0.0 }
0x1249   : > { %v3287_v5 = vmul.f32 %v8944_v40, %v8944_v40  ;;  %v3302_v19 = vsel %vm593_vm0, %v3286_v39, 0.0 }
0x124a   : > { %3303 = vadd.xlane.f32.xlu0 %v3302_v19  ;;  %v3311_v46 = vsel %vm593_vm0, %v3289_v34, 0.0 }
0x124b   : > { %v7179_v41 = vpop.f32.mrb[116].mxu1  ;;  %v3305_v42 = vsel %vm593_vm0, %v3287_v5, 0.0 }
0x124c   : > { %3306 = vadd.xlane.f32.xlu1 %v3305_v42  ;;  %v3223_v48 = vpop.f32.mrb[117].mxu1  ;;  %v8954_v31 = vmax.f32 %v7179_v41, 0.0 }
0x124d   : > { %v8956_v59 = vmax.f32 %v3223_v48, 0.0  ;;  %v7180_v1 = vpop.f32.mrb[118].mxu1 }
0x124e   : > { %3309 = vadd.xlane.f32.xlu0 %v3308_v51  ;;  %v3226_v62 = vpop.f32.mrb[119].mxu1  ;;  %v8961_v58 = vmax.f32 %v7180_v1, 0.0  ;;  %v3292_v44 = vmul.f32 %v8954_v31, %v8954_v31 }
0x124f   : > { %v3290_v45 = vmul.f32 %v8956_v59, %v8956_v59  ;;  %v8963_v61 = vmax.f32 %v3226_v62, 0.0 }
0x1250   : > { %3312 = vadd.xlane.f32.xlu1 %v3311_v46  ;;  %v3293_v35 = vmul.f32 %v8961_v58, %v8961_v58  ;;  %v3320_v54 = vsel %vm593_vm0, %v3292_v44, 0.0 }
0x1251   : > { %v3291_v17 = vmul.f32 %v8963_v61, %v8963_v61  ;;  %v3314_v63 = vsel %vm593_vm0, %v3290_v45, 0.0 }
0x1252   : > { %3315 = vadd.xlane.f32.xlu0 %v3314_v63  ;;  %v3323_v36 = vsel %vm593_vm0, %v3293_v35, 0.0 }
0x1253   : > { %v7183_v47 = vpop.f32.mrb[120].mxu1  ;;  %v3317_v50 = vsel %vm593_vm0, %v3291_v17, 0.0 }
0x1254   : > { %3318 = vadd.xlane.f32.xlu1 %v3317_v50  ;;  %v3239_v52 = vpop.f32.mrb[121].mxu1  ;;  %v8974_v57 = vmax.f32 %v7183_v47, 0.0 }
0x1255   : > { %v8976_v53 = vmax.f32 %v3239_v52, 0.0  ;;  %v7184_v56 = vpop.f32.mrb[122].mxu1 }
0x1256   : > { %3321 = vadd.xlane.f32.xlu0 %v3320_v54  ;;  %v3242_v29 = vpop.f32.mrb[123].mxu1  ;;  %v8981_v28 = vmax.f32 %v7184_v56, 0.0  ;;  %v3296_v15 = vmul.f32 %v8974_v57, %v8974_v57 }
0x1257   : > { %v3294_v23 = vmul.f32 %v8976_v53, %v8976_v53  ;;  %v8983_v24 = vmax.f32 %v3242_v29, 0.0 }
0x1258   : > { %3324 = vadd.xlane.f32.xlu1 %v3323_v36  ;;  %v3297_v4 = vmul.f32 %v8981_v28, %v8981_v28  ;;  %v3332_v7 = vsel %vm593_vm0, %v3296_v15, 0.0 }
0x1259   : > { %v3295_v30 = vmul.f32 %v8983_v24, %v8983_v24  ;;  %v3326_v2 = vsel %vm593_vm0, %v3294_v23, 0.0 }
0x125a   : > { %3327 = vadd.xlane.f32.xlu0 %v3326_v2  ;;  %v3335_v27 = vsel %vm593_vm0, %v3297_v4, 0.0 }
0x125b   : > { %v7187_v8 = vpop.f32.mrb[124].mxu1  ;;  %v3329_v60 = vsel %vm593_vm0, %v3295_v30, 0.0 }
0x125c   : > { %3330 = vadd.xlane.f32.xlu1 %v3329_v60  ;;  %v3255_v25 = vpop.f32.mrb[125].mxu1  ;;  %v8994_v18 = vmax.f32 %v7187_v8, 0.0  ;;  %v7582_v60 = vld [vmem:[%s10087_s3 + $0x8] sm:$0xff]  }
0x125d   : > { %v8996_v0 = vmax.f32 %v3255_v25, 0.0  ;;  %v7188_v16 = vpop.f32.mrb[126].mxu1 }
0x125e   : > { %3333 = vadd.xlane.f32.xlu0 %v3332_v7  ;;  %v3258_v33 = vpop.f32.mrb[127].mxu1  ;;  %v9001_v43 = vmax.f32 %v7188_v16, 0.0  ;;  %v3300_v55 = vmul.f32 %v8994_v18, %v8994_v18 }
0x125f   : > { %v3298_v11 = vmul.f32 %v8996_v0, %v8996_v0  ;;  %v9003_v22 = vmax.f32 %v3258_v33, 0.0 }
0x1260   : > { %3336 = vadd.xlane.f32.xlu1 %v3335_v27  ;;  %v3301_v12 = vmul.f32 %v9001_v43, %v9001_v43  ;;  %v3344_v49 = vsel %vm593_vm0, %v3300_v55, 0.0 }
0x1261   : > { %v3299_v14 = vmul.f32 %v9003_v22, %v9003_v22  ;;  %v3338_v10 = vsel %vm593_vm0, %v3298_v11, 0.0 }
0x1262   : > { %3339 = vadd.xlane.f32.xlu0 %v3338_v10  ;;  %v3347_v6 = vsel %vm593_vm0, %v3301_v12, 0.0 }
0x1263   : > { %v3341_v38 = vsel %vm593_vm0, %v3299_v14, 0.0 }
0x1264   : > { %3342 = vadd.xlane.f32.xlu1 %v3341_v38 }
0x1266   : > { %3345 = vadd.xlane.f32.xlu0 %v3344_v49 }
0x1268   : > { %3348 = vadd.xlane.f32.xlu1 %v3347_v6 }
0x12d7   : > { %v3304_v37 = vpop.xlane.xlu0 %3303 }
0x12d8   : > { %v3350_v32 = vmax.f32 %v3304_v37, 1e-24 }
0x12d9   : > { %v3307_v39 = vpop.xlane.xlu1 %3306 }
0x12da   : > { %7811 = vrsqrt.f32 %v3350_v32  ;;  %v3351_v21 = vmax.f32 %v3307_v39, 1e-24 }
0x12db   : > { %v3310_v5 = vpop.xlane.xlu0 %3309 }
0x12dc   : > { %7813 = vrsqrt.f32 %v3351_v21  ;;  %v3352_v19 = vmax.f32 %v3310_v5, 1e-24 }
0x12dd   : > { %v3313_v34 = vpop.xlane.xlu1 %3312 }
0x12de   : > { %7815 = vrsqrt.f32 %v3352_v19  ;;  %v3353_v41 = vmax.f32 %v3313_v34, 1e-24 }
0x12df   : > { %v3316_v42 = vpop.xlane.xlu0 %3315 }
0x12e0   : > { %7817 = vrsqrt.f32 %v3353_v41  ;;  %v3354_v48 = vmax.f32 %v3316_v42, 1e-24 }
0x12e1   : > { %v3319_v1 = vpop.xlane.xlu1 %3318 }
0x12e2   : > { %7819 = vrsqrt.f32 %v3354_v48  ;;  %v3355_v51 = vmax.f32 %v3319_v1, 1e-24 }
0x12e3   : > { %v3322_v62 = vpop.xlane.xlu0 %3321 }
0x12e4   : > { %v7812_v45 = vpop.eup %7811  ;;  %7821 = vrsqrt.f32 %v3355_v51  ;;  %v3356_v46 = vmax.f32 %v3322_v62, 1e-24 }
0x12e5   : > { %v3325_v44 = vpop.xlane.xlu1 %3324  ;;  %v3382_v47 = vmul.f32 %v7812_v45, %v8938_v20  ;;  %v3689_v45 = vld [vmem:[#allocation2] sm:$0xff] }
0x12e6   : > { %v7814_v17 = vpop.eup %7813  ;;  %7823 = vrsqrt.f32 %v3356_v46  ;;  %v3357_v63 = vmax.f32 %v3325_v44, 1e-24  ;;  %v3692_v46 = vld [vmem:[#allocation2 + $0x18] sm:$0xff]  ;;  %v3695_v44 = vld [vmem:[#allocation2 + $0x30] sm:$0xff] }
0x12e7   : > { %v3328_v35 = vpop.xlane.xlu0 %3327  ;;  %v3383_v50 = vmul.f32 %v7814_v17, %v8944_v40  ;;  %v3696_v17 = vld [vmem:[#allocation2 + $0x38] sm:$0xff] }
0x12e8   : > { %v7816_v52 = vpop.eup %7815  ;;  %7825 = vrsqrt.f32 %v3357_v63  ;;  %v3358_v56 = vmax.f32 %v3328_v35, 1e-24  ;;  %v3697_v63 = vld [vmem:[#allocation2 + $0x40] sm:$0xff]  ;;  %v3698_v35 = vld [vmem:[#allocation2 + $0x48] sm:$0xff] }
0x12e9   : > { %v3331_v54 = vpop.xlane.xlu1 %3330  ;;  %v3398_v29 = vpack.c.bf16 %v3383_v50, %v3382_v47  ;;  %v3384_v15 = vmul.f32 %v7816_v52, %v8936_v9  ;;  %v3699_v47 = vld [vmem:[#allocation2 + $0x50] sm:$0xff]  ;;  %v3700_v50 = vld [vmem:[#allocation2 + $0x58] sm:$0xff]  ;;  %v3701_v52 = vld [vmem:[#allocation2 + $0x60] sm:$0xff] }
0x12ea   : > { %v7818_v23 = vpop.eup %7817  ;;  %7827 = vrsqrt.f32 %v3358_v56  ;;  %v3359_v36 = vmax.f32 %v3331_v54, 1e-24  ;;  %v3702_v56 = vld [vmem:[#allocation2 + $0x68] sm:$0xff]  ;;  %v3703_v54 = vld [vmem:[#allocation2 + $0x70] sm:$0xff] }
0x12eb   : > { %v3385_v30 = vmul.f32 %v7818_v23, %v8942_v26  ;;  %3406 = vst.msk [vmem:[#allocation2 + $0x1c0] sm:$0xff] %vm593_vm0, %v3398_v29  ;;  %7193 = vmatprep.mubr.msk.bf16.mxu0 %vm593_vm0, %v3398_v29  ;;  %v3334_v2 = vpop.xlane.xlu0 %3333  ;;  %v3704_v29 = vld [vmem:[#allocation2 + $0x78] sm:$0xff]  ;;  %v3705_v23 = vld [vmem:[#allocation2 + $0x80] sm:$0xff] }
0x12ec   : > { %v7820_v20 = vpop.eup %7819  ;;  %7829 = vrsqrt.f32 %v3359_v36  ;;  %v3360_v40 = vmax.f32 %v3334_v2, 1e-24  ;;  %v3706_v36 = vld [vmem:[#allocation2 + $0x88] sm:$0xff]  ;;  %v3709_v2 = vld [vmem:[#allocation2 + $0xa0] sm:$0xff] }
0x12ed   : > { %v3399_v4 = vpack.c.bf16 %v3385_v30, %v3384_v15  ;;  %v3337_v8 = vpop.xlane.xlu1 %3336  ;;  %v3386_v26 = vmul.f32 %v7820_v20, %v8956_v59  ;;  %v3707_v15 = vld [vmem:[#allocation2 + $0x90] sm:$0xff]  ;;  %v3708_v30 = vld [vmem:[#allocation2 + $0x98] sm:$0xff]  ;;  %v3710_v20 = vld [vmem:[#allocation2 + $0xa8] sm:$0xff] }
0x12ee   : > { %v7822_v25 = vpop.eup %7821  ;;  %7831 = vrsqrt.f32 %v3360_v40  ;;  %v3361_v16 = vmax.f32 %v3337_v8, 1e-24  ;;  %v3711_v40 = vld [vmem:[#allocation2 + $0xb0] sm:$0xff]  ;;  %v3713_v8 = vld [vmem:[#allocation2 + $0xc0] sm:$0xff] }
0x12ef   : > { %3407 = vst.msk [vmem:[#allocation2 + $0x1c8] sm:$0xff] %vm593_vm0, %v3399_v4  ;;  %7194 = vmatmul.mubr.msk.bf16.vlgmr.msra.gmra.mrb[112].mxu0 %vm593_vm0, %v3399_v4  ;;  %v3340_v9 = vpop.xlane.xlu0 %3339  ;;  %v3387_v7 = vmul.f32 %v7822_v25, %v8963_v61  ;;  %v3712_v4 = vld [vmem:[#allocation2 + $0xb8] sm:$0xff]  ;;  %v3715_v25 = vld [vmem:[#allocation2 + $0xd0] sm:$0xff] }
0x12f0   : > { %v7824_v33 = vpop.eup %7823  ;;  %7833 = vrsqrt.f32 %v3361_v16  ;;  %v3362_v11 = vmax.f32 %v3340_v9, 1e-24  ;;  %7242 = vmatpush3.bf16.msra.mxu0 %v7581_v13  ;;  %v3716_v16 = vld [vmem:[#allocation2 + $0xd8] sm:$0xff]  ;;  %v3717_v9 = vld [vmem:[#allocation2 + $0xe0] sm:$0xff] }
0x12f1   : > { %v3343_v27 = vpop.xlane.xlu1 %3342  ;;  %v3400_v55 = vpack.c.bf16 %v3387_v7, %v3386_v26  ;;  %7243 = vmatprep.subr.bf16.mxu0 %v7582_v60  ;;  %v3388_v38 = vmul.f32 %v7824_v33, %v8954_v31  ;;  %v3718_v26 = vld [vmem:[#allocation2 + $0xe8] sm:$0xff]  ;;  %v3719_v7 = vld [vmem:[#allocation2 + $0xf0] sm:$0xff]  ;;  %v3720_v33 = vld [vmem:[#allocation2 + $0xf8] sm:$0xff] }
0x12f2   : > { %v7826_v14 = vpop.eup %7825  ;;  %7835 = vrsqrt.f32 %v3362_v11  ;;  %v3363_v10 = vmax.f32 %v3343_v27, 1e-24  ;;  %v3721_v11 = vld [vmem:[#allocation2 + $0x100] sm:$0xff]  ;;  %v3722_v27 = vld [vmem:[#allocation2 + $0x108] sm:$0xff] }
0x12f3   : > { %3408 = vst.msk [vmem:[#allocation2 + $0x1d0] sm:$0xff] %vm593_vm0, %v3400_v55  ;;  %7197 = vmatprep.mubr.msk.bf16.mxu0 %vm593_vm0, %v3400_v55  ;;  %v3346_v12 = vpop.xlane.xlu0 %3345  ;;  %v3389_v59 = vmul.f32 %v7826_v14, %v8961_v58  ;;  %v3723_v55 = vld [vmem:[#allocation2 + $0x110] sm:$0xff]  ;;  %v3724_v14 = vld [vmem:[#allocation2 + $0x118] sm:$0xff] }
0x12f4   : > { %v7828_v61 = vpop.eup %7827  ;;  %7837 = vrsqrt.f32 %v3363_v10  ;;  %v3364_v49 = vmax.f32 %v3346_v12, 1e-24  ;;  %7244 = vmatpush3.bf16.msra.mxu0 %v7582_v60  ;;  %v3714_v60 = vld [vmem:[#allocation2 + $0xc8] sm:$0xff]  ;;  %v3725_v10 = vld [vmem:[#allocation2 + $0x120] sm:$0xff] }
0x12f5   : > { %v3349_v6 = vpop.xlane.xlu1 %3348  ;;  %v3401_v3 = vpack.c.bf16 %v3389_v59, %v3388_v38  ;;  %v3390_v32 = vmul.f32 %v7828_v61, %v8976_v53  ;;  %v3726_v12 = vld [vmem:[#allocation2 + $0x128] sm:$0xff]  ;;  %v3727_v38 = vld [vmem:[#allocation2 + $0x130] sm:$0xff]  ;;  %v3728_v59 = vld [vmem:[#allocation2 + $0x138] sm:$0xff] }
0x12f6   : > { %v7830_v13 = vpop.eup %7829  ;;  %7839 = vrsqrt.f32 %v3364_v49  ;;  %v3365_v37 = vmax.f32 %v3349_v6, 1e-24  ;;  %v3729_v61 = vld [vmem:[#allocation2 + $0x140] sm:$0xff]  ;;  %v3730_v49 = vld [vmem:[#allocation2 + $0x148] sm:$0xff]  ;;  %v3731_v6 = vld [vmem:[#allocation2 + $0x150] sm:$0xff] }
0x12f7   : > { %3409 = vst.msk [vmem:[#allocation2 + $0x1d8] sm:$0xff] %vm593_vm0, %v3401_v3  ;;  %7198 = vmatmul.mubr.msk.bf16.gmra.mrb[116].mxu0 %vm593_vm0, %v3401_v3  ;;  %v3391_v39 = vmul.f32 %v7830_v13, %v8983_v24  ;;  %v3732_v3 = vld [vmem:[#allocation2 + $0x158] sm:$0xff]  ;;  %v3733_v13 = vld [vmem:[#allocation2 + $0x160] sm:$0xff] }
0x12f8   : > { %v7832_v31 = vpop.eup %7831  ;;  %7841 = vrsqrt.f32 %v3365_v37  ;;  %v3734_v37 = vld [vmem:[#allocation2 + $0x168] sm:$0xff] }
0x12f9   : > { %v3402_v58 = vpack.c.bf16 %v3391_v39, %v3390_v32  ;;  %v3392_v5 = vmul.f32 %v7832_v31, %v8974_v57  ;;  %v3735_v32 = vld [vmem:[#allocation2 + $0x170] sm:$0xff] }
0x12fa   : > { %v7834_v21 = vpop.eup %7833 }
0x12fb   : > { %3410 = vst.msk [vmem:[#allocation2 + $0x1e0] sm:$0xff] %vm593_vm0, %v3402_v58  ;;  %7201 = vmatprep.mubr.msk.bf16.mxu0 %vm593_vm0, %v3402_v58  ;;  %v3393_v19 = vmul.f32 %v7834_v21, %v8981_v28 }
0x12fc   : > { %v7836_v34 = vpop.eup %7835 }
0x12fd   : > { %v3403_v41 = vpack.c.bf16 %v3393_v19, %v3392_v5  ;;  %v3394_v53 = vmul.f32 %v7836_v34, %v8996_v0  ;;  %v3690_v0 = vld [vmem:[#allocation2 + $0x8] sm:$0xff]  ;;  %v3736_v34 = vld [vmem:[#allocation2 + $0x178] sm:$0xff] }
0x12fe   : > { %v7838_v42 = vpop.eup %7837 }
0x12ff   : > { %3411 = vst.msk [vmem:[#allocation2 + $0x1e8] sm:$0xff] %vm593_vm0, %v3403_v41  ;;  %7202 = vmatmul.mubr.msk.bf16.gmra.mrb[120].mxu0 %vm593_vm0, %v3403_v41  ;;  %v3395_v24 = vmul.f32 %v7838_v42, %v9003_v22  ;;  %v3691_v22 = vld [vmem:[#allocation2 + $0x10] sm:$0xff]  ;;  %v3737_v41 = vld [vmem:[#allocation2 + $0x180] sm:$0xff] }
0x1300   : > { %v7840_v48 = vpop.eup %7839 }
0x1301   : > { %v3404_v1 = vpack.c.bf16 %v3395_v24, %v3394_v53  ;;  %v3396_v57 = vmul.f32 %v7840_v48, %v8994_v18  ;;  %v3693_v18 = vld [vmem:[#allocation2 + $0x20] sm:$0xff] }
0x1302   : > { %v7842_v51 = vpop.eup %7841 }
0x1303   : > { %3412 = vst.msk [vmem:[#allocation2 + $0x1f0] sm:$0xff] %vm593_vm0, %v3404_v1  ;;  %7205 = vmatprep.mubr.msk.bf16.mxu0 %vm593_vm0, %v3404_v1  ;;  %v3397_v28 = vmul.f32 %v7842_v51, %v9001_v43  ;;  %v3694_v43 = vld [vmem:[#allocation2 + $0x28] sm:$0xff] }
0x1305   : > { %v3405_v62 = vpack.c.bf16 %v3397_v28, %v3396_v57  ;;  %v3738_v57 = vld [vmem:[#allocation2 + $0x188] sm:$0xff]  ;;  %v3739_v28 = vld [vmem:[#allocation2 + $0x190] sm:$0xff] }
0x1307   : > { %3413 = vst.msk [vmem:[#allocation2 + $0x1f8] sm:$0xff] %vm593_vm0, %v3405_v62  ;;  %7206 = vmatmul.mubr.msk.bf16.gmra.mrb[124].mxu0 %vm593_vm0, %v3405_v62 }
0x1308   : > { %7245 = vmatprep.mubr.msk.bf16.mxu0 %vm593_vm0, %v3689_v45 }
0x130f   : > { %7246 = vmatmul.mubr.msk.bf16.vlgmr.msra.gmra.mrb[128].mxu0 %vm593_vm0, %v3690_v0 }
0x1310   : > { %7249 = vmatprep.mubr.msk.bf16.mxu0 %vm593_vm0, %v3691_v22 }
0x1317   : > { %7250 = vmatmul.mubr.msk.bf16.gmra.mrb[132].mxu0 %vm593_vm0, %v3692_v46 }
0x1318   : > { %7253 = vmatprep.mubr.msk.bf16.mxu0 %vm593_vm0, %v3693_v18 }
0x131f   : > { %7254 = vmatmul.mubr.msk.bf16.gmra.mrb[136].mxu0 %vm593_vm0, %v3694_v43  ;;  %v3740_v43 = vld [vmem:[#allocation2 + $0x198] sm:$0xff] }
0x1320   : > { %7257 = vmatprep.mubr.msk.bf16.mxu0 %vm593_vm0, %v3695_v44  ;;  %v3741_v44 = vld [vmem:[#allocation2 + $0x1a0] sm:$0xff] }
0x1327   : > { %7258 = vmatmul.mubr.msk.bf16.gmra.mrb[140].mxu0 %vm593_vm0, %v3696_v17 }
0x1328   : > { %7261 = vmatprep.mubr.msk.bf16.mxu0 %vm593_vm0, %v3697_v63 }
0x132f   : > { %7262 = vmatmul.mubr.msk.bf16.gmra.mrb[144].mxu0 %vm593_vm0, %v3698_v35 }
0x1330   : > { %7265 = vmatprep.mubr.msk.bf16.mxu0 %vm593_vm0, %v3699_v47 }
0x1337   : > { %7266 = vmatmul.mubr.msk.bf16.gmra.mrb[148].mxu0 %vm593_vm0, %v3700_v50 }
0x1338   : > { %7269 = vmatprep.mubr.msk.bf16.mxu0 %vm593_vm0, %v3701_v52 }
0x133f   : > { %7270 = vmatmul.mubr.msk.bf16.gmra.mrb[152].mxu0 %vm593_vm0, %v3702_v56  ;;  %v3742_v56 = vld [vmem:[#allocation2 + $0x1a8] sm:$0xff] }
0x1340   : > { %7273 = vmatprep.mubr.msk.bf16.mxu0 %vm593_vm0, %v3703_v54  ;;  %v3743_v54 = vld [vmem:[#allocation2 + $0x1b0] sm:$0xff] }
0x1347   : > { %7274 = vmatmul.mubr.msk.bf16.gmra.mrb[156].mxu0 %vm593_vm0, %v3704_v29  ;;  %v9115_v29 = vld [vmem:[%s10088_s4] ss:$0 sm:$0xff] }
0x1348   : > { %7277 = vmatprep.mubr.msk.bf16.mxu0 %vm593_vm0, %v3705_v23 }
0x134f   : > { %7278 = vmatmul.mubr.msk.bf16.gmra.mrb[160].mxu0 %vm593_vm0, %v3706_v36  ;;  %v7583_v36 = vld [vmem:[%s10089_s5] sm:$0xff]  }
0x1350   : > { %7281 = vmatprep.mubr.msk.bf16.mxu0 %vm593_vm0, %v3707_v15 }
0x1357   : > { %7282 = vmatmul.mubr.msk.bf16.gmra.mrb[164].mxu0 %vm593_vm0, %v3708_v30 }
0x1358   : > { %7285 = vmatprep.mubr.msk.bf16.mxu0 %vm593_vm0, %v3709_v2 }
0x135f   : > { %7286 = vmatmul.mubr.msk.bf16.gmra.mrb[168].mxu0 %vm593_vm0, %v3710_v20 }
0x1360   : > { %7289 = vmatprep.mubr.msk.bf16.mxu0 %vm593_vm0, %v3711_v40 }
0x1367   : > { %7290 = vmatmul.mubr.msk.bf16.gmra.mrb[172].mxu0 %vm593_vm0, %v3712_v4 }
0x1368   : > { %7293 = vmatprep.mubr.msk.bf16.mxu0 %vm593_vm0, %v3713_v8 }
0x136f   : > { %7294 = vmatmul.mubr.msk.bf16.gmra.mrb[176].mxu0 %vm593_vm0, %v3714_v60  ;;  %v3744_v60 = vld [vmem:[#allocation2 + $0x1b8] sm:$0xff] }
0x1370   : > { %7297 = vmatprep.mubr.msk.bf16.mxu0 %vm593_vm0, %v3715_v25  ;;  %v7584_v25 = vld [vmem:[%s10089_s5 + $0x8] sm:$0xff]  }
0x1377   : > { %7298 = vmatmul.mubr.msk.bf16.gmra.mrb[180].mxu0 %vm593_vm0, %v3716_v16 }
0x1378   : > { %7301 = vmatprep.mubr.msk.bf16.mxu0 %vm593_vm0, %v3717_v9 }
0x137f   : > { %7302 = vmatmul.mubr.msk.bf16.gmra.mrb[184].mxu0 %vm593_vm0, %v3718_v26  ;;  %v3745_v26 = vld [vmem:[#allocation2 + $0x1c0] sm:$0xff] }
0x1380   : > { %7305 = vmatprep.mubr.msk.bf16.mxu0 %vm593_vm0, %v3719_v7 }
0x1387   : > { %7306 = vmatmul.mubr.msk.bf16.gmra.mrb[188].mxu0 %vm593_vm0, %v3720_v33 }
0x1388   : > { %7309 = vmatprep.mubr.msk.bf16.mxu0 %vm593_vm0, %v3721_v11  ;;  %v7859_v11 = vld [vmem:[%s7953_s21 + $0x8] sm:$0xff]  }
0x138f   : > { %7310 = vmatmul.mubr.msk.bf16.gmra.mrb[192].mxu0 %vm593_vm0, %v3722_v27 }
0x1390   : > { %7313 = vmatprep.mubr.msk.bf16.mxu0 %vm593_vm0, %v3723_v55  ;;  %v7860_v55 = vld [vmem:[%s7953_s21 + $0x10] sm:$0xff]  }
0x1397   : > { %7314 = vmatmul.mubr.msk.bf16.gmra.mrb[196].mxu0 %vm593_vm0, %v3724_v14 }
0x1398   : > { %7317 = vmatprep.mubr.msk.bf16.mxu0 %vm593_vm0, %v3725_v10 }
0x139f   : > { %7318 = vmatmul.mubr.msk.bf16.gmra.mrb[200].mxu0 %vm593_vm0, %v3726_v12  ;;  %v7585_v12 = vld [vmem:[%s10089_s5 + $0x10] sm:$0xff]  }
0x13a0   : > { %7321 = vmatprep.mubr.msk.bf16.mxu0 %vm593_vm0, %v3727_v38 }
0x13a7   : > { %7322 = vmatmul.mubr.msk.bf16.gmra.mrb[204].mxu0 %vm593_vm0, %v3728_v59 }
0x13a8   : > { %7325 = vmatprep.mubr.msk.bf16.mxu0 %vm593_vm0, %v3729_v61 }
0x13af   : > { %7326 = vmatmul.mubr.msk.bf16.gmra.mrb[208].mxu0 %vm593_vm0, %v3730_v49 }
0x13b0   : > { %7329 = vmatprep.mubr.msk.bf16.mxu0 %vm593_vm0, %v3731_v6 }
0x13b7   : > { %7330 = vmatmul.mubr.msk.bf16.gmra.mrb[212].mxu0 %vm593_vm0, %v3732_v3 }
0x13b8   : > { %7333 = vmatprep.mubr.msk.bf16.mxu0 %vm593_vm0, %v3733_v13 }
0x13bf   : > { %7334 = vmatmul.mubr.msk.bf16.gmra.mrb[216].mxu0 %vm593_vm0, %v3734_v37  ;;  %v3746_v37 = vld [vmem:[#allocation2 + $0x1c8] sm:$0xff] }
0x13c0   : > { %7337 = vmatprep.mubr.msk.bf16.mxu0 %vm593_vm0, %v3735_v32  ;;  %v7586_v32 = vld [vmem:[%s10089_s5 + $0x18] sm:$0xff]  }
0x13c2   : > { %v7195_v39 = vpop.f32.mrb[112].mxu0 }
0x13c3   : > { %v3489_v31 = vpop.f32.mrb[113].mxu0 }
0x13c4   : > { %v7196_v58 = vpop.f32.mrb[114].mxu0 }
0x13c5   : > { %v3553_v21 = vpack.c.bf16 %v7196_v58, %v7195_v39  ;;  %v3492_v5 = vpop.f32.mrb[115].mxu0  ;;  %v3747_v58 = vld [vmem:[#allocation2 + $0x1d0] sm:$0xff] }
0x13c6   : > { %v3552_v19 = vpack.c.bf16 %v3492_v5, %v3489_v31 }
0x13c7   : > { %7338 = vmatmul.mubr.msk.bf16.gmra.mrb[220].mxu0 %vm593_vm0, %v3736_v34 }
0x13c8   : > { %7209 = vmatprep.subr.bf16.mxu1 %v3552_v19  ;;  %7341 = vmatprep.mubr.msk.bf16.mxu0 %vm593_vm0, %v3737_v41  ;;  %v7862_v41 = vld [vmem:[%s7953_s21 + $0x20] sm:$0xff]  }
0x13c9   : > { %7210 = vmatpush3.bf16.msra.mxu1 %v3552_v19  ;;  %v7861_v19 = vld [vmem:[%s7953_s21 + $0x18] sm:$0xff]  }
0x13ca   : > { %v7199_v42 = vpop.f32.mrb[116].mxu0  ;;  %7211 = vmatprep.subr.bf16.mxu1 %v3553_v21 }
0x13cb   : > { %v3505_v53 = vpop.f32.mrb[117].mxu0 }
0x13cc   : > { %v7200_v24 = vpop.f32.mrb[118].mxu0 }
0x13cd   : > { %v3555_v48 = vpack.c.bf16 %v7200_v24, %v7199_v42  ;;  %v3508_v1 = vpop.f32.mrb[119].mxu0  ;;  %7212 = vmatpush3.bf16.msra.mxu1 %v3553_v21 }
0x13ce   : > { %v3554_v51 = vpack.c.bf16 %v3508_v1, %v3505_v53 }
0x13cf   : > { %7342 = vmatmul.mubr.msk.bf16.gmra.mrb[224].mxu0 %vm593_vm0, %v3738_v57 }
0x13d0   : > { %7213 = vmatprep.subr.bf16.mxu1 %v3554_v51  ;;  %7345 = vmatprep.mubr.msk.bf16.mxu0 %vm593_vm0, %v3739_v28 }
0x13d1   : > { %7214 = vmatpush3.bf16.msra.mxu1 %v3554_v51 }
0x13d2   : > { %v7203_v62 = vpop.f32.mrb[120].mxu0  ;;  %7215 = vmatprep.subr.bf16.mxu1 %v3555_v48 }
0x13d3   : > { %v3521_v45 = vpop.f32.mrb[121].mxu0 }
0x13d4   : > { %v7204_v0 = vpop.f32.mrb[122].mxu0 }
0x13d5   : > { %v3557_v22 = vpack.c.bf16 %v7204_v0, %v7203_v62  ;;  %v3524_v46 = vpop.f32.mrb[123].mxu0  ;;  %7216 = vmatpush3.bf16.msra.mxu1 %v3555_v48 }
0x13d6   : > { %v3556_v18 = vpack.c.bf16 %v3524_v46, %v3521_v45  ;;  %v3748_v45 = vld [vmem:[#allocation2 + $0x1d8] sm:$0xff]  ;;  %v3749_v46 = vld [vmem:[#allocation2 + $0x1e0] sm:$0xff] }
0x13d7   : > { %7346 = vmatmul.mubr.msk.bf16.gmra.mrb[228].mxu0 %vm593_vm0, %v3740_v43 }
0x13d8   : > { %7217 = vmatprep.subr.bf16.mxu1 %v3556_v18  ;;  %7349 = vmatprep.mubr.msk.bf16.mxu0 %vm593_vm0, %v3741_v44  ;;  %v7863_v44 = vld [vmem:[%s7953_s21 + $0x28] sm:$0xff]  }
0x13d9   : > { %7218 = vmatpush3.bf16.msra.mxu1 %v3556_v18 }
0x13da   : > { %v7207_v17 = vpop.f32.mrb[124].mxu0  ;;  %7219 = vmatprep.subr.bf16.mxu1 %v3557_v22 }
0x13db   : > { %v3537_v63 = vpop.f32.mrb[125].mxu0 }
0x13dc   : > { %v7208_v35 = vpop.f32.mrb[126].mxu0 }
0x13dd   : > { %v3559_v47 = vpack.c.bf16 %v7208_v35, %v7207_v17  ;;  %v3540_v50 = vpop.f32.mrb[127].mxu0  ;;  %7220 = vmatpush3.bf16.msra.mxu1 %v3557_v22 }
0x13de   : > { %v3558_v52 = vpack.c.bf16 %v3540_v50, %v3537_v63  ;;  %v7864_v63 = vld [vmem:[%s7953_s21 + $0x30] sm:$0xff]  }
0x13df   : > { %7350 = vmatmul.mubr.msk.bf16.gmra.mrb[232].mxu0 %vm593_vm0, %v3742_v56 }
0x13e0   : > { %7221 = vmatprep.subr.bf16.mxu1 %v3558_v52  ;;  %7353 = vmatprep.mubr.msk.bf16.mxu0 %vm593_vm0, %v3743_v54 }
0x13e1   : > { %7222 = vmatpush3.bf16.msra.mxu1 %v3558_v52 }
0x13e2   : > { %7223 = vmatprep.subr.bf16.mxu1 %v3559_v47  ;;  %v7247_v23 = vpop.f32.mrb[128].mxu0 }
0x13e3   : > { %v4043_v15 = vadd.f32 %v7247_v23, %v9115_v29  ;;  %v4034_v30 = vpop.f32.mrb[129].mxu0 }
0x13e4   : > { %v4035_v2 = vadd.f32 %v9115_v29, %v4034_v30  ;;  %v7248_v20 = vpop.f32.mrb[130].mxu0  ;;  %v3750_v30 = vld [vmem:[#allocation2 + $0x1e8] sm:$0xff] }
0x13e5   : > { %v4046_v40 = vadd.f32 %v7248_v20, %v9115_v29  ;;  %7224 = vmatpush3.bf16.msra.mxu1 %v3559_v47  ;;  %v4037_v4 = vpop.f32.mrb[131].mxu0  ;;  %v4611_v16 = vmax.f32 %v4043_v15, 0.0 }
0x13e6   : > { %v4038_v8 = vadd.f32 %v9115_v29, %v4037_v4  ;;  %7389 = vmatprep.subr.bf16.mxu1 %v7583_v36  ;;  %v4609_v7 = vmax.f32 %v4035_v2, 0.0 }
0x13e7   : > { %v4612_v9 = vmax.f32 %v4046_v40, 0.0  ;;  %7354 = vmatmul.mubr.msk.bf16.gmra.mrb[236].mxu0 %vm593_vm0, %v3744_v60  ;;  %v3751_v40 = vld [vmem:[#allocation2 + $0x1f0] sm:$0xff]  ;;  %v7865_v60 = vld [vmem:[%s7953_s21 + $0x38] sm:$0xff]  }
0x13e8   : > { %v4610_v33 = vmax.f32 %v4038_v8, 0.0  ;;  %7226 = vmatmul.mubr.bf16.vlgmr.msra.gmra.mrb[128].mxu1 %v7859_v11  ;;  %7357 = vmatprep.mubr.msk.bf16.mxu0 %vm593_vm0, %v3745_v26 }
0x13e9   : > { %v9130_v27 = vpack.c.bf16 %v4612_v9, %v4611_v16  ;;  %7229 = vmatprep.mubr.bf16.mxu1 %v7860_v55  ;;  %7390 = vmatpush3.bf16.msra.mxu1 %v7583_v36 }
0x13ea   : > { %v9133_v14 = vpack.c.bf16 %v4610_v33, %v4609_v7  ;;  %v7251_v10 = vpop.f32.mrb[132].mxu0  ;;  %7391 = vmatprep.subr.bf16.mxu1 %v7584_v25 }
0x13eb   : > { %v4059_v38 = vadd.f32 %v7251_v10, %v9115_v29  ;;  %v4050_v59 = vpop.f32.mrb[133].mxu0 }
0x13ec   : > { %v4051_v61 = vadd.f32 %v9115_v29, %v4050_v59  ;;  %v7252_v49 = vpop.f32.mrb[134].mxu0 }
0x13ed   : > { %v4062_v6 = vadd.f32 %v7252_v49, %v9115_v29  ;;  %v4053_v3 = vpop.f32.mrb[135].mxu0  ;;  %7392 = vmatpush3.bf16.msra.mxu1 %v7584_v25  ;;  %v4615_v39 = vmax.f32 %v4059_v38, 0.0  ;;  %v3752_v38 = vld [vmem:[#allocation2 + $0x1f8] sm:$0xff] }
0x13ee   : > { %v4054_v13 = vadd.f32 %v9115_v29, %v4053_v3  ;;  %7393 = vmatprep.subr.bf16.mxu1 %v7585_v12  ;;  %v4613_v21 = vmax.f32 %v4051_v61, 0.0 }
0x13ef   : > { %v4616_v31 = vmax.f32 %v4062_v6, 0.0  ;;  %7358 = vmatmul.mubr.msk.bf16.gmra.mrb[240].mxu0 %vm593_vm0, %v3746_v37 }
0x13f0   : > { %v4614_v5 = vmax.f32 %v4054_v13, 0.0  ;;  %7230 = vmatmul.mubr.bf16.gmra.mrb[132].mxu1 %v7861_v19  ;;  %7361 = vmatprep.mubr.msk.bf16.mxu0 %vm593_vm0, %v3747_v58 }
0x13f1   : > { %v9148_v34 = vpack.c.bf16 %v4616_v31, %v4615_v39  ;;  %7233 = vmatprep.mubr.bf16.mxu1 %v7862_v41  ;;  %7394 = vmatpush3.bf16.msra.mxu1 %v7585_v12 }
0x13f2   : > { %v9151_v42 = vpack.c.bf16 %v4614_v5, %v4613_v21  ;;  %v7255_v53 = vpop.f32.mrb[136].mxu0  ;;  %7395 = vmatprep.subr.bf16.mxu1 %v7586_v32 }
0x13f3   : > { %v4075_v24 = vadd.f32 %v7255_v53, %v9115_v29  ;;  %v4066_v48 = vpop.f32.mrb[137].mxu0 }
0x13f4   : > { %v4067_v1 = vadd.f32 %v9115_v29, %v4066_v48  ;;  %v7256_v51 = vpop.f32.mrb[138].mxu0 }
0x13f5   : > { %v4078_v57 = vadd.f32 %v7256_v51, %v9115_v29  ;;  %v4069_v28 = vpop.f32.mrb[139].mxu0  ;;  %7396 = vmatpush3.bf16.msra.mxu1 %v7586_v32  ;;  %v4619_v0 = vmax.f32 %v4075_v24, 0.0 }
0x13f6   : > { %v4070_v62 = vadd.f32 %v9115_v29, %v4069_v28  ;;  %v4617_v18 = vmax.f32 %v4067_v1, 0.0 }
0x13f7   : > { %v4620_v22 = vmax.f32 %v4078_v57, 0.0  ;;  %7362 = vmatmul.mubr.msk.bf16.gmra.mrb[244].mxu0 %vm593_vm0, %v3748_v45 }
0x13f8   : > { %v4618_v43 = vmax.f32 %v4070_v62, 0.0  ;;  %7234 = vmatmul.mubr.bf16.gmra.mrb[136].mxu1 %v7863_v44  ;;  %7365 = vmatprep.mubr.msk.bf16.mxu0 %vm593_vm0, %v3749_v46 }
0x13f9   : > { %v9160_v17 = vpack.c.bf16 %v4620_v22, %v4619_v0  ;;  %7237 = vmatprep.mubr.bf16.mxu1 %v7864_v63 }
0x13fa   : > { %v4757_v35 = vpack.c.bf16 %v4618_v43, %v4617_v18  ;;  %v7259_v47 = vpop.f32.mrb[140].mxu0 }
0x13fb   : > { %v4091_v50 = vadd.f32 %v7259_v47, %v9115_v29  ;;  %v4082_v52 = vpop.f32.mrb[141].mxu0 }
0x13fc   : > { %v4083_v56 = vadd.f32 %v9115_v29, %v4082_v52  ;;  %v7260_v54 = vpop.f32.mrb[142].mxu0 }
0x13fd   : > { %v4094_v23 = vadd.f32 %v7260_v54, %v9115_v29  ;;  %v4085_v36 = vpop.f32.mrb[143].mxu0  ;;  %v4623_v2 = vmax.f32 %v4091_v50, 0.0 }
0x13fe   : > { %v4086_v15 = vadd.f32 %v9115_v29, %v4085_v36  ;;  %v4621_v4 = vmax.f32 %v4083_v56, 0.0 }
0x13ff   : > { %v4624_v20 = vmax.f32 %v4094_v23, 0.0  ;;  %7366 = vmatmul.mubr.msk.bf16.gmra.mrb[248].mxu0 %vm593_vm0, %v3750_v30 }
0x1400   : > { %v4622_v8 = vmax.f32 %v4086_v15, 0.0  ;;  %7238 = vmatmul.mubr.bf16.gmra.mrb[140].mxu1 %v7865_v60  ;;  %7369 = vmatprep.mubr.msk.bf16.mxu0 %vm593_vm0, %v3751_v40 }
0x1401   : > { %v9170_v25 = vpack.c.bf16 %v4624_v20, %v4623_v2  ;;  %7397 = vmatprep.mubr.msk.bf16.mxu1 %vm4864_vm1, %v9133_v14 }
0x1402   : > { %v4759_v16 = vpack.c.bf16 %v4622_v8, %v4621_v4  ;;  %v7263_v9 = vpop.f32.mrb[144].mxu0 }
0x1403   : > { %v4107_v26 = vadd.f32 %v7263_v9, %v9115_v29  ;;  %v4098_v7 = vpop.f32.mrb[145].mxu0 }
0x1404   : > { %v4099_v33 = vadd.f32 %v9115_v29, %v4098_v7  ;;  %v7264_v11 = vpop.f32.mrb[146].mxu0 }
0x1405   : > { %v4110_v55 = vadd.f32 %v7264_v11, %v9115_v29  ;;  %v4101_v10 = vpop.f32.mrb[147].mxu0  ;;  %v4627_v59 = vmax.f32 %v4107_v26, 0.0 }
0x1406   : > { %v4102_v12 = vadd.f32 %v9115_v29, %v4101_v10  ;;  %v4625_v49 = vmax.f32 %v4099_v33, 0.0 }
0x1407   : > { %v4628_v61 = vmax.f32 %v4110_v55, 0.0  ;;  %7370 = vmatmul.mubr.msk.bf16.gmra.mrb[252].mxu0 %vm593_vm0, %v3752_v38 }
0x1408   : > { %v4626_v14 = vmax.f32 %v4102_v12, 0.0  ;;  %7398 = vmatmul.mubr.msk.bf16.vlgmr.msra.gmra.mrb[144].mxu1 %vm4864_vm1, %v9130_v27 }
0x1409   : > { %v9181_v6 = vpack.c.bf16 %v4628_v61, %v4627_v59  ;;  %7401 = vmatprep.mubr.msk.bf16.mxu1 %vm4864_vm1, %v9151_v42 }
0x140a   : > { %v4761_v3 = vpack.c.bf16 %v4626_v14, %v4625_v49  ;;  %v7267_v13 = vpop.f32.mrb[148].mxu0 }
0x140b   : > { %v4123_v37 = vadd.f32 %v7267_v13, %v9115_v29  ;;  %v4114_v32 = vpop.f32.mrb[149].mxu0 }
0x140c   : > { %v4115_v39 = vadd.f32 %v9115_v29, %v4114_v32  ;;  %v7268_v31 = vpop.f32.mrb[150].mxu0 }
0x140d   : > { %v4126_v58 = vadd.f32 %v7268_v31, %v9115_v29  ;;  %v4117_v21 = vpop.f32.mrb[151].mxu0  ;;  %v4631_v19 = vmax.f32 %v4123_v37, 0.0 }
0x140e   : > { %v4118_v5 = vadd.f32 %v9115_v29, %v4117_v21  ;;  %v4629_v41 = vmax.f32 %v4115_v39, 0.0 }
0x140f   : > { %v4632_v27 = vmax.f32 %v4126_v58, 0.0 }
0x1410   : > { %v4630_v53 = vmax.f32 %v4118_v5, 0.0  ;;  %7402 = vmatmul.mubr.msk.bf16.gmra.mrb[148].mxu1 %vm4864_vm1, %v9148_v34 }
0x1411   : > { %v9191_v42 = vpack.c.bf16 %v4632_v27, %v4631_v19  ;;  %7405 = vmatprep.mubr.msk.bf16.mxu1 %vm4864_vm1, %v4757_v35 }
0x1412   : > { %v4763_v24 = vpack.c.bf16 %v4630_v53, %v4629_v41  ;;  %v7271_v48 = vpop.f32.mrb[152].mxu0 }
0x1413   : > { %v4139_v1 = vadd.f32 %v7271_v48, %v9115_v29  ;;  %v4130_v51 = vpop.f32.mrb[153].mxu0 }
0x1414   : > { %v4131_v57 = vadd.f32 %v9115_v29, %v4130_v51  ;;  %v7272_v28 = vpop.f32.mrb[154].mxu0 }
0x1415   : > { %v4142_v62 = vadd.f32 %v7272_v28, %v9115_v29  ;;  %v4133_v45 = vpop.f32.mrb[155].mxu0  ;;  %v4635_v22 = vmax.f32 %v4139_v1, 0.0 }
0x1416   : > { %v4134_v0 = vadd.f32 %v9115_v29, %v4133_v45  ;;  %v4633_v34 = vmax.f32 %v4131_v57, 0.0 }
0x1417   : > { %v4636_v46 = vmax.f32 %v4142_v62, 0.0 }
0x1418   : > { %v4634_v18 = vmax.f32 %v4134_v0, 0.0  ;;  %7406 = vmatmul.mubr.msk.bf16.gmra.mrb[152].mxu1 %vm4864_vm1, %v9160_v17 }
0x1419   : > { %v9200_v43 = vpack.c.bf16 %v4636_v46, %v4635_v22  ;;  %7409 = vmatprep.mubr.msk.bf16.mxu1 %vm4864_vm1, %v4759_v16 }
0x141a   : > { %v4765_v44 = vpack.c.bf16 %v4634_v18, %v4633_v34  ;;  %v7275_v63 = vpop.f32.mrb[156].mxu0 }
0x141b   : > { %v4155_v35 = vadd.f32 %v7275_v63, %v9115_v29  ;;  %v4146_v47 = vpop.f32.mrb[157].mxu0 }
0x141c   : > { %v4147_v50 = vadd.f32 %v9115_v29, %v4146_v47  ;;  %v7276_v52 = vpop.f32.mrb[158].mxu0 }
0x141d   : > { %v4158_v56 = vadd.f32 %v7276_v52, %v9115_v29  ;;  %v4149_v54 = vpop.f32.mrb[159].mxu0  ;;  %v4639_v36 = vmax.f32 %v4155_v35, 0.0 }
0x141e   : > { %v4150_v23 = vadd.f32 %v9115_v29, %v4149_v54  ;;  %v4637_v17 = vmax.f32 %v4147_v50, 0.0 }
0x141f   : > { %v4640_v15 = vmax.f32 %v4158_v56, 0.0 }
0x1420   : > { %v4638_v30 = vmax.f32 %v4150_v23, 0.0  ;;  %7410 = vmatmul.mubr.msk.bf16.gmra.mrb[156].mxu1 %vm4864_vm1, %v9170_v25 }
0x1421   : > { %v9209_v2 = vpack.c.bf16 %v4640_v15, %v4639_v36  ;;  %7413 = vmatprep.mubr.msk.bf16.mxu1 %vm4864_vm1, %v4761_v3 }
0x1422   : > { %v4767_v20 = vpack.c.bf16 %v4638_v30, %v4637_v17  ;;  %v7279_v40 = vpop.f32.mrb[160].mxu0 }
0x1423   : > { %v4171_v4 = vadd.f32 %v7279_v40, %v9115_v29  ;;  %v4162_v8 = vpop.f32.mrb[161].mxu0 }
0x1424   : > { %v4163_v60 = vadd.f32 %v9115_v29, %v4162_v8  ;;  %v7280_v16 = vpop.f32.mrb[162].mxu0 }
0x1425   : > { %v4174_v9 = vadd.f32 %v7280_v16, %v9115_v29  ;;  %v4165_v26 = vpop.f32.mrb[163].mxu0  ;;  %v4643_v33 = vmax.f32 %v4171_v4, 0.0 }
0x1426   : > { %v4166_v7 = vadd.f32 %v9115_v29, %v4165_v26  ;;  %v4641_v25 = vmax.f32 %v4163_v60, 0.0 }
0x1427   : > { %v4644_v11 = vmax.f32 %v4174_v9, 0.0 }
0x1428   : > { %v4642_v55 = vmax.f32 %v4166_v7, 0.0  ;;  %7414 = vmatmul.mubr.msk.bf16.gmra.mrb[160].mxu1 %vm4864_vm1, %v9181_v6 }
0x1429   : > { %v9218_v10 = vpack.c.bf16 %v4644_v11, %v4643_v33  ;;  %7417 = vmatprep.mubr.msk.bf16.mxu1 %vm4864_vm1, %v4763_v24 }
0x142a   : > { %v4769_v12 = vpack.c.bf16 %v4642_v55, %v4641_v25  ;;  %v7283_v38 = vpop.f32.mrb[164].mxu0 }
0x142b   : > { %v4187_v59 = vadd.f32 %v7283_v38, %v9115_v29  ;;  %v4178_v61 = vpop.f32.mrb[165].mxu0 }
0x142c   : > { %v4179_v49 = vadd.f32 %v9115_v29, %v4178_v61  ;;  %v7284_v14 = vpop.f32.mrb[166].mxu0 }
0x142d   : > { %v4190_v3 = vadd.f32 %v7284_v14, %v9115_v29  ;;  %v4181_v13 = vpop.f32.mrb[167].mxu0  ;;  %v4647_v32 = vmax.f32 %v4187_v59, 0.0 }
0x142e   : > { %v4182_v37 = vadd.f32 %v9115_v29, %v4181_v13  ;;  %v4645_v6 = vmax.f32 %v4179_v49, 0.0 }
0x142f   : > { %v4648_v39 = vmax.f32 %v4190_v3, 0.0 }
0x1430   : > { %v4646_v31 = vmax.f32 %v4182_v37, 0.0  ;;  %7418 = vmatmul.mubr.msk.bf16.gmra.mrb[164].mxu1 %vm4864_vm1, %v9191_v42 }
0x1431   : > { %v9227_v58 = vpack.c.bf16 %v4648_v39, %v4647_v32  ;;  %7421 = vmatprep.mubr.msk.bf16.mxu1 %vm4864_vm1, %v4765_v44 }
0x1432   : > { %v4771_v21 = vpack.c.bf16 %v4646_v31, %v4645_v6  ;;  %v7287_v5 = vpop.f32.mrb[168].mxu0 }
0x1433   : > { %v4203_v19 = vadd.f32 %v7287_v5, %v9115_v29  ;;  %v4194_v27 = vpop.f32.mrb[169].mxu0 }
0x1434   : > { %v4195_v41 = vadd.f32 %v9115_v29, %v4194_v27  ;;  %v7288_v53 = vpop.f32.mrb[170].mxu0 }
0x1435   : > { %v4206_v24 = vadd.f32 %v7288_v53, %v9115_v29  ;;  %v4197_v48 = vpop.f32.mrb[171].mxu0  ;;  %v4651_v51 = vmax.f32 %v4203_v19, 0.0 }
0x1436   : > { %v4198_v1 = vadd.f32 %v9115_v29, %v4197_v48  ;;  %v4649_v42 = vmax.f32 %v4195_v41, 0.0 }
0x1437   : > { %v4652_v57 = vmax.f32 %v4206_v24, 0.0 }
0x1438   : > { %v4650_v28 = vmax.f32 %v4198_v1, 0.0  ;;  %7422 = vmatmul.mubr.msk.bf16.gmra.mrb[168].mxu1 %vm4864_vm1, %v9200_v43 }
0x1439   : > { %v9236_v62 = vpack.c.bf16 %v4652_v57, %v4651_v51  ;;  %7425 = vmatprep.mubr.msk.bf16.mxu1 %vm4864_vm1, %v4767_v20 }
0x143a   : > { %v4773_v45 = vpack.c.bf16 %v4650_v28, %v4649_v42  ;;  %v7291_v0 = vpop.f32.mrb[172].mxu0 }
0x143b   : > { %v4219_v22 = vadd.f32 %v7291_v0, %v9115_v29  ;;  %v4210_v46 = vpop.f32.mrb[173].mxu0 }
0x143c   : > { %v4211_v34 = vadd.f32 %v9115_v29, %v4210_v46  ;;  %v7292_v18 = vpop.f32.mrb[174].mxu0 }
0x143d   : > { %v4222_v44 = vadd.f32 %v7292_v18, %v9115_v29  ;;  %v4213_v63 = vpop.f32.mrb[175].mxu0  ;;  %v4655_v47 = vmax.f32 %v4219_v22, 0.0 }
0x143e   : > { %v4214_v35 = vadd.f32 %v9115_v29, %v4213_v63  ;;  %v4653_v43 = vmax.f32 %v4211_v34, 0.0 }
0x143f   : > { %v4656_v50 = vmax.f32 %v4222_v44, 0.0 }
0x1440   : > { %v4654_v52 = vmax.f32 %v4214_v35, 0.0  ;;  %7426 = vmatmul.mubr.msk.bf16.gmra.mrb[172].mxu1 %vm4864_vm1, %v9209_v2 }
0x1441   : > { %v9245_v56 = vpack.c.bf16 %v4656_v50, %v4655_v47  ;;  %7429 = vmatprep.mubr.msk.bf16.mxu1 %vm4864_vm1, %v4769_v12 }
0x1442   : > { %v4775_v54 = vpack.c.bf16 %v4654_v52, %v4653_v43  ;;  %v7295_v23 = vpop.f32.mrb[176].mxu0 }
0x1443   : > { %v4235_v36 = vadd.f32 %v7295_v23, %v9115_v29  ;;  %v4226_v15 = vpop.f32.mrb[177].mxu0 }
0x1444   : > { %v4227_v17 = vadd.f32 %v9115_v29, %v4226_v15  ;;  %v7296_v30 = vpop.f32.mrb[178].mxu0 }
0x1445   : > { %v4238_v20 = vadd.f32 %v7296_v30, %v9115_v29  ;;  %v4229_v40 = vpop.f32.mrb[179].mxu0  ;;  %v4659_v8 = vmax.f32 %v4235_v36, 0.0 }
0x1446   : > { %v4230_v4 = vadd.f32 %v9115_v29, %v4229_v40  ;;  %v4657_v2 = vmax.f32 %v4227_v17, 0.0 }
0x1447   : > { %v4660_v60 = vmax.f32 %v4238_v20, 0.0 }
0x1448   : > { %v4658_v16 = vmax.f32 %v4230_v4, 0.0  ;;  %7430 = vmatmul.mubr.msk.bf16.gmra.mrb[176].mxu1 %vm4864_vm1, %v9218_v10 }
0x1449   : > { %v9254_v9 = vpack.c.bf16 %v4660_v60, %v4659_v8  ;;  %7433 = vmatprep.mubr.msk.bf16.mxu1 %vm4864_vm1, %v4771_v21 }
0x144a   : > { %v4777_v26 = vpack.c.bf16 %v4658_v16, %v4657_v2  ;;  %v7299_v7 = vpop.f32.mrb[180].mxu0 }
0x144b   : > { %v4251_v33 = vadd.f32 %v7299_v7, %v9115_v29  ;;  %v4242_v11 = vpop.f32.mrb[181].mxu0 }
0x144c   : > { %v4243_v25 = vadd.f32 %v9115_v29, %v4242_v11  ;;  %v7300_v55 = vpop.f32.mrb[182].mxu0 }
0x144d   : > { %v4254_v12 = vadd.f32 %v7300_v55, %v9115_v29  ;;  %v4245_v38 = vpop.f32.mrb[183].mxu0  ;;  %v4663_v61 = vmax.f32 %v4251_v33, 0.0 }
0x144e   : > { %v4246_v59 = vadd.f32 %v9115_v29, %v4245_v38  ;;  %v4661_v10 = vmax.f32 %v4243_v25, 0.0 }
0x144f   : > { %v4664_v49 = vmax.f32 %v4254_v12, 0.0 }
0x1450   : > { %v4662_v14 = vmax.f32 %v4246_v59, 0.0  ;;  %7434 = vmatmul.mubr.msk.bf16.gmra.mrb[180].mxu1 %vm4864_vm1, %v9227_v58 }
0x1451   : > { %v9263_v3 = vpack.c.bf16 %v4664_v49, %v4663_v61  ;;  %7437 = vmatprep.mubr.msk.bf16.mxu1 %vm4864_vm1, %v4773_v45 }
0x1452   : > { %v4779_v13 = vpack.c.bf16 %v4662_v14, %v4661_v10  ;;  %v7303_v37 = vpop.f32.mrb[184].mxu0 }
0x1453   : > { %v4267_v32 = vadd.f32 %v7303_v37, %v9115_v29  ;;  %v4258_v39 = vpop.f32.mrb[185].mxu0 }
0x1454   : > { %v4259_v6 = vadd.f32 %v9115_v29, %v4258_v39  ;;  %v7304_v31 = vpop.f32.mrb[186].mxu0 }
0x1455   : > { %v4270_v21 = vadd.f32 %v7304_v31, %v9115_v29  ;;  %v4261_v5 = vpop.f32.mrb[187].mxu0  ;;  %v4667_v27 = vmax.f32 %v4267_v32, 0.0 }
0x1456   : > { %v4262_v19 = vadd.f32 %v9115_v29, %v4261_v5  ;;  %v4665_v58 = vmax.f32 %v4259_v6, 0.0 }
0x1457   : > { %v4668_v41 = vmax.f32 %v4270_v21, 0.0 }
0x1458   : > { %v4666_v53 = vmax.f32 %v4262_v19, 0.0  ;;  %7438 = vmatmul.mubr.msk.bf16.gmra.mrb[184].mxu1 %vm4864_vm1, %v9236_v62 }
0x1459   : > { %v9272_v24 = vpack.c.bf16 %v4668_v41, %v4667_v27  ;;  %7441 = vmatprep.mubr.msk.bf16.mxu1 %vm4864_vm1, %v4775_v54 }
0x145a   : > { %v4781_v48 = vpack.c.bf16 %v4666_v53, %v4665_v58  ;;  %v7307_v1 = vpop.f32.mrb[188].mxu0 }
0x145b   : > { %v4283_v51 = vadd.f32 %v7307_v1, %v9115_v29  ;;  %v4274_v57 = vpop.f32.mrb[189].mxu0 }
0x145c   : > { %v4275_v42 = vadd.f32 %v9115_v29, %v4274_v57  ;;  %v7308_v28 = vpop.f32.mrb[190].mxu0 }
0x145d   : > { %v4286_v45 = vadd.f32 %v7308_v28, %v9115_v29  ;;  %v4277_v0 = vpop.f32.mrb[191].mxu0  ;;  %v4671_v46 = vmax.f32 %v4283_v51, 0.0 }
0x145e   : > { %v4278_v22 = vadd.f32 %v9115_v29, %v4277_v0  ;;  %v4669_v62 = vmax.f32 %v4275_v42, 0.0 }
0x145f   : > { %v4672_v34 = vmax.f32 %v4286_v45, 0.0 }
0x1460   : > { %v4670_v18 = vmax.f32 %v4278_v22, 0.0  ;;  %7442 = vmatmul.mubr.msk.bf16.gmra.mrb[188].mxu1 %vm4864_vm1, %v9245_v56 }
0x1461   : > { %v9281_v44 = vpack.c.bf16 %v4672_v34, %v4671_v46  ;;  %7445 = vmatprep.mubr.msk.bf16.mxu1 %vm4864_vm1, %v4777_v26 }
0x1462   : > { %v4783_v63 = vpack.c.bf16 %v4670_v18, %v4669_v62  ;;  %v7311_v35 = vpop.f32.mrb[192].mxu0 }
0x1463   : > { %v4299_v47 = vadd.f32 %v7311_v35, %v9115_v29  ;;  %v4290_v50 = vpop.f32.mrb[193].mxu0 }
0x1464   : > { %v4291_v43 = vadd.f32 %v9115_v29, %v4290_v50  ;;  %v7312_v52 = vpop.f32.mrb[194].mxu0 }
0x1465   : > { %v4302_v54 = vadd.f32 %v7312_v52, %v9115_v29  ;;  %v4293_v23 = vpop.f32.mrb[195].mxu0  ;;  %v4675_v15 = vmax.f32 %v4299_v47, 0.0 }
0x1466   : > { %v4294_v36 = vadd.f32 %v9115_v29, %v4293_v23  ;;  %v4673_v56 = vmax.f32 %v4291_v43, 0.0 }
0x1467   : > { %v4676_v17 = vmax.f32 %v4302_v54, 0.0 }
0x1468   : > { %v4674_v30 = vmax.f32 %v4294_v36, 0.0  ;;  %7446 = vmatmul.mubr.msk.bf16.gmra.mrb[192].mxu1 %vm4864_vm1, %v9254_v9 }
0x1469   : > { %v9290_v20 = vpack.c.bf16 %v4676_v17, %v4675_v15  ;;  %7449 = vmatprep.mubr.msk.bf16.mxu1 %vm4864_vm1, %v4779_v13 }
0x146a   : > { %v4785_v40 = vpack.c.bf16 %v4674_v30, %v4673_v56  ;;  %v7315_v4 = vpop.f32.mrb[196].mxu0 }
0x146b   : > { %v4315_v8 = vadd.f32 %v7315_v4, %v9115_v29  ;;  %v4306_v60 = vpop.f32.mrb[197].mxu0 }
0x146c   : > { %v4307_v2 = vadd.f32 %v9115_v29, %v4306_v60  ;;  %v7316_v16 = vpop.f32.mrb[198].mxu0 }
0x146d   : > { %v4318_v26 = vadd.f32 %v7316_v16, %v9115_v29  ;;  %v4309_v7 = vpop.f32.mrb[199].mxu0  ;;  %v4679_v11 = vmax.f32 %v4315_v8, 0.0 }
0x146e   : > { %v4310_v33 = vadd.f32 %v9115_v29, %v4309_v7  ;;  %v4677_v9 = vmax.f32 %v4307_v2, 0.0 }
0x146f   : > { %v4680_v25 = vmax.f32 %v4318_v26, 0.0 }
0x1470   : > { %v4678_v55 = vmax.f32 %v4310_v33, 0.0  ;;  %7450 = vmatmul.mubr.msk.bf16.gmra.mrb[196].mxu1 %vm4864_vm1, %v9263_v3 }
0x1471   : > { %v9299_v12 = vpack.c.bf16 %v4680_v25, %v4679_v11  ;;  %7453 = vmatprep.mubr.msk.bf16.mxu1 %vm4864_vm1, %v4781_v48 }
0x1472   : > { %v4787_v38 = vpack.c.bf16 %v4678_v55, %v4677_v9  ;;  %v7319_v59 = vpop.f32.mrb[200].mxu0 }
0x1473   : > { %v4331_v61 = vadd.f32 %v7319_v59, %v9115_v29  ;;  %v4322_v49 = vpop.f32.mrb[201].mxu0 }
0x1474   : > { %v4323_v10 = vadd.f32 %v9115_v29, %v4322_v49  ;;  %v7320_v14 = vpop.f32.mrb[202].mxu0 }
0x1475   : > { %v4334_v13 = vadd.f32 %v7320_v14, %v9115_v29  ;;  %v4325_v37 = vpop.f32.mrb[203].mxu0  ;;  %v4683_v39 = vmax.f32 %v4331_v61, 0.0 }
0x1476   : > { %v4326_v32 = vadd.f32 %v9115_v29, %v4325_v37  ;;  %v4681_v3 = vmax.f32 %v4323_v10, 0.0 }
0x1477   : > { %v4684_v6 = vmax.f32 %v4334_v13, 0.0 }
0x1478   : > { %v4682_v31 = vmax.f32 %v4326_v32, 0.0  ;;  %7454 = vmatmul.mubr.msk.bf16.gmra.mrb[200].mxu1 %vm4864_vm1, %v9272_v24 }
0x1479   : > { %v9308_v21 = vpack.c.bf16 %v4684_v6, %v4683_v39  ;;  %7457 = vmatprep.mubr.msk.bf16.mxu1 %vm4864_vm1, %v4783_v63 }
0x147a   : > { %v4789_v5 = vpack.c.bf16 %v4682_v31, %v4681_v3  ;;  %v7323_v19 = vpop.f32.mrb[204].mxu0 }
0x147b   : > { %v4347_v27 = vadd.f32 %v7323_v19, %v9115_v29  ;;  %v4338_v41 = vpop.f32.mrb[205].mxu0 }
0x147c   : > { %v4339_v58 = vadd.f32 %v9115_v29, %v4338_v41  ;;  %v7324_v53 = vpop.f32.mrb[206].mxu0 }
0x147d   : > { %v4350_v48 = vadd.f32 %v7324_v53, %v9115_v29  ;;  %v4341_v1 = vpop.f32.mrb[207].mxu0  ;;  %v4687_v57 = vmax.f32 %v4347_v27, 0.0 }
0x147e   : > { %v4342_v51 = vadd.f32 %v9115_v29, %v4341_v1  ;;  %v4685_v24 = vmax.f32 %v4339_v58, 0.0 }
0x147f   : > { %v4688_v42 = vmax.f32 %v4350_v48, 0.0 }
0x1480   : > { %v4686_v28 = vmax.f32 %v4342_v51, 0.0  ;;  %7458 = vmatmul.mubr.msk.bf16.gmra.mrb[204].mxu1 %vm4864_vm1, %v9281_v44 }
0x1481   : > { %v9317_v45 = vpack.c.bf16 %v4688_v42, %v4687_v57  ;;  %7461 = vmatprep.mubr.msk.bf16.mxu1 %vm4864_vm1, %v4785_v40 }
0x1482   : > { %v4791_v0 = vpack.c.bf16 %v4686_v28, %v4685_v24  ;;  %v7327_v22 = vpop.f32.mrb[208].mxu0 }
0x1483   : > { %v4363_v46 = vadd.f32 %v7327_v22, %v9115_v29  ;;  %v4354_v34 = vpop.f32.mrb[209].mxu0 }
0x1484   : > { %v4355_v62 = vadd.f32 %v9115_v29, %v4354_v34  ;;  %v7328_v18 = vpop.f32.mrb[210].mxu0 }
0x1485   : > { %v4366_v63 = vadd.f32 %v7328_v18, %v9115_v29  ;;  %v4357_v35 = vpop.f32.mrb[211].mxu0  ;;  %v4691_v50 = vmax.f32 %v4363_v46, 0.0 }
0x1486   : > { %v4358_v47 = vadd.f32 %v9115_v29, %v4357_v35  ;;  %v4689_v44 = vmax.f32 %v4355_v62, 0.0 }
0x1487   : > { %v4692_v43 = vmax.f32 %v4366_v63, 0.0 }
0x1488   : > { %v4690_v52 = vmax.f32 %v4358_v47, 0.0  ;;  %7462 = vmatmul.mubr.msk.bf16.gmra.mrb[208].mxu1 %vm4864_vm1, %v9290_v20 }
0x1489   : > { %v9326_v54 = vpack.c.bf16 %v4692_v43, %v4691_v50  ;;  %7465 = vmatprep.mubr.msk.bf16.mxu1 %vm4864_vm1, %v4787_v38 }
0x148a   : > { %v4793_v23 = vpack.c.bf16 %v4690_v52, %v4689_v44  ;;  %v7331_v36 = vpop.f32.mrb[212].mxu0 }
0x148b   : > { %v4379_v15 = vadd.f32 %v7331_v36, %v9115_v29  ;;  %v4370_v17 = vpop.f32.mrb[213].mxu0 }
0x148c   : > { %v4371_v56 = vadd.f32 %v9115_v29, %v4370_v17  ;;  %v7332_v30 = vpop.f32.mrb[214].mxu0 }
0x148d   : > { %v4382_v40 = vadd.f32 %v7332_v30, %v9115_v29  ;;  %v4373_v4 = vpop.f32.mrb[215].mxu0  ;;  %v4695_v60 = vmax.f32 %v4379_v15, 0.0 }
0x148e   : > { %v4374_v8 = vadd.f32 %v9115_v29, %v4373_v4  ;;  %v4693_v20 = vmax.f32 %v4371_v56, 0.0 }
0x148f   : > { %v4696_v2 = vmax.f32 %v4382_v40, 0.0 }
0x1490   : > { %v4694_v16 = vmax.f32 %v4374_v8, 0.0  ;;  %7466 = vmatmul.mubr.msk.bf16.gmra.mrb[212].mxu1 %vm4864_vm1, %v9299_v12 }
0x1491   : > { %v9335_v26 = vpack.c.bf16 %v4696_v2, %v4695_v60  ;;  %7469 = vmatprep.mubr.msk.bf16.mxu1 %vm4864_vm1, %v4789_v5 }
0x1492   : > { %v4795_v7 = vpack.c.bf16 %v4694_v16, %v4693_v20  ;;  %v7335_v33 = vpop.f32.mrb[216].mxu0 }
0x1493   : > { %v4395_v11 = vadd.f32 %v7335_v33, %v9115_v29  ;;  %v4386_v25 = vpop.f32.mrb[217].mxu0 }
0x1494   : > { %v4387_v9 = vadd.f32 %v9115_v29, %v4386_v25  ;;  %v7336_v55 = vpop.f32.mrb[218].mxu0 }
0x1495   : > { %v4398_v38 = vadd.f32 %v7336_v55, %v9115_v29  ;;  %v4389_v59 = vpop.f32.mrb[219].mxu0  ;;  %v4699_v49 = vmax.f32 %v4395_v11, 0.0 }
0x1496   : > { %v4390_v61 = vadd.f32 %v9115_v29, %v4389_v59  ;;  %v4697_v12 = vmax.f32 %v4387_v9, 0.0 }
0x1497   : > { %v4700_v10 = vmax.f32 %v4398_v38, 0.0 }
0x1498   : > { %v4698_v14 = vmax.f32 %v4390_v61, 0.0  ;;  %7470 = vmatmul.mubr.msk.bf16.gmra.mrb[216].mxu1 %vm4864_vm1, %v9308_v21 }
0x1499   : > { %v9344_v13 = vpack.c.bf16 %v4700_v10, %v4699_v49  ;;  %7473 = vmatprep.mubr.msk.bf16.mxu1 %vm4864_vm1, %v4791_v0 }
0x149a   : > { %v4797_v37 = vpack.c.bf16 %v4698_v14, %v4697_v12  ;;  %v7339_v32 = vpop.f32.mrb[220].mxu0 }
0x149b   : > { %v4411_v39 = vadd.f32 %v7339_v32, %v9115_v29  ;;  %v4402_v6 = vpop.f32.mrb[221].mxu0 }
0x149c   : > { %v4403_v3 = vadd.f32 %v9115_v29, %v4402_v6  ;;  %v7340_v31 = vpop.f32.mrb[222].mxu0 }
0x149d   : > { %v4414_v5 = vadd.f32 %v7340_v31, %v9115_v29  ;;  %v4405_v19 = vpop.f32.mrb[223].mxu0  ;;  %v4703_v41 = vmax.f32 %v4411_v39, 0.0 }
0x149e   : > { %v4406_v27 = vadd.f32 %v9115_v29, %v4405_v19  ;;  %v4701_v21 = vmax.f32 %v4403_v3, 0.0 }
0x149f   : > { %v4704_v58 = vmax.f32 %v4414_v5, 0.0 }
0x14a0   : > { %v4702_v53 = vmax.f32 %v4406_v27, 0.0  ;;  %7474 = vmatmul.mubr.msk.bf16.gmra.mrb[220].mxu1 %vm4864_vm1, %v9317_v45 }
0x14a1   : > { %v9353_v48 = vpack.c.bf16 %v4704_v58, %v4703_v41  ;;  %7477 = vmatprep.mubr.msk.bf16.mxu1 %vm4864_vm1, %v4793_v23 }
0x14a2   : > { %v4799_v1 = vpack.c.bf16 %v4702_v53, %v4701_v21  ;;  %v7343_v51 = vpop.f32.mrb[224].mxu0 }
0x14a3   : > { %v4427_v57 = vadd.f32 %v7343_v51, %v9115_v29  ;;  %v4418_v42 = vpop.f32.mrb[225].mxu0 }
0x14a4   : > { %v4419_v24 = vadd.f32 %v9115_v29, %v4418_v42  ;;  %v7344_v28 = vpop.f32.mrb[226].mxu0 }
0x14a5   : > { %v4430_v0 = vadd.f32 %v7344_v28, %v9115_v29  ;;  %v4421_v22 = vpop.f32.mrb[227].mxu0  ;;  %v4707_v34 = vmax.f32 %v4427_v57, 0.0 }
0x14a6   : > { %v4422_v46 = vadd.f32 %v9115_v29, %v4421_v22  ;;  %v4705_v45 = vmax.f32 %v4419_v24, 0.0 }
0x14a7   : > { %v4708_v62 = vmax.f32 %v4430_v0, 0.0 }
0x14a8   : > { %v4706_v18 = vmax.f32 %v4422_v46, 0.0  ;;  %7478 = vmatmul.mubr.msk.bf16.gmra.mrb[224].mxu1 %vm4864_vm1, %v9326_v54 }
0x14a9   : > { %v9362_v63 = vpack.c.bf16 %v4708_v62, %v4707_v34  ;;  %7481 = vmatprep.mubr.msk.bf16.mxu1 %vm4864_vm1, %v4795_v7 }
0x14aa   : > { %v4801_v35 = vpack.c.bf16 %v4706_v18, %v4705_v45  ;;  %v7347_v47 = vpop.f32.mrb[228].mxu0 }
0x14ab   : > { %v4443_v50 = vadd.f32 %v7347_v47, %v9115_v29  ;;  %v4434_v43 = vpop.f32.mrb[229].mxu0 }
0x14ac   : > { %v4435_v44 = vadd.f32 %v9115_v29, %v4434_v43  ;;  %v7348_v52 = vpop.f32.mrb[230].mxu0 }
0x14ad   : > { %v4446_v23 = vadd.f32 %v7348_v52, %v9115_v29  ;;  %v4437_v36 = vpop.f32.mrb[231].mxu0  ;;  %v4711_v17 = vmax.f32 %v4443_v50, 0.0 }
0x14ae   : > { %v4438_v15 = vadd.f32 %v9115_v29, %v4437_v36  ;;  %v4709_v54 = vmax.f32 %v4435_v44, 0.0 }
0x14af   : > { %v4712_v56 = vmax.f32 %v4446_v23, 0.0 }
0x14b0   : > { %v4710_v30 = vmax.f32 %v4438_v15, 0.0  ;;  %7482 = vmatmul.mubr.msk.bf16.gmra.mrb[228].mxu1 %vm4864_vm1, %v9335_v26 }
0x14b1   : > { %v9371_v40 = vpack.c.bf16 %v4712_v56, %v4711_v17  ;;  %7485 = vmatprep.mubr.msk.bf16.mxu1 %vm4864_vm1, %v4797_v37 }
0x14b2   : > { %v9374_v4 = vpack.c.bf16 %v4710_v30, %v4709_v54  ;;  %v7351_v8 = vpop.f32.mrb[232].mxu0 }
0x14b3   : > { %v4459_v60 = vadd.f32 %v7351_v8, %v9115_v29  ;;  %v4450_v2 = vpop.f32.mrb[233].mxu0 }
0x14b4   : > { %v4451_v20 = vadd.f32 %v9115_v29, %v4450_v2  ;;  %v7352_v16 = vpop.f32.mrb[234].mxu0 }
0x14b5   : > { %v4462_v7 = vadd.f32 %v7352_v16, %v9115_v29  ;;  %v4453_v33 = vpop.f32.mrb[235].mxu0  ;;  %v4715_v25 = vmax.f32 %v4459_v60, 0.0 }
0x14b6   : > { %v4454_v11 = vadd.f32 %v9115_v29, %v4453_v33  ;;  %v4713_v9 = vmax.f32 %v4451_v20, 0.0  ;;  %v9417_v20 = vld [vmem:[%s10088_s4] ss:$0 sm:$0xff] }
0x14b7   : > { %v4716_v26 = vmax.f32 %v4462_v7, 0.0 }
0x14b8   : > { %v4714_v55 = vmax.f32 %v4454_v11, 0.0  ;;  %7486 = vmatmul.mubr.msk.bf16.gmra.mrb[232].mxu1 %vm4864_vm1, %v9344_v13 }
0x14b9   : > { %v9382_v38 = vpack.c.bf16 %v4716_v26, %v4715_v25  ;;  %7489 = vmatprep.mubr.msk.bf16.mxu1 %vm4864_vm1, %v4799_v1 }
0x14ba   : > { %v9385_v59 = vpack.c.bf16 %v4714_v55, %v4713_v9  ;;  %v7355_v61 = vpop.f32.mrb[236].mxu0 }
0x14bb   : > { %v4475_v49 = vadd.f32 %v7355_v61, %v9115_v29  ;;  %v7227_v10 = vpop.f32.mrb[128].mxu1  ;;  %v4466_v12 = vpop.f32.mrb[237].mxu0 }
0x14bc   : > { %v4467_v14 = vadd.f32 %v9115_v29, %v4466_v12  ;;  %v3594_v37 = vpop.f32.mrb[129].mxu1  ;;  %v7356_v32 = vpop.f32.mrb[238].mxu0  ;;  %v3659_v13 = vmax.f32 %v7227_v10, 0.0 }
0x14bd   : > { %v4478_v39 = vadd.f32 %v7356_v32, %v9115_v29  ;;  %v7228_v6 = vpop.f32.mrb[130].mxu1  ;;  %v4469_v3 = vpop.f32.mrb[239].mxu0  ;;  %v4719_v27 = vmax.f32 %v4475_v49, 0.0  ;;  %v3657_v41 = vmax.f32 %v3594_v37, 0.0 }
0x14be   : > { %v3660_v31 = vmax.f32 %v7228_v6, 0.0  ;;  %v4470_v5 = vadd.f32 %v9115_v29, %v4469_v3  ;;  %v3597_v19 = vpop.f32.mrb[131].mxu1  ;;  %v4717_v53 = vmax.f32 %v4467_v14, 0.0 }
0x14bf   : > { %v4720_v58 = vmax.f32 %v4478_v39, 0.0  ;;  %v3658_v21 = vmax.f32 %v3597_v19, 0.0 }
0x14c0   : > { %v3674_v1 = vpack.c.bf16 %v3660_v31, %v3659_v13  ;;  %v4718_v51 = vmax.f32 %v4470_v5, 0.0  ;;  %7490 = vmatmul.mubr.msk.bf16.gmra.mrb[236].mxu1 %vm4864_vm1, %v9353_v48 }
0x14c1   : > { %v9393_v57 = vpack.c.bf16 %v4720_v58, %v4719_v27  ;;  %v3673_v42 = vpack.c.bf16 %v3658_v21, %v3657_v41  ;;  %7493 = vmatprep.mubr.msk.bf16.mxu1 %vm4864_vm1, %v4801_v35 }
0x14c2   : > { %3682 = vst.msk [vmem:[#allocation2 + $0x208] sm:$0xff] %vm593_vm0, %v3674_v1  ;;  %v9397_v24 = vpack.c.bf16 %v4718_v51, %v4717_v53  ;;  %v7359_v28 = vpop.f32.mrb[240].mxu0 }
0x14c3   : > { %3681 = vst.msk [vmem:[#allocation2 + $0x200] sm:$0xff] %vm593_vm0, %v3673_v42  ;;  %v4491_v0 = vadd.f32 %v7359_v28, %v9115_v29  ;;  %v7231_v22 = vpop.f32.mrb[132].mxu1  ;;  %v4482_v46 = vpop.f32.mrb[241].mxu0 }
0x14c4   : > { %v4483_v34 = vadd.f32 %v9115_v29, %v4482_v46  ;;  %v3610_v62 = vpop.f32.mrb[133].mxu1  ;;  %v7360_v48 = vpop.f32.mrb[242].mxu0  ;;  %v3663_v35 = vmax.f32 %v7231_v22, 0.0 }
0x14c5   : > { %v4494_v45 = vadd.f32 %v7360_v48, %v9115_v29  ;;  %v7232_v18 = vpop.f32.mrb[134].mxu1  ;;  %v4485_v47 = vpop.f32.mrb[243].mxu0  ;;  %v4723_v52 = vmax.f32 %v4491_v0, 0.0  ;;  %v3661_v23 = vmax.f32 %v3610_v62, 0.0 }
0x14c6   : > { %v3664_v50 = vmax.f32 %v7232_v18, 0.0  ;;  %v4486_v43 = vadd.f32 %v9115_v29, %v4485_v47  ;;  %v3613_v44 = vpop.f32.mrb[135].mxu1  ;;  %v4721_v17 = vmax.f32 %v4483_v34, 0.0 }
0x14c7   : > { %v4724_v36 = vmax.f32 %v4494_v45, 0.0  ;;  %v3662_v15 = vmax.f32 %v3613_v44, 0.0 }
0x14c8   : > { %v3676_v56 = vpack.c.bf16 %v3664_v50, %v3663_v35  ;;  %v4722_v54 = vmax.f32 %v4486_v43, 0.0  ;;  %7494 = vmatmul.mubr.msk.bf16.gmra.mrb[240].mxu1 %vm4864_vm1, %v9362_v63 }
0x14c9   : > { %v9406_v30 = vpack.c.bf16 %v4724_v36, %v4723_v52  ;;  %v3675_v8 = vpack.c.bf16 %v3662_v15, %v3661_v23  ;;  %7497 = vmatprep.mubr.msk.bf16.mxu1 %vm4864_vm1, %v9374_v4  ;;  %v3754_v4 = vld [vmem:[#allocation2 + $0x208] sm:$0xff] }
0x14ca   : > { %3684 = vst.msk [vmem:[#allocation2 + $0x218] sm:$0xff] %vm593_vm0, %v3676_v56  ;;  %v9411_v29 = vpack.c.bf16 %v4722_v54, %v4721_v17  ;;  %v7363_v60 = vpop.f32.mrb[244].mxu0  ;;  %v3753_v2 = vld [vmem:[#allocation2 + $0x200] sm:$0xff] }
0x14cb   : > { %3683 = vst.msk [vmem:[#allocation2 + $0x210] sm:$0xff] %vm593_vm0, %v3675_v8  ;;  %v4507_v63 = vadd.f32 %v9417_v20, %v7363_v60  ;;  %v7235_v16 = vpop.f32.mrb[136].mxu1  ;;  %v4498_v7 = vpop.f32.mrb[245].mxu0  ;;  %7373 = vmatprep.mubr.msk.bf16.mxu0 %vm593_vm0, %v3753_v2 }
0x14cc   : > { %v4499_v33 = vadd.f32 %v9417_v20, %v4498_v7  ;;  %v3626_v11 = vpop.f32.mrb[137].mxu1  ;;  %v7364_v25 = vpop.f32.mrb[246].mxu0  ;;  %7374 = vmatmul.mubr.msk.bf16.gmra.mrb[0].mxu0 %vm593_vm0, %v3754_v4  ;;  %v3667_v61 = vmax.f32 %v7235_v16, 0.0 }
0x14cd   : > { %v4510_v26 = vadd.f32 %v9417_v20, %v7364_v25  ;;  %v7236_v9 = vpop.f32.mrb[138].mxu1  ;;  %v4501_v55 = vpop.f32.mrb[247].mxu0  ;;  %v4727_v14 = vmax.f32 %v4507_v63, 0.0  ;;  %v3665_v37 = vmax.f32 %v3626_v11, 0.0 }
0x14ce   : > { %v3668_v49 = vmax.f32 %v7236_v9, 0.0  ;;  %v4502_v10 = vadd.f32 %v9417_v20, %v4501_v55  ;;  %v3629_v12 = vpop.f32.mrb[139].mxu1  ;;  %v4725_v6 = vmax.f32 %v4499_v33, 0.0 }
0x14cf   : > { %v4728_v32 = vmax.f32 %v4510_v26, 0.0  ;;  %v3666_v39 = vmax.f32 %v3629_v12, 0.0 }
0x14d0   : > { %v3678_v3 = vpack.c.bf16 %v3668_v49, %v3667_v61  ;;  %v4726_v13 = vmax.f32 %v4502_v10, 0.0  ;;  %7498 = vmatmul.mubr.msk.bf16.gmra.mrb[244].mxu1 %vm4864_vm1, %v9371_v40 }
0x14d1   : > { %v9427_v31 = vpack.c.bf16 %v4728_v32, %v4727_v14  ;;  %v3677_v5 = vpack.c.bf16 %v3666_v39, %v3665_v37  ;;  %7501 = vmatprep.mubr.msk.bf16.mxu1 %vm4864_vm1, %v9385_v59  ;;  %v3756_v40 = vld [vmem:[#allocation2 + $0x218] sm:$0xff] }
0x14d2   : > { %3686 = vst.msk [vmem:[#allocation2 + $0x228] sm:$0xff] %vm593_vm0, %v3678_v3  ;;  %v9432_v19 = vpack.c.bf16 %v4726_v13, %v4725_v6  ;;  %v7367_v27 = vpop.f32.mrb[248].mxu0  ;;  %v3755_v41 = vld [vmem:[#allocation2 + $0x210] sm:$0xff] }
0x14d3   : > { %3685 = vst.msk [vmem:[#allocation2 + $0x220] sm:$0xff] %vm593_vm0, %v3677_v5  ;;  %v4523_v58 = vadd.f32 %v9417_v20, %v7367_v27  ;;  %v7239_v21 = vpop.f32.mrb[140].mxu1  ;;  %v4514_v53 = vpop.f32.mrb[249].mxu0  ;;  %7377 = vmatprep.mubr.msk.bf16.mxu0 %vm593_vm0, %v3755_v41  ;;  %v9481_v5 = vld [vmem:[%s10090_s6] ss:$0 sm:$0xff] }
0x14d4   : > { %v4515_v1 = vadd.f32 %v9417_v20, %v4514_v53  ;;  %v3642_v51 = vpop.f32.mrb[141].mxu1  ;;  %v7368_v42 = vpop.f32.mrb[250].mxu0  ;;  %7378 = vmatmul.mubr.msk.bf16.gmra.mrb[4].mxu0 %vm593_vm0, %v3756_v40  ;;  %v3671_v22 = vmax.f32 %v7239_v21, 0.0 }
0x14d5   : > { %v4526_v59 = vadd.f32 %v9417_v20, %v7368_v42  ;;  %v7240_v28 = vpop.f32.mrb[142].mxu1  ;;  %v4517_v0 = vpop.f32.mrb[251].mxu0  ;;  %v4731_v48 = vmax.f32 %v4523_v58, 0.0  ;;  %v3669_v45 = vmax.f32 %v3642_v51, 0.0 }
0x14d6   : > { %v3672_v46 = vmax.f32 %v7240_v28, 0.0  ;;  %v4518_v34 = vadd.f32 %v9417_v20, %v4517_v0  ;;  %v3645_v62 = vpop.f32.mrb[143].mxu1  ;;  %v4729_v35 = vmax.f32 %v4515_v1, 0.0 }
0x14d7   : > { %v4732_v18 = vmax.f32 %v4526_v59, 0.0  ;;  %v3670_v47 = vmax.f32 %v3645_v62, 0.0 }
0x14d8   : > { %v3680_v50 = vpack.c.bf16 %v3672_v46, %v3671_v22  ;;  %v4730_v43 = vmax.f32 %v4518_v34, 0.0  ;;  %7502 = vmatmul.mubr.msk.bf16.gmra.mrb[248].mxu1 %vm4864_vm1, %v9382_v38 }
0x14d9   : > { %v4814_v44 = vpack.c.bf16 %v4732_v18, %v4731_v48  ;;  %v3679_v52 = vpack.c.bf16 %v3670_v47, %v3669_v45  ;;  %7505 = vmatprep.mubr.msk.bf16.mxu1 %vm4864_vm1, %v9397_v24  ;;  %v3758_v8 = vld [vmem:[#allocation2 + $0x228] sm:$0xff] }
0x14da   : > { %3688 = vst.msk [vmem:[#allocation2 + $0x238] sm:$0xff] %vm593_vm0, %v3680_v50  ;;  %v4813_v23 = vpack.c.bf16 %v4730_v43, %v4729_v35  ;;  %v7371_v36 = vpop.f32.mrb[252].mxu0  ;;  %v3757_v15 = vld [vmem:[#allocation2 + $0x220] sm:$0xff] }
0x14db   : > { %3687 = vst.msk [vmem:[#allocation2 + $0x230] sm:$0xff] %vm593_vm0, %v3679_v52  ;;  %v4539_v17 = vadd.f32 %v9417_v20, %v7371_v36  ;;  %v4530_v56 = vpop.f32.mrb[253].mxu0  ;;  %7381 = vmatprep.mubr.msk.bf16.mxu0 %vm593_vm0, %v3757_v15  ;;  %v7399_v54 = vpop.f32.mrb[144].mxu1 }
0x14dc   : > { %v4531_v38 = vadd.f32 %v9417_v20, %v4530_v56  ;;  %v7372_v60 = vpop.f32.mrb[254].mxu0  ;;  %7382 = vmatmul.mubr.msk.bf16.gmra.mrb[8].mxu0 %vm593_vm0, %v3758_v8  ;;  %v5115_v24 = vpop.f32.mrb[145].mxu1 }
0x14dd   : > { %v4542_v2 = vadd.f32 %v9417_v20, %v7372_v60  ;;  %v4533_v63 = vpop.f32.mrb[255].mxu0  ;;  %v7400_v16 = vpop.f32.mrb[146].mxu1  ;;  %v4735_v33 = vmax.f32 %v4539_v17, 0.0 }
0x14de   : > { %v4534_v7 = vadd.f32 %v9417_v20, %v4533_v63  ;;  %v5118_v4 = vpop.f32.mrb[147].mxu1  ;;  %v4733_v25 = vmax.f32 %v4531_v38, 0.0  ;;  %v5127_v41 = vadd.f32 %v7400_v16, %v9481_v5 }
0x14df   : > { %v4736_v11 = vmax.f32 %v4542_v2, 0.0  ;;  %v5119_v53 = vadd.f32 %v9481_v5, %v5118_v4 }
0x14e0   : > { %v4734_v26 = vmax.f32 %v4534_v7, 0.0  ;;  %7506 = vmatmul.mubr.msk.bf16.gmra.mrb[252].mxu1 %vm4864_vm1, %v9393_v57  ;;  %v5693_v34 = vmax.f32 %v5127_v41, 0.0 }
0x14e1   : > { %v4816_v9 = vpack.c.bf16 %v4736_v11, %v4735_v33  ;;  %7509 = vmatprep.mubr.msk.bf16.mxu1 %vm4864_vm1, %v9411_v29  ;;  %v3760_v10 = vld [vmem:[#allocation2 + $0x238] sm:$0xff]  ;;  %v5691_v45 = vmax.f32 %v5119_v53, 0.0 }
0x14e2   : > { %v4815_v55 = vpack.c.bf16 %v4734_v26, %v4733_v25  ;;  %v3759_v61 = vld [vmem:[#allocation2 + $0x230] sm:$0xff] }
0x14e3   : > { %7385 = vmatprep.mubr.msk.bf16.mxu0 %vm593_vm0, %v3759_v61  ;;  %v7403_v49 = vpop.f32.mrb[148].mxu1 }
0x14e4   : > { %7386 = vmatmul.mubr.msk.bf16.gmra.mrb[12].mxu0 %vm593_vm0, %v3760_v10  ;;  %v5131_v12 = vpop.f32.mrb[149].mxu1  ;;  %v5140_v35 = vadd.f32 %v7403_v49, %v9481_v5 }
0x14e5   : > { %v7404_v14 = vpop.f32.mrb[150].mxu1  ;;  %v5132_v43 = vadd.f32 %v9481_v5, %v5131_v12 }
0x14e6   : > { %v5134_v37 = vpop.f32.mrb[151].mxu1  ;;  %v5696_v8 = vmax.f32 %v5140_v35, 0.0 }
0x14e7   : > { %v5135_v17 = vadd.f32 %v9481_v5, %v5134_v37  ;;  %v5694_v2 = vmax.f32 %v5132_v43, 0.0 }
0x14e8   : > { %7510 = vmatmul.mubr.msk.bf16.gmra.mrb[0].mxu1 %vm4864_vm1, %v9406_v30 }
0x14e9   : > { %7513 = vmatprep.mubr.msk.bf16.mxu1 %vm4864_vm1, %v9432_v19  ;;  %v5116_v19 = vadd.f32 %v9481_v5, %v5115_v24  ;;  %v5695_v11 = vmax.f32 %v5135_v17, 0.0 }
0x14eb   : > { %v7407_v57 = vpop.f32.mrb[152].mxu1  ;;  %v5690_v0 = vmax.f32 %v5116_v19, 0.0 }
0x14ec   : > { %v5147_v32 = vpop.f32.mrb[153].mxu1 }
0x14ed   : > { %v9463_v29 = vpop.f32.mrb[154].mxu1  ;;  %v5148_v61 = vadd.f32 %v9481_v5, %v5147_v32 }
0x14ee   : > { %v9465_v39 = vpop.f32.mrb[155].mxu1  ;;  %v5159_v12 = vadd.f32 %v9463_v29, %v9481_v5 }
0x14f0   : > { %7514 = vmatmul.mubr.msk.bf16.gmra.mrb[4].mxu1 %vm4864_vm1, %v9427_v31  ;;  %v5124_v31 = vadd.f32 %v7399_v54, %v9481_v5 }
0x14f1   : > { %7517 = vmatprep.mubr.msk.bf16.mxu1 %vm4864_vm1, %v4813_v23  ;;  %v5143_v23 = vadd.f32 %v7404_v14, %v9481_v5 }
0x14f2   : > { %v5692_v51 = vmax.f32 %v5124_v31, 0.0  ;;  %v5151_v31 = vadd.f32 %v9481_v5, %v9465_v39 }
0x14f3   : > { %v9470_v6 = vpop.f32.mrb[156].mxu1  ;;  %v5697_v7 = vmax.f32 %v5143_v23, 0.0 }
0x14f4   : > { %v9472_v3 = vpop.f32.mrb[157].mxu1 }
0x14f5   : > { %v9474_v13 = vpop.f32.mrb[158].mxu1 }
0x14f6   : > { %v9476_v30 = vpop.f32.mrb[159].mxu1 }
0x14f7   : > { %v5167_v35 = vadd.f32 %v9481_v5, %v9476_v30 }
0x14f8   : > { %7518 = vmatmul.mubr.msk.bf16.gmra.mrb[8].mxu1 %vm4864_vm1, %v4814_v44 }
0x14f9   : > { %7521 = vmatprep.mubr.msk.bf16.mxu1 %vm4864_vm1, %v4815_v55 }
0x14fb   : > { %v7415_v27 = vpop.f32.mrb[160].mxu1 }
0x14fc   : > { %v5188_v58 = vadd.f32 %v7415_v27, %v9481_v5  ;;  %v5179_v21 = vpop.f32.mrb[161].mxu1 }
0x14fd   : > { %v5180_v40 = vadd.f32 %v9481_v5, %v5179_v21  ;;  %v7416_v1 = vpop.f32.mrb[162].mxu1  ;;  %v5698_v21 = vmax.f32 %v5148_v61, 0.0 }
0x14fe   : > { %v5708_v42 = vmax.f32 %v5188_v58, 0.0  ;;  %v5191_v59 = vadd.f32 %v7416_v1, %v9481_v5  ;;  %v5182_v28 = vpop.f32.mrb[163].mxu1  ;;  %v5701_v1 = vmax.f32 %v5159_v12, 0.0 }
0x14ff   : > { %v5706_v22 = vmax.f32 %v5180_v40, 0.0  ;;  %v5183_v46 = vadd.f32 %v9481_v5, %v5182_v28  ;;  %v5172_v28 = vadd.f32 %v9470_v6, %v9481_v5 }
0x1500   : > { %v9493_v62 = vadd.f32 %v5708_v42, %v5692_v51  ;;  %v5709_v48 = vmax.f32 %v5191_v59, 0.0  ;;  %7522 = vmatmul.mubr.msk.bf16.gmra.mrb[12].mxu1 %vm4864_vm1, %v4816_v9  ;;  %v5156_v9 = vadd.f32 %v7407_v57, %v9481_v5  ;;  %v5699_v42 = vmax.f32 %v5151_v31, 0.0 }
0x1501   : > { %v9496_v18 = vadd.f32 %v5706_v22, %v5690_v0  ;;  %v5707_v47 = vmax.f32 %v5183_v46, 0.0  ;;  %v5164_v22 = vadd.f32 %v9481_v5, %v9472_v3 }
0x1502   : > { %v9499_v50 = vadd.f32 %v5709_v48, %v5693_v34  ;;  %v5700_v57 = vmax.f32 %v5156_v9, 0.0  ;;  %v5175_v48 = vadd.f32 %v9474_v13, %v9481_v5 }
0x1503   : > { %v9502_v44 = vadd.f32 %v5707_v47, %v5691_v45  ;;  %v7419_v52 = vpop.f32.mrb[164].mxu1 }
0x1504   : > { %v5204_v36 = vadd.f32 %v7419_v52, %v9481_v5  ;;  %v5195_v15 = vpop.f32.mrb[165].mxu1  ;;  %v5704_v52 = vmax.f32 %v5172_v28, 0.0 }
0x1505   : > { %v5196_v56 = vadd.f32 %v9481_v5, %v5195_v15  ;;  %v7420_v54 = vpop.f32.mrb[166].mxu1  ;;  %v5702_v15 = vmax.f32 %v5164_v22, 0.0 }
0x1506   : > { %v5712_v38 = vmax.f32 %v5204_v36, 0.0  ;;  %v5207_v60 = vadd.f32 %v7420_v54, %v9481_v5  ;;  %v5198_v24 = vpop.f32.mrb[167].mxu1  ;;  %v5705_v54 = vmax.f32 %v5175_v48, 0.0 }
0x1507   : > { %v5710_v63 = vmax.f32 %v5196_v56, 0.0  ;;  %v5199_v16 = vadd.f32 %v9481_v5, %v5198_v24 }
0x1508   : > { %v9510_v4 = vadd.f32 %v5712_v38, %v5696_v8  ;;  %v5713_v33 = vmax.f32 %v5207_v60, 0.0  ;;  %v5703_v38 = vmax.f32 %v5167_v35, 0.0 }
0x1509   : > { %v9512_v25 = vadd.f32 %v5710_v63, %v5694_v2  ;;  %v5711_v26 = vmax.f32 %v5199_v16, 0.0 }
0x150a   : > { %v9515_v55 = vadd.f32 %v5713_v33, %v5697_v7 }
0x150b   : > { %v9518_v49 = vadd.f32 %v5711_v26, %v5695_v11  ;;  %v7423_v10 = vpop.f32.mrb[168].mxu1 }
0x150c   : > { %v5220_v14 = vadd.f32 %v7423_v10, %v9481_v5  ;;  %v5211_v37 = vpop.f32.mrb[169].mxu1 }
0x150d   : > { %v5212_v19 = vadd.f32 %v9481_v5, %v5211_v37  ;;  %v7424_v27 = vpop.f32.mrb[170].mxu1 }
0x150e   : > { %v5716_v41 = vmax.f32 %v5220_v14, 0.0  ;;  %v5223_v58 = vadd.f32 %v7424_v27, %v9481_v5  ;;  %v5214_v32 = vpop.f32.mrb[171].mxu1 }
0x150f   : > { %v5714_v53 = vmax.f32 %v5212_v19, 0.0  ;;  %v5215_v40 = vadd.f32 %v9481_v5, %v5214_v32 }
0x1510   : > { %v9528_v29 = vadd.f32 %v5716_v41, %v5700_v57  ;;  %v5717_v51 = vmax.f32 %v5223_v58, 0.0 }
0x1511   : > { %v9530_v59 = vadd.f32 %v5714_v53, %v5698_v21  ;;  %v5715_v39 = vmax.f32 %v5215_v40, 0.0 }
0x1512   : > { %v9534_v0 = vadd.f32 %v5717_v51, %v5701_v1 }
0x1513   : > { %v9538_v46 = vadd.f32 %v5715_v39, %v5699_v42  ;;  %v7427_v34 = vpop.f32.mrb[172].mxu1 }
0x1514   : > { %v5236_v45 = vadd.f32 %v7427_v34, %v9481_v5  ;;  %v5227_v47 = vpop.f32.mrb[173].mxu1 }
0x1515   : > { %v5228_v43 = vadd.f32 %v9481_v5, %v5227_v47  ;;  %v7428_v6 = vpop.f32.mrb[174].mxu1 }
0x1516   : > { %v5720_v23 = vmax.f32 %v5236_v45, 0.0  ;;  %v5239_v36 = vadd.f32 %v7428_v6, %v9481_v5  ;;  %v5230_v3 = vpop.f32.mrb[175].mxu1 }
0x1517   : > { %v5718_v17 = vmax.f32 %v5228_v43, 0.0  ;;  %v5231_v56 = vadd.f32 %v9481_v5, %v5230_v3 }
0x1518   : > { %v9548_v13 = vadd.f32 %v5720_v23, %v5704_v52  ;;  %v5721_v8 = vmax.f32 %v5239_v36, 0.0 }
0x1519   : > { %v9550_v60 = vadd.f32 %v5718_v17, %v5702_v15  ;;  %v5719_v30 = vmax.f32 %v5231_v56, 0.0 }
0x151a   : > { %v9552_v24 = vadd.f32 %v5721_v8, %v5705_v54 }
0x151b   : > { %v9554_v2 = vadd.f32 %v5719_v30, %v5703_v38  ;;  %v7431_v63 = vpop.f32.mrb[176].mxu1 }
0x151c   : > { %v5252_v16 = vadd.f32 %v7431_v63, %v9481_v5  ;;  %v5243_v7 = vpop.f32.mrb[177].mxu1 }
0x151d   : > { %v5244_v33 = vadd.f32 %v9481_v5, %v5243_v7  ;;  %v7432_v11 = vpop.f32.mrb[178].mxu1 }
0x151e   : > { %v5724_v26 = vmax.f32 %v5252_v16, 0.0  ;;  %v5255_v9 = vadd.f32 %v7432_v11, %v9481_v5  ;;  %v5246_v61 = vpop.f32.mrb[179].mxu1 }
0x151f   : > { %v5722_v10 = vmax.f32 %v5244_v33, 0.0  ;;  %v5247_v12 = vadd.f32 %v9481_v5, %v5246_v61 }
0x1520   : > { %v9561_v14 = vadd.f32 %v9493_v62, %v5724_v26  ;;  %v5725_v37 = vmax.f32 %v5255_v9, 0.0 }
0x1521   : > { %v9564_v31 = vadd.f32 %v9496_v18, %v5722_v10  ;;  %v5723_v19 = vmax.f32 %v5247_v12, 0.0 }
0x1522   : > { %v9567_v27 = vadd.f32 %v9499_v50, %v5725_v37 }
0x1523   : > { %v9570_v57 = vadd.f32 %v9502_v44, %v5723_v19  ;;  %v7435_v41 = vpop.f32.mrb[180].mxu1 }
0x1524   : > { %v5268_v58 = vadd.f32 %v7435_v41, %v9481_v5  ;;  %v5259_v32 = vpop.f32.mrb[181].mxu1 }
0x1525   : > { %v5260_v21 = vadd.f32 %v9481_v5, %v5259_v32  ;;  %v7436_v53 = vpop.f32.mrb[182].mxu1 }
0x1526   : > { %v5728_v62 = vmax.f32 %v5268_v58, 0.0  ;;  %v5271_v40 = vadd.f32 %v7436_v53, %v9481_v5  ;;  %v5262_v1 = vpop.f32.mrb[183].mxu1 }
0x1527   : > { %v5726_v18 = vmax.f32 %v5260_v21, 0.0  ;;  %v5263_v51 = vadd.f32 %v9481_v5, %v5262_v1 }
0x1528   : > { %v9577_v50 = vadd.f32 %v9510_v4, %v5728_v62  ;;  %v5729_v42 = vmax.f32 %v5271_v40, 0.0 }
0x1529   : > { %v9580_v44 = vadd.f32 %v9512_v25, %v5726_v18  ;;  %v5727_v39 = vmax.f32 %v5263_v51, 0.0 }
0x152a   : > { %v9583_v28 = vadd.f32 %v9515_v55, %v5729_v42 }
0x152b   : > { %v9586_v22 = vadd.f32 %v9518_v49, %v5727_v39  ;;  %v7439_v34 = vpop.f32.mrb[184].mxu1 }
0x152c   : > { %v5284_v48 = vadd.f32 %v7439_v34, %v9481_v5  ;;  %v5275_v45 = vpop.f32.mrb[185].mxu1 }
0x152d   : > { %v5276_v47 = vadd.f32 %v9481_v5, %v5275_v45  ;;  %v7440_v35 = vpop.f32.mrb[186].mxu1 }
0x152e   : > { %v5732_v4 = vmax.f32 %v5284_v48, 0.0  ;;  %v5287_v43 = vadd.f32 %v7440_v35, %v9481_v5  ;;  %v5278_v6 = vpop.f32.mrb[187].mxu1 }
0x152f   : > { %v5730_v25 = vmax.f32 %v5276_v47, 0.0  ;;  %v5279_v52 = vadd.f32 %v9481_v5, %v5278_v6 }
0x1530   : > { %v9593_v55 = vadd.f32 %v9528_v29, %v5732_v4  ;;  %v5733_v23 = vmax.f32 %v5287_v43, 0.0 }
0x1531   : > { %v9596_v49 = vadd.f32 %v9530_v59, %v5730_v25  ;;  %v5731_v36 = vmax.f32 %v5279_v52, 0.0 }
0x1532   : > { %v9599_v3 = vadd.f32 %v9534_v0, %v5733_v23 }
0x1533   : > { %v9602_v15 = vadd.f32 %v9538_v46, %v5731_v36  ;;  %v7443_v17 = vpop.f32.mrb[188].mxu1 }
0x1534   : > { %v5300_v56 = vadd.f32 %v7443_v17, %v9481_v5  ;;  %v5291_v54 = vpop.f32.mrb[189].mxu1 }
0x1535   : > { %v5292_v8 = vadd.f32 %v9481_v5, %v5291_v54  ;;  %v7444_v38 = vpop.f32.mrb[190].mxu1 }
0x1536   : > { %v5736_v29 = vmax.f32 %v5300_v56, 0.0  ;;  %v5303_v30 = vadd.f32 %v7444_v38, %v9481_v5  ;;  %v5294_v63 = vpop.f32.mrb[191].mxu1 }
0x1537   : > { %v5734_v59 = vmax.f32 %v5292_v8, 0.0  ;;  %v5295_v16 = vadd.f32 %v9481_v5, %v5294_v63 }
0x1538   : > { %v9609_v0 = vadd.f32 %v9548_v13, %v5736_v29  ;;  %v5737_v7 = vmax.f32 %v5303_v30, 0.0 }
0x1539   : > { %v9612_v46 = vadd.f32 %v9550_v60, %v5734_v59  ;;  %v5735_v33 = vmax.f32 %v5295_v16, 0.0 }
0x153a   : > { %v9615_v11 = vadd.f32 %v9552_v24, %v5737_v7 }
0x153b   : > { %v9618_v26 = vadd.f32 %v9554_v2, %v5735_v33  ;;  %v7447_v9 = vpop.f32.mrb[192].mxu1 }
0x153c   : > { %v5316_v61 = vadd.f32 %v7447_v9, %v9481_v5  ;;  %v5307_v10 = vpop.f32.mrb[193].mxu1 }
0x153d   : > { %v5308_v12 = vadd.f32 %v9481_v5, %v5307_v10  ;;  %v7448_v37 = vpop.f32.mrb[194].mxu1 }
0x153e   : > { %v5740_v13 = vmax.f32 %v5316_v61, 0.0  ;;  %v5319_v19 = vadd.f32 %v7448_v37, %v9481_v5  ;;  %v5310_v41 = vpop.f32.mrb[195].mxu1 }
0x153f   : > { %v5738_v60 = vmax.f32 %v5308_v12, 0.0  ;;  %v5311_v58 = vadd.f32 %v9481_v5, %v5310_v41 }
0x1540   : > { %v9625_v24 = vadd.f32 %v9561_v14, %v5740_v13  ;;  %v5741_v32 = vmax.f32 %v5319_v19, 0.0 }
0x1541   : > { %v9628_v2 = vadd.f32 %v9564_v31, %v5738_v60  ;;  %v5739_v21 = vmax.f32 %v5311_v58, 0.0 }
0x1542   : > { %v9631_v53 = vadd.f32 %v9567_v27, %v5741_v32 }
0x1543   : > { %v9634_v62 = vadd.f32 %v9570_v57, %v5739_v21  ;;  %v7451_v40 = vpop.f32.mrb[196].mxu1 }
0x1544   : > { %v5332_v1 = vadd.f32 %v7451_v40, %v9481_v5  ;;  %v5323_v18 = vpop.f32.mrb[197].mxu1 }
0x1545   : > { %v5324_v51 = vadd.f32 %v9481_v5, %v5323_v18  ;;  %v7452_v42 = vpop.f32.mrb[198].mxu1 }
0x1546   : > { %v5744_v14 = vmax.f32 %v5332_v1, 0.0  ;;  %v5335_v39 = vadd.f32 %v7452_v42, %v9481_v5  ;;  %v5326_v34 = vpop.f32.mrb[199].mxu1 }
0x1547   : > { %v5742_v31 = vmax.f32 %v5324_v51, 0.0  ;;  %v5327_v48 = vadd.f32 %v9481_v5, %v5326_v34 }
0x1548   : > { %v9641_v27 = vadd.f32 %v9577_v50, %v5744_v14  ;;  %v5745_v45 = vmax.f32 %v5335_v39, 0.0 }
0x1549   : > { %v9644_v57 = vadd.f32 %v9580_v44, %v5742_v31  ;;  %v5743_v47 = vmax.f32 %v5327_v48, 0.0 }
0x154a   : > { %v9647_v35 = vadd.f32 %v9583_v28, %v5745_v45 }
0x154b   : > { %v9650_v4 = vadd.f32 %v9586_v22, %v5743_v47  ;;  %v7455_v43 = vpop.f32.mrb[200].mxu1 }
0x154c   : > { %v5348_v6 = vadd.f32 %v7455_v43, %v9481_v5  ;;  %v5339_v25 = vpop.f32.mrb[201].mxu1 }
0x154d   : > { %v5340_v52 = vadd.f32 %v9481_v5, %v5339_v25  ;;  %v7456_v23 = vpop.f32.mrb[202].mxu1 }
0x154e   : > { %v5748_v50 = vmax.f32 %v5348_v6, 0.0  ;;  %v5351_v36 = vadd.f32 %v7456_v23, %v9481_v5  ;;  %v5342_v17 = vpop.f32.mrb[203].mxu1 }
0x154f   : > { %v5746_v44 = vmax.f32 %v5340_v52, 0.0  ;;  %v5343_v56 = vadd.f32 %v9481_v5, %v5342_v17 }
0x1550   : > { %v9657_v28 = vadd.f32 %v9593_v55, %v5748_v50  ;;  %v5749_v54 = vmax.f32 %v5351_v36, 0.0 }
0x1551   : > { %v9660_v22 = vadd.f32 %v9596_v49, %v5746_v44  ;;  %v5747_v8 = vmax.f32 %v5343_v56, 0.0 }
0x1552   : > { %v9663_v38 = vadd.f32 %v9599_v3, %v5749_v54 }
0x1553   : > { %v9666_v29 = vadd.f32 %v9602_v15, %v5747_v8  ;;  %v7459_v30 = vpop.f32.mrb[204].mxu1 }
0x1554   : > { %v5364_v63 = vadd.f32 %v7459_v30, %v9481_v5  ;;  %v5355_v59 = vpop.f32.mrb[205].mxu1 }
0x1555   : > { %v5356_v16 = vadd.f32 %v9481_v5, %v5355_v59  ;;  %v7460_v7 = vpop.f32.mrb[206].mxu1 }
0x1556   : > { %v5752_v55 = vmax.f32 %v5364_v63, 0.0  ;;  %v5367_v33 = vadd.f32 %v7460_v7, %v9481_v5  ;;  %v5358_v9 = vpop.f32.mrb[207].mxu1 }
0x1557   : > { %v5750_v49 = vmax.f32 %v5356_v16, 0.0  ;;  %v5359_v61 = vadd.f32 %v9481_v5, %v5358_v9 }
0x1558   : > { %v9673_v3 = vadd.f32 %v9609_v0, %v5752_v55  ;;  %v5753_v10 = vmax.f32 %v5367_v33, 0.0 }
0x1559   : > { %v9676_v15 = vadd.f32 %v9612_v46, %v5750_v49  ;;  %v5751_v12 = vmax.f32 %v5359_v61, 0.0 }
0x155a   : > { %v9679_v37 = vadd.f32 %v9615_v11, %v5753_v10 }
0x155b   : > { %v9682_v13 = vadd.f32 %v9618_v26, %v5751_v12  ;;  %v7463_v19 = vpop.f32.mrb[208].mxu1 }
0x155c   : > { %v5380_v41 = vadd.f32 %v7463_v19, %v9481_v5  ;;  %v5371_v60 = vpop.f32.mrb[209].mxu1 }
0x155d   : > { %v5372_v58 = vadd.f32 %v9481_v5, %v5371_v60  ;;  %v7464_v32 = vpop.f32.mrb[210].mxu1 }
0x155e   : > { %v5756_v0 = vmax.f32 %v5380_v41, 0.0  ;;  %v5383_v21 = vadd.f32 %v7464_v32, %v9481_v5  ;;  %v5374_v40 = vpop.f32.mrb[211].mxu1 }
0x155f   : > { %v5754_v46 = vmax.f32 %v5372_v58, 0.0  ;;  %v5375_v1 = vadd.f32 %v9481_v5, %v5374_v40 }
0x1560   : > { %v9689_v11 = vadd.f32 %v9625_v24, %v5756_v0  ;;  %v5757_v18 = vmax.f32 %v5383_v21, 0.0 }
0x1561   : > { %v9692_v26 = vadd.f32 %v9628_v2, %v5754_v46  ;;  %v5755_v51 = vmax.f32 %v5375_v1, 0.0 }
0x1562   : > { %v9695_v42 = vadd.f32 %v9631_v53, %v5757_v18 }
0x1563   : > { %v9698_v14 = vadd.f32 %v9634_v62, %v5755_v51  ;;  %v7467_v39 = vpop.f32.mrb[212].mxu1 }
0x1564   : > { %v5396_v34 = vadd.f32 %v7467_v39, %v9481_v5  ;;  %v5387_v31 = vpop.f32.mrb[213].mxu1 }
0x1565   : > { %v5388_v48 = vadd.f32 %v9481_v5, %v5387_v31  ;;  %v7468_v45 = vpop.f32.mrb[214].mxu1 }
0x1566   : > { %v5760_v24 = vmax.f32 %v5396_v34, 0.0  ;;  %v5399_v47 = vadd.f32 %v7468_v45, %v9481_v5  ;;  %v5390_v43 = vpop.f32.mrb[215].mxu1 }
0x1567   : > { %v5758_v2 = vmax.f32 %v5388_v48, 0.0  ;;  %v5391_v6 = vadd.f32 %v9481_v5, %v5390_v43 }
0x1568   : > { %v9705_v53 = vadd.f32 %v9641_v27, %v5760_v24  ;;  %v5761_v25 = vmax.f32 %v5399_v47, 0.0 }
0x1569   : > { %v9708_v62 = vadd.f32 %v9644_v57, %v5758_v2  ;;  %v5759_v52 = vmax.f32 %v5391_v6, 0.0 }
0x156a   : > { %v9711_v23 = vadd.f32 %v9647_v35, %v5761_v25 }
0x156b   : > { %v9714_v50 = vadd.f32 %v9650_v4, %v5759_v52  ;;  %v7471_v36 = vpop.f32.mrb[216].mxu1 }
0x156c   : > { %v5412_v17 = vadd.f32 %v7471_v36, %v9481_v5  ;;  %v5403_v44 = vpop.f32.mrb[217].mxu1 }
0x156d   : > { %v5404_v56 = vadd.f32 %v9481_v5, %v5403_v44  ;;  %v7472_v54 = vpop.f32.mrb[218].mxu1 }
0x156e   : > { %v5764_v27 = vmax.f32 %v5412_v17, 0.0  ;;  %v5415_v8 = vadd.f32 %v7472_v54, %v9481_v5  ;;  %v5406_v30 = vpop.f32.mrb[219].mxu1 }
0x156f   : > { %v5762_v57 = vmax.f32 %v5404_v56, 0.0  ;;  %v5407_v63 = vadd.f32 %v9481_v5, %v5406_v30 }
0x1570   : > { %v9721_v35 = vadd.f32 %v9657_v28, %v5764_v27  ;;  %v5765_v59 = vmax.f32 %v5415_v8, 0.0 }
0x1571   : > { %v9724_v4 = vadd.f32 %v9660_v22, %v5762_v57  ;;  %v5763_v16 = vmax.f32 %v5407_v63, 0.0 }
0x1572   : > { %v9727_v7 = vadd.f32 %v9663_v38, %v5765_v59 }
0x1573   : > { %v9730_v55 = vadd.f32 %v9666_v29, %v5763_v16  ;;  %v7475_v33 = vpop.f32.mrb[220].mxu1 }
0x1574   : > { %v5428_v9 = vadd.f32 %v7475_v33, %v9481_v5  ;;  %v5419_v49 = vpop.f32.mrb[221].mxu1 }
0x1575   : > { %v5420_v61 = vadd.f32 %v9481_v5, %v5419_v49  ;;  %v7476_v10 = vpop.f32.mrb[222].mxu1 }
0x1576   : > { %v5768_v28 = vmax.f32 %v5428_v9, 0.0  ;;  %v5431_v12 = vadd.f32 %v7476_v10, %v9481_v5  ;;  %v5422_v19 = vpop.f32.mrb[223].mxu1 }
0x1577   : > { %v5766_v22 = vmax.f32 %v5420_v61, 0.0  ;;  %v5423_v41 = vadd.f32 %v9481_v5, %v5422_v19 }
0x1578   : > { %v9737_v38 = vadd.f32 %v9673_v3, %v5768_v28  ;;  %v5769_v60 = vmax.f32 %v5431_v12, 0.0 }
0x1579   : > { %v9740_v29 = vadd.f32 %v9676_v15, %v5766_v22  ;;  %v5767_v58 = vmax.f32 %v5423_v41, 0.0 }
0x157a   : > { %v9743_v32 = vadd.f32 %v9679_v37, %v5769_v60 }
0x157b   : > { %v9746_v0 = vadd.f32 %v9682_v13, %v5767_v58  ;;  %v7479_v21 = vpop.f32.mrb[224].mxu1 }
0x157c   : > { %v5444_v40 = vadd.f32 %v7479_v21, %v9481_v5  ;;  %v5435_v46 = vpop.f32.mrb[225].mxu1 }
0x157d   : > { %v5436_v1 = vadd.f32 %v9481_v5, %v5435_v46  ;;  %v7480_v18 = vpop.f32.mrb[226].mxu1 }
0x157e   : > { %v5772_v3 = vmax.f32 %v5444_v40, 0.0  ;;  %v5447_v51 = vadd.f32 %v7480_v18, %v9481_v5  ;;  %v5438_v39 = vpop.f32.mrb[227].mxu1 }
0x157f   : > { %v5770_v15 = vmax.f32 %v5436_v1, 0.0  ;;  %v5439_v34 = vadd.f32 %v9481_v5, %v5438_v39 }
0x1580   : > { %v9753_v37 = vadd.f32 %v9689_v11, %v5772_v3  ;;  %v5773_v31 = vmax.f32 %v5447_v51, 0.0 }
0x1581   : > { %v9756_v13 = vadd.f32 %v9692_v26, %v5770_v15  ;;  %v5771_v48 = vmax.f32 %v5439_v34, 0.0 }
0x1582   : > { %v9759_v45 = vadd.f32 %v9695_v42, %v5773_v31 }
0x1583   : > { %v9762_v24 = vadd.f32 %v9698_v14, %v5771_v48  ;;  %v7483_v47 = vpop.f32.mrb[228].mxu1 }
0x1584   : > { %v5460_v43 = vadd.f32 %v7483_v47, %v9481_v5  ;;  %v5451_v2 = vpop.f32.mrb[229].mxu1 }
0x1585   : > { %v5452_v6 = vadd.f32 %v9481_v5, %v5451_v2  ;;  %v7484_v25 = vpop.f32.mrb[230].mxu1 }
0x1586   : > { %v5776_v11 = vmax.f32 %v5460_v43, 0.0  ;;  %v5463_v52 = vadd.f32 %v7484_v25, %v9481_v5  ;;  %v5454_v36 = vpop.f32.mrb[231].mxu1 }
0x1587   : > { %v5774_v26 = vmax.f32 %v5452_v6, 0.0  ;;  %v5455_v17 = vadd.f32 %v9481_v5, %v5454_v36 }
0x1588   : > { %v9769_v42 = vadd.f32 %v9705_v53, %v5776_v11  ;;  %v5777_v44 = vmax.f32 %v5463_v52, 0.0 }
0x1589   : > { %v9772_v14 = vadd.f32 %v9708_v62, %v5774_v26  ;;  %v5775_v56 = vmax.f32 %v5455_v17, 0.0 }
0x158a   : > { %v9775_v54 = vadd.f32 %v9711_v23, %v5777_v44 }
0x158b   : > { %v9778_v27 = vadd.f32 %v9714_v50, %v5775_v56  ;;  %v7487_v8 = vpop.f32.mrb[232].mxu1 }
0x158c   : > { %v5476_v30 = vadd.f32 %v7487_v8, %v9481_v5  ;;  %v5467_v57 = vpop.f32.mrb[233].mxu1 }
0x158d   : > { %v5468_v63 = vadd.f32 %v9481_v5, %v5467_v57  ;;  %v7488_v59 = vpop.f32.mrb[234].mxu1 }
0x158e   : > { %v5780_v53 = vmax.f32 %v5476_v30, 0.0  ;;  %v5479_v16 = vadd.f32 %v7488_v59, %v9481_v5  ;;  %v5470_v33 = vpop.f32.mrb[235].mxu1 }
0x158f   : > { %v5778_v62 = vmax.f32 %v5468_v63, 0.0  ;;  %v5471_v9 = vadd.f32 %v9481_v5, %v5470_v33 }
0x1590   : > { %v9785_v23 = vadd.f32 %v9721_v35, %v5780_v53  ;;  %v5781_v49 = vmax.f32 %v5479_v16, 0.0 }
0x1591   : > { %v9788_v50 = vadd.f32 %v9724_v4, %v5778_v62  ;;  %v5779_v61 = vmax.f32 %v5471_v9, 0.0 }
0x1592   : > { %v9791_v10 = vadd.f32 %v9727_v7, %v5781_v49 }
0x1593   : > { %v9794_v28 = vadd.f32 %v9730_v55, %v5779_v61  ;;  %v7491_v12 = vpop.f32.mrb[236].mxu1 }
0x1594   : > { %v5492_v19 = vadd.f32 %v7491_v12, %v9481_v5  ;;  %v5483_v22 = vpop.f32.mrb[237].mxu1 }
0x1595   : > { %v5484_v41 = vadd.f32 %v9481_v5, %v5483_v22  ;;  %v7492_v60 = vpop.f32.mrb[238].mxu1 }
0x1596   : > { %v5784_v35 = vmax.f32 %v5492_v19, 0.0  ;;  %v5495_v58 = vadd.f32 %v7492_v60, %v9481_v5  ;;  %v5486_v21 = vpop.f32.mrb[239].mxu1 }
0x1597   : > { %v5782_v4 = vmax.f32 %v5484_v41, 0.0  ;;  %v5487_v40 = vadd.f32 %v9481_v5, %v5486_v21 }
0x1598   : > { %v9801_v7 = vadd.f32 %v9737_v38, %v5784_v35  ;;  %v5785_v46 = vmax.f32 %v5495_v58, 0.0 }
0x1599   : > { %v9804_v55 = vadd.f32 %v9740_v29, %v5782_v4  ;;  %v5783_v1 = vmax.f32 %v5487_v40, 0.0 }
0x159a   : > { %v9807_v18 = vadd.f32 %v9743_v32, %v5785_v46 }
0x159b   : > { %v9810_v3 = vadd.f32 %v9746_v0, %v5783_v1  ;;  %v7495_v51 = vpop.f32.mrb[240].mxu1 }
0x159c   : > { %v5508_v39 = vadd.f32 %v7495_v51, %v9481_v5  ;;  %v5499_v15 = vpop.f32.mrb[241].mxu1 }
0x159d   : > { %v5500_v34 = vadd.f32 %v9481_v5, %v5499_v15  ;;  %v7496_v31 = vpop.f32.mrb[242].mxu1 }
0x159e   : > { %v5788_v38 = vmax.f32 %v5508_v39, 0.0  ;;  %v5511_v48 = vadd.f32 %v7496_v31, %v9481_v5  ;;  %v5502_v47 = vpop.f32.mrb[243].mxu1 }
0x159f   : > { %v5786_v29 = vmax.f32 %v5500_v34, 0.0  ;;  %v5503_v43 = vadd.f32 %v9481_v5, %v5502_v47  ;;  %v7375_v2 = vpop.f32.mrb[0].mxu0 }
0x15a0   : > { %v9817_v32 = vadd.f32 %v9753_v37, %v5788_v38  ;;  %v5789_v0 = vmax.f32 %v5511_v48, 0.0  ;;  %v4555_v6 = vadd.f32 %v9417_v20, %v7375_v2  ;;  %v4546_v25 = vpop.f32.mrb[1].mxu0 }
0x15a1   : > { %v9821_v11 = vadd.f32 %v9756_v13, %v5786_v29  ;;  %v5787_v52 = vmax.f32 %v5503_v43, 0.0  ;;  %v4547_v36 = vadd.f32 %v9417_v20, %v4546_v25  ;;  %v7376_v26 = vpop.f32.mrb[2].mxu0 }
0x15a2   : > { %v9825_v17 = vadd.f32 %v9759_v45, %v5789_v0  ;;  %v4558_v44 = vadd.f32 %v9417_v20, %v7376_v26  ;;  %v4549_v56 = vpop.f32.mrb[3].mxu0  ;;  %v4739_v57 = vmax.f32 %v4555_v6, 0.0 }
0x15a3   : > { %v9829_v37 = vadd.f32 %v9762_v24, %v5787_v52  ;;  %v4550_v8 = vadd.f32 %v9417_v20, %v4549_v56  ;;  %v7499_v30 = vpop.f32.mrb[244].mxu1  ;;  %v4737_v53 = vmax.f32 %v4547_v36, 0.0 }
0x15a4   : > { %v4740_v63 = vmax.f32 %v4558_v44, 0.0  ;;  %v5524_v13 = vadd.f32 %v7499_v30, %v9481_v5  ;;  %v5515_v59 = vpop.f32.mrb[245].mxu1 }
0x15a5   : > { %v4738_v16 = vmax.f32 %v4550_v8, 0.0  ;;  %v5516_v33 = vadd.f32 %v9481_v5, %v5515_v59  ;;  %v7500_v45 = vpop.f32.mrb[246].mxu1 }
0x15a6   : > { %v4818_v62 = vpack.c.bf16 %v4740_v63, %v4739_v57  ;;  %v5792_v9 = vmax.f32 %v5524_v13, 0.0  ;;  %v5527_v49 = vadd.f32 %v7500_v45, %v9481_v5  ;;  %v5518_v61 = vpop.f32.mrb[247].mxu1 }
0x15a7   : > { %v4817_v24 = vpack.c.bf16 %v4738_v16, %v4737_v53  ;;  %v5790_v12 = vmax.f32 %v5516_v33, 0.0  ;;  %v5519_v19 = vadd.f32 %v9481_v5, %v5518_v61  ;;  %v7379_v22 = vpop.f32.mrb[4].mxu0 }
0x15a8   : > { %v9837_v41 = vadd.f32 %v9769_v42, %v5792_v9  ;;  %v5793_v60 = vmax.f32 %v5527_v49, 0.0  ;;  %v4571_v35 = vadd.f32 %v9417_v20, %v7379_v22  ;;  %v4562_v58 = vpop.f32.mrb[5].mxu0  ;;  %v9851_v42 = vld [vmem:[%s10088_s4] ss:$0 sm:$0xff] }
0x15a9   : > { %v9841_v21 = vadd.f32 %v9772_v14, %v5790_v12  ;;  %v5791_v4 = vmax.f32 %v5519_v19, 0.0  ;;  %v4563_v40 = vadd.f32 %v9417_v20, %v4562_v58  ;;  %v7380_v46 = vpop.f32.mrb[6].mxu0  ;;  %7525 = vmatprep.mubr.msk.bf16.mxu1 %vm4864_vm1, %v4817_v24 }
0x15aa   : > { %v9846_v1 = vadd.f32 %v9775_v54, %v5793_v60  ;;  %v4574_v51 = vadd.f32 %v9851_v42, %v7380_v46  ;;  %v4565_v39 = vpop.f32.mrb[7].mxu0  ;;  %7526 = vmatmul.mubr.msk.bf16.gmra.mrb[16].mxu1 %vm4864_vm1, %v4818_v62  ;;  %v4743_v34 = vmax.f32 %v4571_v35, 0.0 }
0x15ab   : > { %v9856_v14 = vadd.f32 %v9778_v27, %v5791_v4  ;;  %v4566_v20 = vadd.f32 %v9851_v42, %v4565_v39  ;;  %v7503_v15 = vpop.f32.mrb[248].mxu1  ;;  %v4741_v48 = vmax.f32 %v4563_v40, 0.0 }
0x15ac   : > { %v4744_v31 = vmax.f32 %v4574_v51, 0.0  ;;  %v5540_v54 = vadd.f32 %v7503_v15, %v9481_v5  ;;  %v5531_v38 = vpop.f32.mrb[249].mxu1 }
0x15ad   : > { %v4742_v47 = vmax.f32 %v4566_v20, 0.0  ;;  %v5532_v29 = vadd.f32 %v9481_v5, %v5531_v38  ;;  %v7504_v43 = vpop.f32.mrb[250].mxu1 }
0x15ae   : > { %v4820_v2 = vpack.c.bf16 %v4744_v31, %v4743_v34  ;;  %v5796_v0 = vmax.f32 %v5540_v54, 0.0  ;;  %v5543_v6 = vadd.f32 %v7504_v43, %v9481_v5  ;;  %v5534_v25 = vpop.f32.mrb[251].mxu1 }
0x15af   : > { %v4819_v27 = vpack.c.bf16 %v4742_v47, %v4741_v48  ;;  %v5794_v52 = vmax.f32 %v5532_v29, 0.0  ;;  %v5535_v36 = vadd.f32 %v9481_v5, %v5534_v25  ;;  %v7383_v26 = vpop.f32.mrb[8].mxu0 }
0x15b0   : > { %v9864_v44 = vadd.f32 %v9785_v23, %v5796_v0  ;;  %v5797_v56 = vmax.f32 %v5543_v6, 0.0  ;;  %v4587_v8 = vadd.f32 %v9851_v42, %v7383_v26  ;;  %v4578_v30 = vpop.f32.mrb[9].mxu0 }
0x15b1   : > { %v9868_v57 = vadd.f32 %v9788_v50, %v5794_v52  ;;  %v5795_v63 = vmax.f32 %v5535_v36, 0.0  ;;  %v4579_v13 = vadd.f32 %v9851_v42, %v4578_v30  ;;  %v7384_v59 = vpop.f32.mrb[10].mxu0  ;;  %7529 = vmatprep.mubr.msk.bf16.mxu1 %vm4864_vm1, %v4819_v27 }
0x15b2   : > { %v9873_v53 = vadd.f32 %v9791_v10, %v5797_v56  ;;  %v4590_v16 = vadd.f32 %v9851_v42, %v7384_v59  ;;  %v4581_v23 = vpop.f32.mrb[11].mxu0  ;;  %7530 = vmatmul.mubr.msk.bf16.gmra.mrb[20].mxu1 %vm4864_vm1, %v4820_v2  ;;  %v4747_v62 = vmax.f32 %v4587_v8, 0.0 }
0x15b3   : > { %v9878_v33 = vadd.f32 %v9794_v28, %v5795_v63  ;;  %v4582_v50 = vadd.f32 %v9851_v42, %v4581_v23  ;;  %v7507_v45 = vpop.f32.mrb[252].mxu1  ;;  %v4745_v24 = vmax.f32 %v4579_v13, 0.0 }
0x15b4   : > { %v4748_v9 = vmax.f32 %v4590_v16, 0.0  ;;  %v5556_v49 = vadd.f32 %v7507_v45, %v9481_v5  ;;  %v5547_v61 = vpop.f32.mrb[253].mxu1 }
0x15b5   : > { %v4746_v12 = vmax.f32 %v4582_v50, 0.0  ;;  %v5548_v10 = vadd.f32 %v9481_v5, %v5547_v61  ;;  %v7508_v19 = vpop.f32.mrb[254].mxu1 }
0x15b6   : > { %v4822_v22 = vpack.c.bf16 %v4748_v9, %v4747_v62  ;;  %v5800_v60 = vmax.f32 %v5556_v49, 0.0  ;;  %v5559_v35 = vadd.f32 %v7508_v19, %v9481_v5  ;;  %v5550_v58 = vpop.f32.mrb[255].mxu1 }
0x15b7   : > { %v4821_v28 = vpack.c.bf16 %v4746_v12, %v4745_v24  ;;  %v5798_v4 = vmax.f32 %v5548_v10, 0.0  ;;  %v5551_v40 = vadd.f32 %v9481_v5, %v5550_v58  ;;  %v7387_v46 = vpop.f32.mrb[12].mxu0 }
0x15b8   : > { %v9886_v51 = vadd.f32 %v9801_v7, %v5800_v60  ;;  %v5801_v39 = vmax.f32 %v5559_v35, 0.0  ;;  %v4603_v20 = vadd.f32 %v9851_v42, %v7387_v46  ;;  %v4594_v15 = vpop.f32.mrb[13].mxu0 }
0x15b9   : > { %v9890_v34 = vadd.f32 %v9804_v55, %v5798_v4  ;;  %v5799_v31 = vmax.f32 %v5551_v40, 0.0  ;;  %v4595_v54 = vadd.f32 %v9851_v42, %v4594_v15  ;;  %v7388_v38 = vpop.f32.mrb[14].mxu0  ;;  %7533 = vmatprep.mubr.msk.bf16.mxu1 %vm4864_vm1, %v4821_v28  ;;  %v9940_v4 = vld [vmem:[%s10090_s6] ss:$0 sm:$0xff] }
0x15ba   : > { %v9895_v48 = vadd.f32 %v9807_v18, %v5801_v39  ;;  %v4606_v47 = vadd.f32 %v9851_v42, %v7388_v38  ;;  %v4597_v7 = vpop.f32.mrb[15].mxu0  ;;  %7534 = vmatmul.mubr.msk.bf16.gmra.mrb[24].mxu1 %vm4864_vm1, %v4822_v22  ;;  %v4751_v2 = vmax.f32 %v4603_v20, 0.0 }
0x15bb   : > { %v9900_v29 = vadd.f32 %v9810_v3, %v5799_v31  ;;  %v4598_v55 = vadd.f32 %v9851_v42, %v4597_v7  ;;  %v7511_v43 = vpop.f32.mrb[0].mxu1  ;;  %v4749_v27 = vmax.f32 %v4595_v54, 0.0 }
0x15bc   : > { %v4752_v0 = vmax.f32 %v4606_v47, 0.0  ;;  %v5572_v6 = vadd.f32 %v7511_v43, %v9481_v5  ;;  %v5563_v25 = vpop.f32.mrb[1].mxu1 }
0x15bd   : > { %v4750_v52 = vmax.f32 %v4598_v55, 0.0  ;;  %v5564_v18 = vadd.f32 %v9481_v5, %v5563_v25  ;;  %v7512_v36 = vpop.f32.mrb[2].mxu1 }
0x15be   : > { %v4824_v26 = vpack.c.bf16 %v4752_v0, %v4751_v2  ;;  %v5804_v56 = vmax.f32 %v5572_v6, 0.0  ;;  %v5575_v8 = vadd.f32 %v7512_v36, %v9481_v5  ;;  %v5566_v30 = vpop.f32.mrb[3].mxu1 }
0x15bf   : > { %v4823_v3 = vpack.c.bf16 %v4750_v52, %v4749_v27  ;;  %v5802_v63 = vmax.f32 %v5564_v18, 0.0  ;;  %v5567_v42 = vadd.f32 %v9481_v5, %v5566_v30 }
0x15c0   : > { %v9908_v13 = vadd.f32 %v9817_v32, %v5804_v56  ;;  %v5805_v59 = vmax.f32 %v5575_v8, 0.0 }
0x15c1   : > { %v9911_v16 = vadd.f32 %v9821_v11, %v5802_v63  ;;  %v5803_v23 = vmax.f32 %v5567_v42, 0.0  ;;  %7537 = vmatprep.mubr.msk.bf16.mxu1 %vm4864_vm1, %v4823_v3 }
0x15c2   : > { %v9915_v50 = vadd.f32 %v9825_v17, %v5805_v59  ;;  %7538 = vmatmul.mubr.msk.bf16.gmra.mrb[28].mxu1 %vm4864_vm1, %v4824_v26 }
0x15c3   : > { %v9919_v45 = vadd.f32 %v9829_v37, %v5803_v23  ;;  %v7515_v62 = vpop.f32.mrb[4].mxu1 }
0x15c4   : > { %v5588_v9 = vadd.f32 %v7515_v62, %v9481_v5  ;;  %v5579_v32 = vpop.f32.mrb[5].mxu1 }
0x15c5   : > { %v5580_v49 = vadd.f32 %v9481_v5, %v5579_v32  ;;  %v7516_v61 = vpop.f32.mrb[6].mxu1 }
0x15c6   : > { %v5808_v11 = vmax.f32 %v5588_v9, 0.0  ;;  %v5591_v24 = vadd.f32 %v7516_v61, %v9481_v5  ;;  %v5582_v12 = vpop.f32.mrb[7].mxu1 }
0x15c7   : > { %v5806_v10 = vmax.f32 %v5580_v49, 0.0  ;;  %v5583_v17 = vadd.f32 %v9481_v5, %v5582_v12 }
0x15c8   : > { %v9926_v19 = vadd.f32 %v9837_v41, %v5808_v11  ;;  %v5809_v22 = vmax.f32 %v5591_v24, 0.0 }
0x15c9   : > { %v9929_v37 = vadd.f32 %v9841_v21, %v5806_v10  ;;  %v5807_v60 = vmax.f32 %v5583_v17, 0.0 }
0x15ca   : > { %v9932_v35 = vadd.f32 %v9846_v1, %v5809_v22 }
0x15cb   : > { %v9935_v58 = vadd.f32 %v9856_v14, %v5807_v60  ;;  %v7519_v28 = vpop.f32.mrb[8].mxu1 }
0x15cc   : > { %v5604_v5 = vadd.f32 %v9940_v4, %v7519_v28  ;;  %v5595_v41 = vpop.f32.mrb[9].mxu1 }
0x15cd   : > { %v5596_v40 = vadd.f32 %v9940_v4, %v5595_v41  ;;  %v7520_v21 = vpop.f32.mrb[10].mxu1 }
0x15ce   : > { %v5812_v46 = vmax.f32 %v5604_v5, 0.0  ;;  %v5607_v39 = vadd.f32 %v9940_v4, %v7520_v21  ;;  %v5598_v1 = vpop.f32.mrb[11].mxu1 }
0x15cf   : > { %v5810_v20 = vmax.f32 %v5596_v40, 0.0  ;;  %v5599_v14 = vadd.f32 %v9940_v4, %v5598_v1 }
0x15d0   : > { %v9947_v15 = vadd.f32 %v9864_v44, %v5812_v46  ;;  %v5813_v31 = vmax.f32 %v5607_v39, 0.0 }
0x15d1   : > { %v9950_v54 = vadd.f32 %v9868_v57, %v5810_v20  ;;  %v5811_v38 = vmax.f32 %v5599_v14, 0.0 }
0x15d2   : > { %v9953_v47 = vadd.f32 %v9873_v53, %v5813_v31 }
0x15d3   : > { %v9956_v7 = vadd.f32 %v9878_v33, %v5811_v38  ;;  %v7523_v55 = vpop.f32.mrb[12].mxu1 }
0x15d4   : > { %v5620_v43 = vadd.f32 %v9940_v4, %v7523_v55  ;;  %v5611_v2 = vpop.f32.mrb[13].mxu1 }
0x15d5   : > { %v5612_v0 = vadd.f32 %v9940_v4, %v5611_v2  ;;  %v7524_v6 = vpop.f32.mrb[14].mxu1 }
0x15d6   : > { %v5816_v44 = vmax.f32 %v5620_v43, 0.0  ;;  %v5623_v25 = vadd.f32 %v9940_v4, %v7524_v6  ;;  %v5614_v27 = vpop.f32.mrb[15].mxu1 }
0x15d7   : > { %v5814_v57 = vmax.f32 %v5612_v0, 0.0  ;;  %v5615_v52 = vadd.f32 %v9940_v4, %v5614_v27 }
0x15d8   : > { %v9963_v53 = vadd.f32 %v9886_v51, %v5816_v44  ;;  %v5817_v18 = vmax.f32 %v5623_v25, 0.0 }
0x15d9   : > { %v9966_v33 = vadd.f32 %v9890_v34, %v5814_v57  ;;  %v5815_v36 = vmax.f32 %v5615_v52, 0.0 }
0x15da   : > { %v9969_v26 = vadd.f32 %v9895_v48, %v5817_v18  ;;  %v9981_v48 = vld [vmem:[%s10091_s7] ss:$0 sm:$0xff] }
0x15db   : > { %v9972_v56 = vadd.f32 %v9900_v29, %v5815_v36 }
0x167d   : > { %v7527_v8 = vpop.f32.mrb[16].mxu1 }
0x167e   : > { %v5636_v30 = vadd.f32 %v9940_v4, %v7527_v8  ;;  %v5627_v3 = vpop.f32.mrb[17].mxu1 }
0x167f   : > { %v5628_v63 = vadd.f32 %v9940_v4, %v5627_v3  ;;  %v7528_v42 = vpop.f32.mrb[18].mxu1 }
0x1680   : > { %v5820_v51 = vmax.f32 %v5636_v30, 0.0  ;;  %v5639_v59 = vadd.f32 %v9940_v4, %v7528_v42  ;;  %v5630_v23 = vpop.f32.mrb[19].mxu1 }
0x1681   : > { %v5818_v34 = vmax.f32 %v5628_v63, 0.0  ;;  %v5631_v62 = vadd.f32 %v9940_v4, %v5630_v23 }
0x1682   : > { %v5948_v29 = vadd.f32 %v9908_v13, %v5820_v51  ;;  %v5821_v9 = vmax.f32 %v5639_v59, 0.0 }
0x1683   : > { %v5946_v32 = vadd.f32 %v9911_v16, %v5818_v34  ;;  %v5819_v49 = vmax.f32 %v5631_v62, 0.0 }
0x1684   : > { %v5949_v61 = vadd.f32 %v9915_v50, %v5821_v9  ;;  %v5971_v11 = vmul.f32 %v9981_v48, %v5948_v29 }
0x1685   : > { %v5947_v24 = vadd.f32 %v9919_v45, %v5819_v49  ;;  %v7531_v12 = vpop.f32.mrb[20].mxu1  ;;  %v5969_v13 = vmul.f32 %v9981_v48, %v5946_v32 }
0x1686   : > { %v5652_v10 = vadd.f32 %v9940_v4, %v7531_v12  ;;  %v5643_v17 = vpop.f32.mrb[21].mxu1  ;;  %v5991_v22 = vsel %vm4864_vm1, %v5971_v11, 0.0  ;;  %v5972_v60 = vmul.f32 %v9981_v48, %v5949_v61 }
0x1687   : > { %v5644_v28 = vadd.f32 %v9940_v4, %v5643_v17  ;;  %5992 = vadd.xlane.f32.xlu0 %v5991_v22  ;;  %v7532_v16 = vpop.f32.mrb[22].mxu1  ;;  %v5970_v40 = vmul.f32 %v9981_v48, %v5947_v24  ;;  %v5985_v20 = vsel %vm4864_vm1, %v5969_v13, 0.0 }
0x1688   : > { %v5824_v5 = vmax.f32 %v5652_v10, 0.0  ;;  %v5655_v50 = vadd.f32 %v9940_v4, %v7532_v16  ;;  %v5646_v41 = vpop.f32.mrb[23].mxu1  ;;  %v5994_v45 = vsel %vm4864_vm1, %v5972_v60, 0.0 }
0x1689   : > { %v5822_v21 = vmax.f32 %v5644_v28, 0.0  ;;  %v5647_v46 = vadd.f32 %v9940_v4, %v5646_v41  ;;  %5995 = vadd.xlane.f32.xlu1 %v5994_v45  ;;  %v5988_v55 = vsel %vm4864_vm1, %v5970_v40, 0.0 }
0x168a   : > { %v5952_v39 = vadd.f32 %v9926_v19, %v5824_v5  ;;  %v5825_v1 = vmax.f32 %v5655_v50, 0.0 }
0x168b   : > { %v5950_v14 = vadd.f32 %v9929_v37, %v5822_v21  ;;  %v5823_v31 = vmax.f32 %v5647_v46, 0.0  ;;  %5986 = vadd.xlane.f32.xlu0 %v5985_v20 }
0x168c   : > { %v5953_v38 = vadd.f32 %v9932_v35, %v5825_v1  ;;  %v5975_v43 = vmul.f32 %v9981_v48, %v5952_v39  ;;  %v6036_v1 = vlaneseq }
0x168d   : > { %v5951_v2 = vadd.f32 %v9935_v58, %v5823_v31  ;;  %v7535_v0 = vpop.f32.mrb[24].mxu1  ;;  %5989 = vadd.xlane.f32.xlu1 %v5988_v55  ;;  %v5973_v37 = vmul.f32 %v9981_v48, %v5950_v14  ;;  %v6033_v14 = vld [vmem:[#allocation3] sm:$0x1] }
0x168e   : > { %v5668_v6 = vadd.f32 %v9940_v4, %v7535_v0  ;;  %v5659_v19 = vpop.f32.mrb[25].mxu1  ;;  %v6003_v44 = vsel %vm4864_vm1, %v5975_v43, 0.0  ;;  %v5976_v25 = vmul.f32 %v9981_v48, %v5953_v38  ;;  %v6037_v20 = vshrl.u32 %v6036_v1, 7 }
0x168f   : > { %v5660_v27 = vadd.f32 %v9940_v4, %v5659_v19  ;;  %v7536_v35 = vpop.f32.mrb[26].mxu1  ;;  %6004 = vadd.xlane.f32.xlu0 %v6003_v44  ;;  %v5974_v36 = vmul.f32 %v9981_v48, %v5951_v2  ;;  %v5997_v42 = vsel %vm4864_vm1, %v5973_v37, 0.0  ;;  %v6034_v31 = vmul.f32 9.0, %v6033_v14 }
0x1690   : > { %v5828_v57 = vmax.f32 %v5668_v6, 0.0  ;;  %v5671_v52 = vadd.f32 %v9940_v4, %v7536_v35  ;;  %v5662_v18 = vpop.f32.mrb[27].mxu1  ;;  %v6006_v58 = vsel %vm4864_vm1, %v5976_v25, 0.0  ;;  %v6038_v38 = vsub.s32 0, %v6037_v20 }
0x1691   : > { %v5826_v8 = vmax.f32 %v5660_v27, 0.0  ;;  %v5663_v30 = vadd.f32 %v9940_v4, %v5662_v18  ;;  %6007 = vadd.xlane.f32.xlu1 %v6006_v58  ;;  %v6000_v34 = vsel %vm4864_vm1, %v5974_v36, 0.0 }
0x1692   : > { %v5956_v3 = vadd.f32 %v9947_v15, %v5828_v57  ;;  %v5829_v63 = vmax.f32 %v5671_v52, 0.0  ;;  %v6039_v55 = vrot.slane %v6034_v31, %v6038_v38 }
0x1693   : > { %v5954_v51 = vadd.f32 %v9950_v54, %v5826_v8  ;;  %v5827_v59 = vmax.f32 %v5663_v30, 0.0  ;;  %5998 = vadd.xlane.f32.xlu0 %v5997_v42 }
0x1694   : > { %v5957_v23 = vadd.f32 %v9953_v47, %v5829_v63  ;;  %v5979_v62 = vmul.f32 %v9981_v48, %v5956_v3 }
0x1695   : > { %v5955_v29 = vadd.f32 %v9956_v7, %v5827_v59  ;;  %v7539_v9 = vpop.f32.mrb[28].mxu1  ;;  %6001 = vadd.xlane.f32.xlu1 %v6000_v34  ;;  %v5977_v54 = vmul.f32 %v9981_v48, %v5954_v51 }
0x1696   : > { %v5684_v32 = vadd.f32 %v9940_v4, %v7539_v9  ;;  %v5675_v15 = vpop.f32.mrb[29].mxu1  ;;  %v6015_v49 = vsel %vm4864_vm1, %v5979_v62, 0.0  ;;  %v5980_v61 = vmul.f32 %v9981_v48, %v5957_v23 }
0x1697   : > { %v5676_v11 = vadd.f32 %v9940_v4, %v5675_v15  ;;  %v7540_v47 = vpop.f32.mrb[30].mxu1  ;;  %6016 = vadd.xlane.f32.xlu0 %v6015_v49  ;;  %v5978_v17 = vmul.f32 %v9981_v48, %v5955_v29  ;;  %v6009_v16 = vsel %vm4864_vm1, %v5977_v54, 0.0 }
0x1698   : > { %v5832_v24 = vmax.f32 %v5684_v32, 0.0  ;;  %v5687_v12 = vadd.f32 %v9940_v4, %v7540_v47  ;;  %v5678_v10 = vpop.f32.mrb[31].mxu1  ;;  %v6018_v7 = vsel %vm4864_vm1, %v5980_v61, 0.0 }
0x1699   : > { %v5830_v22 = vmax.f32 %v5676_v11, 0.0  ;;  %v5679_v60 = vadd.f32 %v9940_v4, %v5678_v10  ;;  %6019 = vadd.xlane.f32.xlu1 %v6018_v7  ;;  %v6012_v45 = vsel %vm4864_vm1, %v5978_v17, 0.0 }
0x169a   : > { %v5960_v13 = vadd.f32 %v9963_v53, %v5832_v24  ;;  %v5833_v28 = vmax.f32 %v5687_v12, 0.0 }
0x169b   : > { %v5958_v5 = vadd.f32 %v9966_v33, %v5830_v22  ;;  %v5831_v50 = vmax.f32 %v5679_v60, 0.0  ;;  %6010 = vadd.xlane.f32.xlu0 %v6009_v16 }
0x169c   : > { %v5961_v41 = vadd.f32 %v9969_v26, %v5833_v28  ;;  %v5983_v46 = vmul.f32 %v9981_v48, %v5960_v13 }
0x169d   : > { %v5959_v40 = vadd.f32 %v9972_v56, %v5831_v50  ;;  %6013 = vadd.xlane.f32.xlu1 %v6012_v45  ;;  %v5981_v21 = vmul.f32 %v9981_v48, %v5958_v5 }
0x169e   : > { %v5984_v39 = vmul.f32 %v9981_v48, %v5961_v41  ;;  %v6027_v26 = vsel %vm4864_vm1, %v5983_v46, 0.0 }
0x169f   : > { %v6021_v4 = vsel %vm4864_vm1, %v5981_v21, 0.0  ;;  %v5982_v53 = vmul.f32 %v9981_v48, %v5959_v40 }
0x16a0   : > { %6022 = vadd.xlane.f32.xlu0 %v6021_v4  ;;  %v6030_v56 = vsel %vm4864_vm1, %v5984_v39, 0.0 }
0x16a1   : > { %v6024_v33 = vsel %vm4864_vm1, %v5982_v53, 0.0 }
0x16a2   : > { %6025 = vadd.xlane.f32.xlu1 %v6024_v33 }
0x16a4   : > { %6028 = vadd.xlane.f32.xlu0 %v6027_v26 }
0x16a6   : > { %6031 = vadd.xlane.f32.xlu1 %v6030_v56 }
0x1714   : > { %v5993_v48 = vpop.xlane.xlu0 %5992 }
0x1715   : > { %v6043_v43 = vadd.f32 %v6039_v55, %v5993_v48 }
0x1716   : > { %v5996_v2 = vpop.xlane.xlu1 %5995 }
0x1717   : > { %6060 = vst.msk [vmem:[%s10047_s14 + $0x10] sm:$0xff] %vm6057_vm2, %v6043_v43  ;;  %v6044_v0 = vadd.f32 %v6039_v55, %v5996_v2 }
0x1718   : > { %v5987_v6 = vpop.xlane.xlu0 %5986 }
0x1719   : > { %6061 = vst.msk [vmem:[%s10047_s14 + $0x18] sm:$0xff] %vm6057_vm2, %v6044_v0  ;;  %v6041_v19 = vadd.f32 %v6039_v55, %v5987_v6 }
0x171a   : > { %v5990_v44 = vpop.xlane.xlu1 %5989 }
0x171b   : > { %6058 = vst.msk [vmem:[%s10047_s14] sm:$0xff] %vm6057_vm2, %v6041_v19  ;;  %v6042_v25 = vadd.f32 %v6039_v55, %v5990_v44 }
0x171c   : > { %v6005_v37 = vpop.xlane.xlu0 %6004 }
0x171d   : > { %6059 = vst.msk [vmem:[%s10047_s14 + $0x8] sm:$0xff] %vm6057_vm2, %v6042_v25  ;;  %v6047_v27 = vadd.f32 %v6039_v55, %v6005_v37 }
0x171e   : > { %v6008_v35 = vpop.xlane.xlu1 %6007 }
0x171f   : > { %6064 = vst.msk [vmem:[%s10047_s14 + $0x30] sm:$0xff] %vm6057_vm2, %v6047_v27  ;;  %v6048_v57 = vadd.f32 %v6039_v55, %v6008_v35 }
0x1720   : > { %v5999_v52 = vpop.xlane.xlu0 %5998 }
0x1721   : > { %6065 = vst.msk [vmem:[%s10047_s14 + $0x38] sm:$0xff] %vm6057_vm2, %v6048_v57  ;;  %v6045_v18 = vadd.f32 %v6039_v55, %v5999_v52 }
0x1722   : > { %v6002_v58 = vpop.xlane.xlu1 %6001 }
0x1723   : > { %6062 = vst.msk [vmem:[%s10047_s14 + $0x20] sm:$0xff] %vm6057_vm2, %v6045_v18  ;;  %v6046_v36 = vadd.f32 %v6039_v55, %v6002_v58 }
0x1724   : > { %v6017_v8 = vpop.xlane.xlu0 %6016 }
0x1725   : > { %6063 = vst.msk [vmem:[%s10047_s14 + $0x28] sm:$0xff] %vm6057_vm2, %v6046_v36  ;;  %v6051_v30 = vadd.f32 %v6039_v55, %v6017_v8 }
0x1726   : > { %v6020_v3 = vpop.xlane.xlu1 %6019 }
0x1727   : > { %6068 = vst.msk [vmem:[%s10047_s14 + $0x50] sm:$0xff] %vm6057_vm2, %v6051_v30  ;;  %v6052_v63 = vadd.f32 %v6039_v55, %v6020_v3 }
0x1728   : > { %v6011_v42 = vpop.xlane.xlu0 %6010 }
0x1729   : > { %6069 = vst.msk [vmem:[%s10047_s14 + $0x58] sm:$0xff] %vm6057_vm2, %v6052_v63  ;;  %v6049_v51 = vadd.f32 %v6039_v55, %v6011_v42 }
0x172a   : > { %v6014_v59 = vpop.xlane.xlu1 %6013 }
0x172b   : > { %6066 = vst.msk [vmem:[%s10047_s14 + $0x40] sm:$0xff] %vm6057_vm2, %v6049_v51  ;;  %v6050_v23 = vadd.f32 %v6039_v55, %v6014_v59 }
0x172d   : > { %6067 = vst.msk [vmem:[%s10047_s14 + $0x48] sm:$0xff] %vm6057_vm2, %v6050_v23  ;;  %v6023_v34 = vpop.xlane.xlu0 %6022 }
0x172e   : > { %v6053_v62 = vadd.f32 %v6039_v55, %v6023_v34 }
0x172f   : > { %v6026_v29 = vpop.xlane.xlu1 %6025 }
0x1730   : > { %6070 = vst.msk [vmem:[%s10047_s14 + $0x60] sm:$0xff] %vm6057_vm2, %v6053_v62  ;;  %v6054_v9 = vadd.f32 %v6039_v55, %v6026_v29 }
0x1731   : > { %v6029_v32 = vpop.xlane.xlu0 %6028 }
0x1732   : > { %6071 = vst.msk [vmem:[%s10047_s14 + $0x68] sm:$0xff] %vm6057_vm2, %v6054_v9  ;;  %v6055_v15 = vadd.f32 %v6039_v55, %v6029_v32 }
0x1733   : > { %v6032_v49 = vpop.xlane.xlu1 %6031 }
0x1734   : > { %6072 = vst.msk [vmem:[%s10047_s14 + $0x70] sm:$0xff] %vm6057_vm2, %v6055_v15  ;;  %v6056_v61 = vadd.f32 %v6039_v55, %v6032_v49 }
0x1736   : > { %6073 = vst.msk [vmem:[%s10047_s14 + $0x78] sm:$0xff] %vm6057_vm2, %v6056_v61 }
0x1737 PF: > { %s21_s11 = sadd.s32 1, %s7875_s11  }
0x1738   : > { %p18_p4 = scmp.ge.s32.totalorder %s21_s11, 4  }
0x173a   :  { %20 = sbr.rel (!%p18_p4) target bundleno = 3 (0x3), region = 93 }

</bundles_post_ra>
